<compile_context>
chip_gen: v5e
topology: v5e:2x2
jax: 0.10.0
libtpu: 0.0.40
codegen_flags: <defaults>
</compile_context>

<pallas_src>
import math

import jax
import jax.numpy as jnp
from jax.experimental import pallas as pl
from jax.experimental.pallas import tpu as pltpu


def _round_up(x, m):
    return ((x + m - 1) // m) * m


# ----------------------------------------------------------------------------
# Fused kernel: all GRU layers + Linear + Sigmoid in one pallas_call.
#
# ref order: x2d, (w_ih, w_hh, bias_i, bias_h) * num_layers, w_fc, b_fc,
#            out, gi_scratch, hseq_scratch
#   x2d:   (T*Bp, Fp)      time-major, zero-padded input
#   w_ih:  (in_pad, 3*Hp)  gates laid out [r | z | n], each Hp-wide (lane aligned)
#   w_hh:  (Hp, 3*Hp)
#   bias_i:(1, 3*Hp)       [b_ih_r+b_hh_r | b_ih_z+b_hh_z | b_ih_n]
#   bias_h:(1, 3*Hp)       [0 | 0 | b_hh_n]
#   out:   (T*Bp, Hp)      lane-dense store
# ----------------------------------------------------------------------------
def _make_embedder_kernel(T, Bp, Hp, num_layers):
    H3 = 3 * Hp

    def kernel(*refs):
        x_ref = refs[0]
        layer_refs = refs[1:1 + 4 * num_layers]
        w_fc_ref = refs[1 + 4 * num_layers]
        b_fc_ref = refs[2 + 4 * num_layers]
        out_ref = refs[3 + 4 * num_layers]
        gi_ref = refs[4 + 4 * num_layers]      # (T*Bp, 3*Hp) VMEM scratch
        hseq_ref = refs[5 + 4 * num_layers]    # (T*Bp, Hp)   VMEM scratch

        def run_layer(inp_2d, w_ih_ref, w_hh_ref, bi_ref, bh_ref):
            # Hoisted, time-independent input projection: one big MXU matmul
            # over all timesteps (with the r/z biases already folded in).
            gi_ref[...] = (
                jnp.dot(inp_2d, w_ih_ref[...],
                        preferred_element_type=jnp.float32)
                + bi_ref[...])

            # Hoist weight load and bias broadcast out of the time loop
            # (JAX does not CSE broadcast_in_dim inside loops).
            w_hh = w_hh_ref[...]
            bh = jnp.broadcast_to(bh_ref[...], (Bp, H3))

            def step(t, h_prev):
                row = t * Bp                                  # sublane-aligned
                gi_t = gi_ref[pl.ds(row, Bp), :]              # (Bp, 3*Hp)
                gh = jnp.dot(h_prev, w_hh,
                             preferred_element_type=jnp.float32) + bh
                # PyTorch gate order r, z, n; each gate slab is 128-lane aligned.
                r = jax.nn.sigmoid(gi_t[:, 0:Hp] + gh[:, 0:Hp])
                z = jax.nn.sigmoid(gi_t[:, Hp:2 * Hp] + gh[:, Hp:2 * Hp])
                n = jnp.tanh(gi_t[:, 2 * Hp:] + r * gh[:, 2 * Hp:])
                h_new = (1.0 - z) * n + z * h_prev
                hseq_ref[pl.ds(row, Bp), :] = h_new
                return h_new

            jax.lax.fori_loop(0, T, step,
                              jnp.zeros((Bp, Hp), jnp.float32),
                              unroll=True)

        # Layer 0 consumes the padded input slab.
        run_layer(x_ref[...], *layer_refs[0:4])
        # Layers 1..L-1 consume the previous layer's VMEM-resident hidden
        # sequence. Inter-layer dropout is an eval-mode no-op.
        for layer in range(1, num_layers):
            run_layer(hseq_ref[...], *layer_refs[4 * layer:4 * layer + 4])

        # Fused Linear + Sigmoid over the whole (T*Bp, Hp) hidden sequence.
        y = (jnp.dot(hseq_ref[...], w_fc_ref[...],
                     preferred_element_type=jnp.float32) + b_fc_ref[...])
        out_ref[...] = jax.nn.sigmoid(y)

    return kernel


# ----------------------------------------------------------------------------
# Parameter init (deterministic, PyTorch-style uniform(-1/sqrt(H), 1/sqrt(H)))
# Stored transposed: w_ih_t (in, 3H), w_hh_t (H, 3H); gate order r, z, n.
# ----------------------------------------------------------------------------
def init_params(key, n_features, hidden_size, num_layers):
    H = hidden_size
    bound = 1.0 / math.sqrt(H)
    params = {"gru": [], "fc": None}
    for layer in range(num_layers):
        in_size = n_features if layer == 0 else H
        key, k1, k2, k3, k4 = jax.random.split(key, 5)
        params["gru"].append({
            "w_ih_t": jax.random.uniform(k1, (in_size, 3 * H), jnp.float32, -bound, bound),
            "w_hh_t": jax.random.uniform(k2, (H, 3 * H), jnp.float32, -bound, bound),
            "b_ih": jax.random.uniform(k3, (3 * H,), jnp.float32, -bound, bound),
            "b_hh": jax.random.uniform(k4, (3 * H,), jnp.float32, -bound, bound),
        })
    key, k1, k2 = jax.random.split(key, 3)
    params["fc"] = {
        "w_t": jax.random.uniform(k1, (H, H), jnp.float32, -bound, bound),
        "b": jax.random.uniform(k2, (H,), jnp.float32, -bound, bound),
    }
    return params


# ----------------------------------------------------------------------------
# Pack parameters into the padded, lane-aligned layout the kernel expects.
# ----------------------------------------------------------------------------
def pack_params(params, n_features, hidden_size, num_layers):
    H = hidden_size
    Hp = _round_up(H, 128)
    Fp = _round_up(n_features, 128)
    packed = []
    for layer in range(num_layers):
        lp = params["gru"][layer]
        in_size = n_features if layer == 0 else H
        in_pad = Fp if layer == 0 else Hp
        w_ih = jnp.zeros((in_pad, 3 * Hp), jnp.float32)
        w_hh = jnp.zeros((Hp, 3 * Hp), jnp.float32)
        for g in range(3):
            w_ih = w_ih.at[:in_size, g * Hp:g * Hp + H].set(
                lp["w_ih_t"][:, g * H:(g + 1) * H])
            w_hh = w_hh.at[:H, g * Hp:g * Hp + H].set(
                lp["w_hh_t"][:, g * H:(g + 1) * H])
        bi = jnp.zeros((1, 3 * Hp), jnp.float32)
        bh = jnp.zeros((1, 3 * Hp), jnp.float32)
        # fold b_ih + b_hh for r and z into the input-side bias
        bi = bi.at[0, 0 * Hp:0 * Hp + H].set(lp["b_ih"][0:H] + lp["b_hh"][0:H])
        bi = bi.at[0, 1 * Hp:1 * Hp + H].set(lp["b_ih"][H:2 * H] + lp["b_hh"][H:2 * H])
        bi = bi.at[0, 2 * Hp:2 * Hp + H].set(lp["b_ih"][2 * H:3 * H])
        # b_hh_n stays hidden-side (it is scaled by r inside the tanh gate)
        bh = bh.at[0, 2 * Hp:2 * Hp + H].set(lp["b_hh"][2 * H:3 * H])
        packed.extend([w_ih, w_hh, bi, bh])

    w_fc = jnp.zeros((Hp, Hp), jnp.float32).at[:H, :H].set(params["fc"]["w_t"])
    b_fc = jnp.zeros((1, Hp), jnp.float32).at[0, :H].set(params["fc"]["b"])
    packed.extend([w_fc, b_fc])
    return packed, Fp, Hp


# ----------------------------------------------------------------------------
# Forward pass (matches Embedder.forward semantics)
# ----------------------------------------------------------------------------
def embedder_forward(x_bft, params):
    """x_bft: (B, n_features, T) -> (B, T, H)."""
    B, F, T = x_bft.shape
    num_layers = len(params["gru"])
    H = params["fc"]["b"].shape[0]
    Bp = _round_up(B, 8)

    packed, Fp, Hp = pack_params(params, F, H, num_layers)

    # torch.permute(x, (0, 2, 1)) -> (B, T, F); kernel wants time-major and
    # padded (Bp sublanes, Fp lanes). This is a tiny one-shot XLA op.
    x_tbf = jnp.transpose(x_bft, (2, 0, 1))                     # (T, B, F)
    x_pad = jnp.zeros((T, Bp, Fp), jnp.float32).at[:, :B, :F].set(x_tbf)
    x2d = x_pad.reshape(T * Bp, Fp)

    kernel = _make_embedder_kernel(T, Bp, Hp, num_layers)
    operands = [x2d] + packed
    in_specs = [pl.BlockSpec(op.shape, lambda: (0, 0)) for op in operands]

    out2d = pl.pallas_call(
        kernel,
        out_shape=jax.ShapeDtypeStruct((T * Bp, Hp), jnp.float32),
        grid=(),                       # single fused step; recurrence is in-kernel
        in_specs=in_specs,
        out_specs=pl.BlockSpec((T * Bp, Hp), lambda: (0, 0)),
        scratch_shapes=[
            pltpu.VMEM((T * Bp, 3 * Hp), jnp.float32),   # GI slab (all timesteps)
            pltpu.VMEM((T * Bp, Hp), jnp.float32),       # per-layer hidden sequence
        ],
    )(*operands)

    # Strip padding (also discards sigmoid(0)=0.5 garbage in padded lanes/rows)
    out = out2d.reshape(T, Bp, Hp)[:, :B, :H]
    return jnp.transpose(out, (1, 0, 2))                        # (B, T, H)


# ----------------------------------------------------------------------------
# Pure-JAX reference (lax.scan GRU) for a correctness sanity check
# ----------------------------------------------------------------------------
def embedder_reference(x_bft, params):
    x = jnp.transpose(x_bft, (0, 2, 1))   # (B, T, F)
    h_seq = x
    for lp in params["gru"]:
        H = lp["w_hh_t"].shape[0]

        def step(h_prev, x_t, lp=lp, H=H):
            gi = x_t @ lp["w_ih_t"] + lp["b_ih"]
            gh = h_prev @ lp["w_hh_t"] + lp["b_hh"]
            i_r, i_z, i_n = gi[:, :H], gi[:, H:2 * H], gi[:, 2 * H:]
            h_r, h_z, h_n = gh[:, :H], gh[:, H:2 * H], gh[:, 2 * H:]
            r = jax.nn.sigmoid(i_r + h_r)
            z = jax.nn.sigmoid(i_z + h_z)
            n = jnp.tanh(i_n + r * h_n)
            h_new = (1.0 - z) * n + z * h_prev
            return h_new, h_new

        B = h_seq.shape[0]
        h0 = jnp.zeros((B, H), jnp.float32)
        _, hs = jax.lax.scan(step, h0, jnp.transpose(h_seq, (1, 0, 2)))
        h_seq = jnp.transpose(hs, (1, 0, 2))
    y = h_seq @ params["fc"]["w_t"] + params["fc"]["b"]
    return jax.nn.sigmoid(y)


if __name__ == "__main__":
    B, n_features, T = 2, 4, 8
    hidden_size, num_layers = 32, 2    # dropout ignored (eval mode / no-op)

    key = jax.random.PRNGKey(0)
    key, kx, kp = jax.random.split(key, 3)
    x = jax.random.normal(kx, (B, n_features, T), jnp.float32)
    params = init_params(kp, n_features, hidden_size, num_layers)

    out = embedder_forward(x, params)
    out = jax.block_until_ready(out)

    ref = embedder_reference(x, params)
    assert out.shape == (B, T, hidden_size)
    assert jnp.allclose(out, ref, atol=5e-5, rtol=5e-5), "mismatch vs reference"

    print("KERNEL_OK")
</pallas_src>

<mosaic_0001>
module attributes {stable_mosaic.version = 11 : i64} {
  func.func @kernel(%arg0: memref<64x128xf32, #tpu.memory_space<vmem>>, %arg1: memref<128x384xf32, #tpu.memory_space<vmem>>, %arg2: memref<128x384xf32, #tpu.memory_space<vmem>>, %arg3: memref<1x384xf32, #tpu.memory_space<vmem>>, %arg4: memref<1x384xf32, #tpu.memory_space<vmem>>, %arg5: memref<128x384xf32, #tpu.memory_space<vmem>>, %arg6: memref<128x384xf32, #tpu.memory_space<vmem>>, %arg7: memref<1x384xf32, #tpu.memory_space<vmem>>, %arg8: memref<1x384xf32, #tpu.memory_space<vmem>>, %arg9: memref<128x128xf32, #tpu.memory_space<vmem>>, %arg10: memref<1x128xf32, #tpu.memory_space<vmem>>, %arg11: memref<64x128xf32, #tpu.memory_space<vmem>>, %arg12: memref<64x384xf32, #tpu.memory_space<vmem>>, %arg13: memref<64x128xf32, #tpu.memory_space<vmem>>) attributes {dimension_semantics = [], scalar_prefetch = 0 : i64, scratch_operands = 2 : i64, tpu.core_type = #tpu.core_type<tc>} {
    %c0 = arith.constant 0 : index
    %c0_0 = arith.constant 0 : index
    %0 = vector.load %arg0[%c0, %c0_0] : memref<64x128xf32, #tpu.memory_space<vmem>>, vector<64x128xf32>
    %c0_1 = arith.constant 0 : index
    %c0_2 = arith.constant 0 : index
    %1 = vector.load %arg1[%c0_1, %c0_2] : memref<128x384xf32, #tpu.memory_space<vmem>>, vector<128x384xf32>
    %cst = arith.constant dense<0.000000e+00> : vector<64x384xf32>
    %2 = tpu.matmul %0, %1, %cst {dimension_numbers = #tpu.dot_dimension_numbers<[1], [0], [0], [1], [0, 0, 1, 1], [], []>} : vector<64x128xf32>, vector<128x384xf32>, vector<64x384xf32> -> vector<64x384xf32>
    %c0_3 = arith.constant 0 : index
    %c0_4 = arith.constant 0 : index
    %3 = vector.load %arg3[%c0_3, %c0_4] : memref<1x384xf32, #tpu.memory_space<vmem>>, vector<1x384xf32>
    %4 = vector.broadcast %3 : vector<1x384xf32> to vector<64x384xf32>
    %5 = arith.addf %2, %4 : vector<64x384xf32>
    %c0_5 = arith.constant 0 : index
    %c0_6 = arith.constant 0 : index
    %6 = vector.load %arg12[%c0_5, %c0_6] : memref<64x384xf32, #tpu.memory_space<vmem>>, vector<64x384xf32>
    tpu.vector_store %arg12[%c0_5, %c0_6], %5 {strides = array<i32>} : memref<64x384xf32, #tpu.memory_space<vmem>>, vector<64x384xf32>,
    %c0_7 = arith.constant 0 : index
    %c0_8 = arith.constant 0 : index
    %7 = vector.load %arg2[%c0_7, %c0_8] : memref<128x384xf32, #tpu.memory_space<vmem>>, vector<128x384xf32>
    %c0_9 = arith.constant 0 : index
    %c0_10 = arith.constant 0 : index
    %8 = vector.load %arg4[%c0_9, %c0_10] : memref<1x384xf32, #tpu.memory_space<vmem>>, vector<1x384xf32>
    %9 = vector.shape_cast %8 : vector<1x384xf32> to vector<1x384xf32>
    %10 = vector.broadcast %9 : vector<1x384xf32> to vector<8x384xf32>
    %cst_11 = arith.constant 0.000000e+00 : f32
    %11 = vector.broadcast %cst_11 : f32 to vector<8x128xf32>
    %c0_i32 = arith.constant 0 : i32
    %c8_i32 = arith.constant 8 : i32
    %12 = arith.muli %c0_i32, %c8_i32 : i32
    %13 = arith.index_cast %12 : i32 to index
    %c0_12 = arith.constant 0 : index
    %14 = vector.load %arg12[%13, %c0_12] : memref<64x384xf32, #tpu.memory_space<vmem>>, vector<8x384xf32>
    %cst_13 = arith.constant dense<0.000000e+00> : vector<8x384xf32>
    %15 = tpu.matmul %11, %7, %cst_13 {dimension_numbers = #tpu.dot_dimension_numbers<[1], [0], [0], [1], [0, 0, 1, 1], [], []>} : vector<8x128xf32>, vector<128x384xf32>, vector<8x384xf32> -> vector<8x384xf32>
    %16 = arith.addf %15, %10 : vector<8x384xf32>
    %17 = vector.extract_strided_slice %14 {offsets = [0, 0], sizes = [8, 128], strides = [1, 1]} : vector<8x384xf32> to vector<8x128xf32>
    %18 = vector.extract_strided_slice %16 {offsets = [0, 0], sizes = [8, 128], strides = [1, 1]} : vector<8x384xf32> to vector<8x128xf32>
    %19 = arith.addf %17, %18 : vector<8x128xf32>
    %20 = arith.negf %19 : vector<8x128xf32>
    %21 = math.exp %20 : vector<8x128xf32>
    %cst_14 = arith.constant 1.000000e+00 : f32
    %22 = vector.broadcast %cst_14 : f32 to vector<8x128xf32>
    %23 = arith.addf %22, %21 : vector<8x128xf32>
    %24 = arith.divf %22, %23 : vector<8x128xf32>
    %25 = vector.extract_strided_slice %14 {offsets = [0, 128], sizes = [8, 128], strides = [1, 1]} : vector<8x384xf32> to vector<8x128xf32>
    %26 = vector.extract_strided_slice %16 {offsets = [0, 128], sizes = [8, 128], strides = [1, 1]} : vector<8x384xf32> to vector<8x128xf32>
    %27 = arith.addf %25, %26 : vector<8x128xf32>
    %28 = arith.negf %27 : vector<8x128xf32>
    %29 = math.exp %28 : vector<8x128xf32>
    %cst_15 = arith.constant 1.000000e+00 : f32
    %30 = vector.broadcast %cst_15 : f32 to vector<8x128xf32>
    %31 = arith.addf %30, %29 : vector<8x128xf32>
    %32 = arith.divf %30, %31 : vector<8x128xf32>
    %33 = vector.extract_strided_slice %14 {offsets = [0, 256], sizes = [8, 128], strides = [1, 1]} : vector<8x384xf32> to vector<8x128xf32>
    %34 = vector.extract_strided_slice %16 {offsets = [0, 256], sizes = [8, 128], strides = [1, 1]} : vector<8x384xf32> to vector<8x128xf32>
    %35 = arith.mulf %24, %34 : vector<8x128xf32>
    %36 = arith.addf %33, %35 : vector<8x128xf32>
    %37 = math.tanh %36 : vector<8x128xf32>
    %cst_16 = arith.constant 1.000000e+00 : f32
    %38 = vector.broadcast %cst_16 : f32 to vector<8x128xf32>
    %39 = arith.subf %38, %32 : vector<8x128xf32>
    %40 = arith.mulf %39, %37 : vector<8x128xf32>
    %41 = arith.mulf %32, %11 : vector<8x128xf32>
    %42 = arith.addf %40, %41 : vector<8x128xf32>
    %43 = arith.index_cast %12 : i32 to index
    %c0_17 = arith.constant 0 : index
    %44 = vector.load %arg13[%43, %c0_17] : memref<64x128xf32, #tpu.memory_space<vmem>>, vector<8x128xf32>
    tpu.vector_store %arg13[%43, %c0_17], %42 {strides = array<i32>} : memref<64x128xf32, #tpu.memory_space<vmem>>, vector<8x128xf32>,
    %c1_i32 = arith.constant 1 : i32
    %c8_i32_18 = arith.constant 8 : i32
    %45 = arith.muli %c1_i32, %c8_i32_18 : i32
    %46 = arith.index_cast %45 : i32 to index
    %c0_19 = arith.constant 0 : index
    %47 = vector.load %arg12[%46, %c0_19] : memref<64x384xf32, #tpu.memory_space<vmem>>, vector<8x384xf32>
    %cst_20 = arith.constant dense<0.000000e+00> : vector<8x384xf32>
    %48 = tpu.matmul %42, %7, %cst_20 {dimension_numbers = #tpu.dot_dimension_numbers<[1], [0], [0], [1], [0, 0, 1, 1], [], []>} : vector<8x128xf32>, vector<128x384xf32>, vector<8x384xf32> -> vector<8x384xf32>
    %49 = arith.addf %48, %10 : vector<8x384xf32>
    %50 = vector.extract_strided_slice %47 {offsets = [0, 0], sizes = [8, 128], strides = [1, 1]} : vector<8x384xf32> to vector<8x128xf32>
    %51 = vector.extract_strided_slice %49 {offsets = [0, 0], sizes = [8, 128], strides = [1, 1]} : vector<8x384xf32> to vector<8x128xf32>
    %52 = arith.addf %50, %51 : vector<8x128xf32>
    %53 = arith.negf %52 : vector<8x128xf32>
    %54 = math.exp %53 : vector<8x128xf32>
    %cst_21 = arith.constant 1.000000e+00 : f32
    %55 = vector.broadcast %cst_21 : f32 to vector<8x128xf32>
    %56 = arith.addf %55, %54 : vector<8x128xf32>
    %57 = arith.divf %55, %56 : vector<8x128xf32>
    %58 = vector.extract_strided_slice %47 {offsets = [0, 128], sizes = [8, 128], strides = [1, 1]} : vector<8x384xf32> to vector<8x128xf32>
    %59 = vector.extract_strided_slice %49 {offsets = [0, 128], sizes = [8, 128], strides = [1, 1]} : vector<8x384xf32> to vector<8x128xf32>
    %60 = arith.addf %58, %59 : vector<8x128xf32>
    %61 = arith.negf %60 : vector<8x128xf32>
    %62 = math.exp %61 : vector<8x128xf32>
    %cst_22 = arith.constant 1.000000e+00 : f32
    %63 = vector.broadcast %cst_22 : f32 to vector<8x128xf32>
    %64 = arith.addf %63, %62 : vector<8x128xf32>
    %65 = arith.divf %63, %64 : vector<8x128xf32>
    %66 = vector.extract_strided_slice %47 {offsets = [0, 256], sizes = [8, 128], strides = [1, 1]} : vector<8x384xf32> to vector<8x128xf32>
    %67 = vector.extract_strided_slice %49 {offsets = [0, 256], sizes = [8, 128], strides = [1, 1]} : vector<8x384xf32> to vector<8x128xf32>
    %68 = arith.mulf %57, %67 : vector<8x128xf32>
    %69 = arith.addf %66, %68 : vector<8x128xf32>
    %70 = math.tanh %69 : vector<8x128xf32>
    %cst_23 = arith.constant 1.000000e+00 : f32
    %71 = vector.broadcast %cst_23 : f32 to vector<8x128xf32>
    %72 = arith.subf %71, %65 : vector<8x128xf32>
    %73 = arith.mulf %72, %70 : vector<8x128xf32>
    %74 = arith.mulf %65, %42 : vector<8x128xf32>
    %75 = arith.addf %73, %74 : vector<8x128xf32>
    %76 = arith.index_cast %45 : i32 to index
    %c0_24 = arith.constant 0 : index
    %77 = vector.load %arg13[%76, %c0_24] : memref<64x128xf32, #tpu.memory_space<vmem>>, vector<8x128xf32>
    tpu.vector_store %arg13[%76, %c0_24], %75 {strides = array<i32>} : memref<64x128xf32, #tpu.memory_space<vmem>>, vector<8x128xf32>,
    %c2_i32 = arith.constant 2 : i32
    %c8_i32_25 = arith.constant 8 : i32
    %78 = arith.muli %c2_i32, %c8_i32_25 : i32
    %79 = arith.index_cast %78 : i32 to index
    %c0_26 = arith.constant 0 : index
    %80 = vector.load %arg12[%79, %c0_26] : memref<64x384xf32, #tpu.memory_space<vmem>>, vector<8x384xf32>
    %cst_27 = arith.constant dense<0.000000e+00> : vector<8x384xf32>
    %81 = tpu.matmul %75, %7, %cst_27 {dimension_numbers = #tpu.dot_dimension_numbers<[1], [0], [0], [1], [0, 0, 1, 1], [], []>} : vector<8x128xf32>, vector<128x384xf32>, vector<8x384xf32> -> vector<8x384xf32>
    %82 = arith.addf %81, %10 : vector<8x384xf32>
    %83 = vector.extract_strided_slice %80 {offsets = [0, 0], sizes = [8, 128], strides = [1, 1]} : vector<8x384xf32> to vector<8x128xf32>
    %84 = vector.extract_strided_slice %82 {offsets = [0, 0], sizes = [8, 128], strides = [1, 1]} : vector<8x384xf32> to vector<8x128xf32>
    %85 = arith.addf %83, %84 : vector<8x128xf32>
    %86 = arith.negf %85 : vector<8x128xf32>
    %87 = math.exp %86 : vector<8x128xf32>
    %cst_28 = arith.constant 1.000000e+00 : f32
    %88 = vector.broadcast %cst_28 : f32 to vector<8x128xf32>
    %89 = arith.addf %88, %87 : vector<8x128xf32>
    %90 = arith.divf %88, %89 : vector<8x128xf32>
    %91 = vector.extract_strided_slice %80 {offsets = [0, 128], sizes = [8, 128], strides = [1, 1]} : vector<8x384xf32> to vector<8x128xf32>
    %92 = vector.extract_strided_slice %82 {offsets = [0, 128], sizes = [8, 128], strides = [1, 1]} : vector<8x384xf32> to vector<8x128xf32>
    %93 = arith.addf %91, %92 : vector<8x128xf32>
    %94 = arith.negf %93 : vector<8x128xf32>
    %95 = math.exp %94 : vector<8x128xf32>
    %cst_29 = arith.constant 1.000000e+00 : f32
    %96 = vector.broadcast %cst_29 : f32 to vector<8x128xf32>
    %97 = arith.addf %96, %95 : vector<8x128xf32>
    %98 = arith.divf %96, %97 : vector<8x128xf32>
    %99 = vector.extract_strided_slice %80 {offsets = [0, 256], sizes = [8, 128], strides = [1, 1]} : vector<8x384xf32> to vector<8x128xf32>
    %100 = vector.extract_strided_slice %82 {offsets = [0, 256], sizes = [8, 128], strides = [1, 1]} : vector<8x384xf32> to vector<8x128xf32>
    %101 = arith.mulf %90, %100 : vector<8x128xf32>
    %102 = arith.addf %99, %101 : vector<8x128xf32>
    %103 = math.tanh %102 : vector<8x128xf32>
    %cst_30 = arith.constant 1.000000e+00 : f32
    %104 = vector.broadcast %cst_30 : f32 to vector<8x128xf32>
    %105 = arith.subf %104, %98 : vector<8x128xf32>
    %106 = arith.mulf %105, %103 : vector<8x128xf32>
    %107 = arith.mulf %98, %75 : vector<8x128xf32>
    %108 = arith.addf %106, %107 : vector<8x128xf32>
    %109 = arith.index_cast %78 : i32 to index
    %c0_31 = arith.constant 0 : index
    %110 = vector.load %arg13[%109, %c0_31] : memref<64x128xf32, #tpu.memory_space<vmem>>, vector<8x128xf32>
    tpu.vector_store %arg13[%109, %c0_31], %108 {strides = array<i32>} : memref<64x128xf32, #tpu.memory_space<vmem>>, vector<8x128xf32>,
    %c3_i32 = arith.constant 3 : i32
    %c8_i32_32 = arith.constant 8 : i32
    %111 = arith.muli %c3_i32, %c8_i32_32 : i32
    %112 = arith.index_cast %111 : i32 to index
    %c0_33 = arith.constant 0 : index
    %113 = vector.load %arg12[%112, %c0_33] : memref<64x384xf32, #tpu.memory_space<vmem>>, vector<8x384xf32>
    %cst_34 = arith.constant dense<0.000000e+00> : vector<8x384xf32>
    %114 = tpu.matmul %108, %7, %cst_34 {dimension_numbers = #tpu.dot_dimension_numbers<[1], [0], [0], [1], [0, 0, 1, 1], [], []>} : vector<8x128xf32>, vector<128x384xf32>, vector<8x384xf32> -> vector<8x384xf32>
    %115 = arith.addf %114, %10 : vector<8x384xf32>
    %116 = vector.extract_strided_slice %113 {offsets = [0, 0], sizes = [8, 128], strides = [1, 1]} : vector<8x384xf32> to vector<8x128xf32>
    %117 = vector.extract_strided_slice %115 {offsets = [0, 0], sizes = [8, 128], strides = [1, 1]} : vector<8x384xf32> to vector<8x128xf32>
    %118 = arith.addf %116, %117 : vector<8x128xf32>
    %119 = arith.negf %118 : vector<8x128xf32>
    %120 = math.exp %119 : vector<8x128xf32>
    %cst_35 = arith.constant 1.000000e+00 : f32
    %121 = vector.broadcast %cst_35 : f32 to vector<8x128xf32>
    %122 = arith.addf %121, %120 : vector<8x128xf32>
    %123 = arith.divf %121, %122 : vector<8x128xf32>
    %124 = vector.extract_strided_slice %113 {offsets = [0, 128], sizes = [8, 128], strides = [1, 1]} : vector<8x384xf32> to vector<8x128xf32>
    %125 = vector.extract_strided_slice %115 {offsets = [0, 128], sizes = [8, 128], strides = [1, 1]} : vector<8x384xf32> to vector<8x128xf32>
    %126 = arith.addf %124, %125 : vector<8x128xf32>
    %127 = arith.negf %126 : vector<8x128xf32>
    %128 = math.exp %127 : vector<8x128xf32>
    %cst_36 = arith.constant 1.000000e+00 : f32
    %129 = vector.broadcast %cst_36 : f32 to vector<8x128xf32>
    %130 = arith.addf %129, %128 : vector<8x128xf32>
    %131 = arith.divf %129, %130 : vector<8x128xf32>
    %132 = vector.extract_strided_slice %113 {offsets = [0, 256], sizes = [8, 128], strides = [1, 1]} : vector<8x384xf32> to vector<8x128xf32>
    %133 = vector.extract_strided_slice %115 {offsets = [0, 256], sizes = [8, 128], strides = [1, 1]} : vector<8x384xf32> to vector<8x128xf32>
    %134 = arith.mulf %123, %133 : vector<8x128xf32>
    %135 = arith.addf %132, %134 : vector<8x128xf32>
    %136 = math.tanh %135 : vector<8x128xf32>
    %cst_37 = arith.constant 1.000000e+00 : f32
    %137 = vector.broadcast %cst_37 : f32 to vector<8x128xf32>
    %138 = arith.subf %137, %131 : vector<8x128xf32>
    %139 = arith.mulf %138, %136 : vector<8x128xf32>
    %140 = arith.mulf %131, %108 : vector<8x128xf32>
    %141 = arith.addf %139, %140 : vector<8x128xf32>
    %142 = arith.index_cast %111 : i32 to index
    %c0_38 = arith.constant 0 : index
    %143 = vector.load %arg13[%142, %c0_38] : memref<64x128xf32, #tpu.memory_space<vmem>>, vector<8x128xf32>
    tpu.vector_store %arg13[%142, %c0_38], %141 {strides = array<i32>} : memref<64x128xf32, #tpu.memory_space<vmem>>, vector<8x128xf32>,
    %c4_i32 = arith.constant 4 : i32
    %c8_i32_39 = arith.constant 8 : i32
    %144 = arith.muli %c4_i32, %c8_i32_39 : i32
    %145 = arith.index_cast %144 : i32 to index
    %c0_40 = arith.constant 0 : index
    %146 = vector.load %arg12[%145, %c0_40] : memref<64x384xf32, #tpu.memory_space<vmem>>, vector<8x384xf32>
    %cst_41 = arith.constant dense<0.000000e+00> : vector<8x384xf32>
    %147 = tpu.matmul %141, %7, %cst_41 {dimension_numbers = #tpu.dot_dimension_numbers<[1], [0], [0], [1], [0, 0, 1, 1], [], []>} : vector<8x128xf32>, vector<128x384xf32>, vector<8x384xf32> -> vector<8x384xf32>
    %148 = arith.addf %147, %10 : vector<8x384xf32>
    %149 = vector.extract_strided_slice %146 {offsets = [0, 0], sizes = [8, 128], strides = [1, 1]} : vector<8x384xf32> to vector<8x128xf32>
    %150 = vector.extract_strided_slice %148 {offsets = [0, 0], sizes = [8, 128], strides = [1, 1]} : vector<8x384xf32> to vector<8x128xf32>
    %151 = arith.addf %149, %150 : vector<8x128xf32>
    %152 = arith.negf %151 : vector<8x128xf32>
    %153 = math.exp %152 : vector<8x128xf32>
    %cst_42 = arith.constant 1.000000e+00 : f32
    %154 = vector.broadcast %cst_42 : f32 to vector<8x128xf32>
    %155 = arith.addf %154, %153 : vector<8x128xf32>
    %156 = arith.divf %154, %155 : vector<8x128xf32>
    %157 = vector.extract_strided_slice %146 {offsets = [0, 128], sizes = [8, 128], strides = [1, 1]} : vector<8x384xf32> to vector<8x128xf32>
    %158 = vector.extract_strided_slice %148 {offsets = [0, 128], sizes = [8, 128], strides = [1, 1]} : vector<8x384xf32> to vector<8x128xf32>
    %159 = arith.addf %157, %158 : vector<8x128xf32>
    %160 = arith.negf %159 : vector<8x128xf32>
    %161 = math.exp %160 : vector<8x128xf32>
    %cst_43 = arith.constant 1.000000e+00 : f32
    %162 = vector.broadcast %cst_43 : f32 to vector<8x128xf32>
    %163 = arith.addf %162, %161 : vector<8x128xf32>
    %164 = arith.divf %162, %163 : vector<8x128xf32>
    %165 = vector.extract_strided_slice %146 {offsets = [0, 256], sizes = [8, 128], strides = [1, 1]} : vector<8x384xf32> to vector<8x128xf32>
    %166 = vector.extract_strided_slice %148 {offsets = [0, 256], sizes = [8, 128], strides = [1, 1]} : vector<8x384xf32> to vector<8x128xf32>
    %167 = arith.mulf %156, %166 : vector<8x128xf32>
    %168 = arith.addf %165, %167 : vector<8x128xf32>
    %169 = math.tanh %168 : vector<8x128xf32>
    %cst_44 = arith.constant 1.000000e+00 : f32
    %170 = vector.broadcast %cst_44 : f32 to vector<8x128xf32>
    %171 = arith.subf %170, %164 : vector<8x128xf32>
    %172 = arith.mulf %171, %169 : vector<8x128xf32>
    %173 = arith.mulf %164, %141 : vector<8x128xf32>
    %174 = arith.addf %172, %173 : vector<8x128xf32>
    %175 = arith.index_cast %144 : i32 to index
    %c0_45 = arith.constant 0 : index
    %176 = vector.load %arg13[%175, %c0_45] : memref<64x128xf32, #tpu.memory_space<vmem>>, vector<8x128xf32>
    tpu.vector_store %arg13[%175, %c0_45], %174 {strides = array<i32>} : memref<64x128xf32, #tpu.memory_space<vmem>>, vector<8x128xf32>,
    %c5_i32 = arith.constant 5 : i32
    %c8_i32_46 = arith.constant 8 : i32
    %177 = arith.muli %c5_i32, %c8_i32_46 : i32
    %178 = arith.index_cast %177 : i32 to index
    %c0_47 = arith.constant 0 : index
    %179 = vector.load %arg12[%178, %c0_47] : memref<64x384xf32, #tpu.memory_space<vmem>>, vector<8x384xf32>
    %cst_48 = arith.constant dense<0.000000e+00> : vector<8x384xf32>
    %180 = tpu.matmul %174, %7, %cst_48 {dimension_numbers = #tpu.dot_dimension_numbers<[1], [0], [0], [1], [0, 0, 1, 1], [], []>} : vector<8x128xf32>, vector<128x384xf32>, vector<8x384xf32> -> vector<8x384xf32>
    %181 = arith.addf %180, %10 : vector<8x384xf32>
    %182 = vector.extract_strided_slice %179 {offsets = [0, 0], sizes = [8, 128], strides = [1, 1]} : vector<8x384xf32> to vector<8x128xf32>
    %183 = vector.extract_strided_slice %181 {offsets = [0, 0], sizes = [8, 128], strides = [1, 1]} : vector<8x384xf32> to vector<8x128xf32>
    %184 = arith.addf %182, %183 : vector<8x128xf32>
    %185 = arith.negf %184 : vector<8x128xf32>
    %186 = math.exp %185 : vector<8x128xf32>
    %cst_49 = arith.constant 1.000000e+00 : f32
    %187 = vector.broadcast %cst_49 : f32 to vector<8x128xf32>
    %188 = arith.addf %187, %186 : vector<8x128xf32>
    %189 = arith.divf %187, %188 : vector<8x128xf32>
    %190 = vector.extract_strided_slice %179 {offsets = [0, 128], sizes = [8, 128], strides = [1, 1]} : vector<8x384xf32> to vector<8x128xf32>
    %191 = vector.extract_strided_slice %181 {offsets = [0, 128], sizes = [8, 128], strides = [1, 1]} : vector<8x384xf32> to vector<8x128xf32>
    %192 = arith.addf %190, %191 : vector<8x128xf32>
    %193 = arith.negf %192 : vector<8x128xf32>
    %194 = math.exp %193 : vector<8x128xf32>
    %cst_50 = arith.constant 1.000000e+00 : f32
    %195 = vector.broadcast %cst_50 : f32 to vector<8x128xf32>
    %196 = arith.addf %195, %194 : vector<8x128xf32>
    %197 = arith.divf %195, %196 : vector<8x128xf32>
    %198 = vector.extract_strided_slice %179 {offsets = [0, 256], sizes = [8, 128], strides = [1, 1]} : vector<8x384xf32> to vector<8x128xf32>
    %199 = vector.extract_strided_slice %181 {offsets = [0, 256], sizes = [8, 128], strides = [1, 1]} : vector<8x384xf32> to vector<8x128xf32>
    %200 = arith.mulf %189, %199 : vector<8x128xf32>
    %201 = arith.addf %198, %200 : vector<8x128xf32>
    %202 = math.tanh %201 : vector<8x128xf32>
    %cst_51 = arith.constant 1.000000e+00 : f32
    %203 = vector.broadcast %cst_51 : f32 to vector<8x128xf32>
    %204 = arith.subf %203, %197 : vector<8x128xf32>
    %205 = arith.mulf %204, %202 : vector<8x128xf32>
    %206 = arith.mulf %197, %174 : vector<8x128xf32>
    %207 = arith.addf %205, %206 : vector<8x128xf32>
    %208 = arith.index_cast %177 : i32 to index
    %c0_52 = arith.constant 0 : index
    %209 = vector.load %arg13[%208, %c0_52] : memref<64x128xf32, #tpu.memory_space<vmem>>, vector<8x128xf32>
    tpu.vector_store %arg13[%208, %c0_52], %207 {strides = array<i32>} : memref<64x128xf32, #tpu.memory_space<vmem>>, vector<8x128xf32>,
    %c6_i32 = arith.constant 6 : i32
    %c8_i32_53 = arith.constant 8 : i32
    %210 = arith.muli %c6_i32, %c8_i32_53 : i32
    %211 = arith.index_cast %210 : i32 to index
    %c0_54 = arith.constant 0 : index
    %212 = vector.load %arg12[%211, %c0_54] : memref<64x384xf32, #tpu.memory_space<vmem>>, vector<8x384xf32>
    %cst_55 = arith.constant dense<0.000000e+00> : vector<8x384xf32>
    %213 = tpu.matmul %207, %7, %cst_55 {dimension_numbers = #tpu.dot_dimension_numbers<[1], [0], [0], [1], [0, 0, 1, 1], [], []>} : vector<8x128xf32>, vector<128x384xf32>, vector<8x384xf32> -> vector<8x384xf32>
    %214 = arith.addf %213, %10 : vector<8x384xf32>
    %215 = vector.extract_strided_slice %212 {offsets = [0, 0], sizes = [8, 128], strides = [1, 1]} : vector<8x384xf32> to vector<8x128xf32>
    %216 = vector.extract_strided_slice %214 {offsets = [0, 0], sizes = [8, 128], strides = [1, 1]} : vector<8x384xf32> to vector<8x128xf32>
    %217 = arith.addf %215, %216 : vector<8x128xf32>
    %218 = arith.negf %217 : vector<8x128xf32>
    %219 = math.exp %218 : vector<8x128xf32>
    %cst_56 = arith.constant 1.000000e+00 : f32
    %220 = vector.broadcast %cst_56 : f32 to vector<8x128xf32>
    %221 = arith.addf %220, %219 : vector<8x128xf32>
    %222 = arith.divf %220, %221 : vector<8x128xf32>
    %223 = vector.extract_strided_slice %212 {offsets = [0, 128], sizes = [8, 128], strides = [1, 1]} : vector<8x384xf32> to vector<8x128xf32>
    %224 = vector.extract_strided_slice %214 {offsets = [0, 128], sizes = [8, 128], strides = [1, 1]} : vector<8x384xf32> to vector<8x128xf32>
    %225 = arith.addf %223, %224 : vector<8x128xf32>
    %226 = arith.negf %225 : vector<8x128xf32>
    %227 = math.exp %226 : vector<8x128xf32>
    %cst_57 = arith.constant 1.000000e+00 : f32
    %228 = vector.broadcast %cst_57 : f32 to vector<8x128xf32>
    %229 = arith.addf %228, %227 : vector<8x128xf32>
    %230 = arith.divf %228, %229 : vector<8x128xf32>
    %231 = vector.extract_strided_slice %212 {offsets = [0, 256], sizes = [8, 128], strides = [1, 1]} : vector<8x384xf32> to vector<8x128xf32>
    %232 = vector.extract_strided_slice %214 {offsets = [0, 256], sizes = [8, 128], strides = [1, 1]} : vector<8x384xf32> to vector<8x128xf32>
    %233 = arith.mulf %222, %232 : vector<8x128xf32>
    %234 = arith.addf %231, %233 : vector<8x128xf32>
    %235 = math.tanh %234 : vector<8x128xf32>
    %cst_58 = arith.constant 1.000000e+00 : f32
    %236 = vector.broadcast %cst_58 : f32 to vector<8x128xf32>
    %237 = arith.subf %236, %230 : vector<8x128xf32>
    %238 = arith.mulf %237, %235 : vector<8x128xf32>
    %239 = arith.mulf %230, %207 : vector<8x128xf32>
    %240 = arith.addf %238, %239 : vector<8x128xf32>
    %241 = arith.index_cast %210 : i32 to index
    %c0_59 = arith.constant 0 : index
    %242 = vector.load %arg13[%241, %c0_59] : memref<64x128xf32, #tpu.memory_space<vmem>>, vector<8x128xf32>
    tpu.vector_store %arg13[%241, %c0_59], %240 {strides = array<i32>} : memref<64x128xf32, #tpu.memory_space<vmem>>, vector<8x128xf32>,
    %c7_i32 = arith.constant 7 : i32
    %c8_i32_60 = arith.constant 8 : i32
    %243 = arith.muli %c7_i32, %c8_i32_60 : i32
    %244 = arith.index_cast %243 : i32 to index
    %c0_61 = arith.constant 0 : index
    %245 = vector.load %arg12[%244, %c0_61] : memref<64x384xf32, #tpu.memory_space<vmem>>, vector<8x384xf32>
    %cst_62 = arith.constant dense<0.000000e+00> : vector<8x384xf32>
    %246 = tpu.matmul %240, %7, %cst_62 {dimension_numbers = #tpu.dot_dimension_numbers<[1], [0], [0], [1], [0, 0, 1, 1], [], []>} : vector<8x128xf32>, vector<128x384xf32>, vector<8x384xf32> -> vector<8x384xf32>
    %247 = arith.addf %246, %10 : vector<8x384xf32>
    %248 = vector.extract_strided_slice %245 {offsets = [0, 0], sizes = [8, 128], strides = [1, 1]} : vector<8x384xf32> to vector<8x128xf32>
    %249 = vector.extract_strided_slice %247 {offsets = [0, 0], sizes = [8, 128], strides = [1, 1]} : vector<8x384xf32> to vector<8x128xf32>
    %250 = arith.addf %248, %249 : vector<8x128xf32>
    %251 = arith.negf %250 : vector<8x128xf32>
    %252 = math.exp %251 : vector<8x128xf32>
    %cst_63 = arith.constant 1.000000e+00 : f32
    %253 = vector.broadcast %cst_63 : f32 to vector<8x128xf32>
    %254 = arith.addf %253, %252 : vector<8x128xf32>
    %255 = arith.divf %253, %254 : vector<8x128xf32>
    %256 = vector.extract_strided_slice %245 {offsets = [0, 128], sizes = [8, 128], strides = [1, 1]} : vector<8x384xf32> to vector<8x128xf32>
    %257 = vector.extract_strided_slice %247 {offsets = [0, 128], sizes = [8, 128], strides = [1, 1]} : vector<8x384xf32> to vector<8x128xf32>
    %258 = arith.addf %256, %257 : vector<8x128xf32>
    %259 = arith.negf %258 : vector<8x128xf32>
    %260 = math.exp %259 : vector<8x128xf32>
    %cst_64 = arith.constant 1.000000e+00 : f32
    %261 = vector.broadcast %cst_64 : f32 to vector<8x128xf32>
    %262 = arith.addf %261, %260 : vector<8x128xf32>
    %263 = arith.divf %261, %262 : vector<8x128xf32>
    %264 = vector.extract_strided_slice %245 {offsets = [0, 256], sizes = [8, 128], strides = [1, 1]} : vector<8x384xf32> to vector<8x128xf32>
    %265 = vector.extract_strided_slice %247 {offsets = [0, 256], sizes = [8, 128], strides = [1, 1]} : vector<8x384xf32> to vector<8x128xf32>
    %266 = arith.mulf %255, %265 : vector<8x128xf32>
    %267 = arith.addf %264, %266 : vector<8x128xf32>
    %268 = math.tanh %267 : vector<8x128xf32>
    %cst_65 = arith.constant 1.000000e+00 : f32
    %269 = vector.broadcast %cst_65 : f32 to vector<8x128xf32>
    %270 = arith.subf %269, %263 : vector<8x128xf32>
    %271 = arith.mulf %270, %268 : vector<8x128xf32>
    %272 = arith.mulf %263, %240 : vector<8x128xf32>
    %273 = arith.addf %271, %272 : vector<8x128xf32>
    %274 = arith.index_cast %243 : i32 to index
    %c0_66 = arith.constant 0 : index
    %275 = vector.load %arg13[%274, %c0_66] : memref<64x128xf32, #tpu.memory_space<vmem>>, vector<8x128xf32>
    tpu.vector_store %arg13[%274, %c0_66], %273 {strides = array<i32>} : memref<64x128xf32, #tpu.memory_space<vmem>>, vector<8x128xf32>,
    %c8_i32_67 = arith.constant 8 : i32
    %c0_68 = arith.constant 0 : index
    %c0_69 = arith.constant 0 : index
    %276 = vector.load %arg13[%c0_68, %c0_69] : memref<64x128xf32, #tpu.memory_space<vmem>>, vector<64x128xf32>
    %c0_70 = arith.constant 0 : index
    %c0_71 = arith.constant 0 : index
    %277 = vector.load %arg5[%c0_70, %c0_71] : memref<128x384xf32, #tpu.memory_space<vmem>>, vector<128x384xf32>
    %cst_72 = arith.constant dense<0.000000e+00> : vector<64x384xf32>
    %278 = tpu.matmul %276, %277, %cst_72 {dimension_numbers = #tpu.dot_dimension_numbers<[1], [0], [0], [1], [0, 0, 1, 1], [], []>} : vector<64x128xf32>, vector<128x384xf32>, vector<64x384xf32> -> vector<64x384xf32>
    %c0_73 = arith.constant 0 : index
    %c0_74 = arith.constant 0 : index
    %279 = vector.load %arg7[%c0_73, %c0_74] : memref<1x384xf32, #tpu.memory_space<vmem>>, vector<1x384xf32>
    %280 = vector.broadcast %279 : vector<1x384xf32> to vector<64x384xf32>
    %281 = arith.addf %278, %280 : vector<64x384xf32>
    %c0_75 = arith.constant 0 : index
    %c0_76 = arith.constant 0 : index
    %282 = vector.load %arg12[%c0_75, %c0_76] : memref<64x384xf32, #tpu.memory_space<vmem>>, vector<64x384xf32>
    tpu.vector_store %arg12[%c0_75, %c0_76], %281 {strides = array<i32>} : memref<64x384xf32, #tpu.memory_space<vmem>>, vector<64x384xf32>,
    %c0_77 = arith.constant 0 : index
    %c0_78 = arith.constant 0 : index
    %283 = vector.load %arg6[%c0_77, %c0_78] : memref<128x384xf32, #tpu.memory_space<vmem>>, vector<128x384xf32>
    %c0_79 = arith.constant 0 : index
    %c0_80 = arith.constant 0 : index
    %284 = vector.load %arg8[%c0_79, %c0_80] : memref<1x384xf32, #tpu.memory_space<vmem>>, vector<1x384xf32>
    %285 = vector.shape_cast %284 : vector<1x384xf32> to vector<1x384xf32>
    %286 = vector.broadcast %285 : vector<1x384xf32> to vector<8x384xf32>
    %cst_81 = arith.constant 0.000000e+00 : f32
    %287 = vector.broadcast %cst_81 : f32 to vector<8x128xf32>
    %c0_i32_82 = arith.constant 0 : i32
    %c8_i32_83 = arith.constant 8 : i32
    %288 = arith.muli %c0_i32_82, %c8_i32_83 : i32
    %289 = arith.index_cast %288 : i32 to index
    %c0_84 = arith.constant 0 : index
    %290 = vector.load %arg12[%289, %c0_84] : memref<64x384xf32, #tpu.memory_space<vmem>>, vector<8x384xf32>
    %cst_85 = arith.constant dense<0.000000e+00> : vector<8x384xf32>
    %291 = tpu.matmul %287, %283, %cst_85 {dimension_numbers = #tpu.dot_dimension_numbers<[1], [0], [0], [1], [0, 0, 1, 1], [], []>} : vector<8x128xf32>, vector<128x384xf32>, vector<8x384xf32> -> vector<8x384xf32>
    %292 = arith.addf %291, %286 : vector<8x384xf32>
    %293 = vector.extract_strided_slice %290 {offsets = [0, 0], sizes = [8, 128], strides = [1, 1]} : vector<8x384xf32> to vector<8x128xf32>
    %294 = vector.extract_strided_slice %292 {offsets = [0, 0], sizes = [8, 128], strides = [1, 1]} : vector<8x384xf32> to vector<8x128xf32>
    %295 = arith.addf %293, %294 : vector<8x128xf32>
    %296 = arith.negf %295 : vector<8x128xf32>
    %297 = math.exp %296 : vector<8x128xf32>
    %cst_86 = arith.constant 1.000000e+00 : f32
    %298 = vector.broadcast %cst_86 : f32 to vector<8x128xf32>
    %299 = arith.addf %298, %297 : vector<8x128xf32>
    %300 = arith.divf %298, %299 : vector<8x128xf32>
    %301 = vector.extract_strided_slice %290 {offsets = [0, 128], sizes = [8, 128], strides = [1, 1]} : vector<8x384xf32> to vector<8x128xf32>
    %302 = vector.extract_strided_slice %292 {offsets = [0, 128], sizes = [8, 128], strides = [1, 1]} : vector<8x384xf32> to vector<8x128xf32>
    %303 = arith.addf %301, %302 : vector<8x128xf32>
    %304 = arith.negf %303 : vector<8x128xf32>
    %305 = math.exp %304 : vector<8x128xf32>
    %cst_87 = arith.constant 1.000000e+00 : f32
    %306 = vector.broadcast %cst_87 : f32 to vector<8x128xf32>
    %307 = arith.addf %306, %305 : vector<8x128xf32>
    %308 = arith.divf %306, %307 : vector<8x128xf32>
    %309 = vector.extract_strided_slice %290 {offsets = [0, 256], sizes = [8, 128], strides = [1, 1]} : vector<8x384xf32> to vector<8x128xf32>
    %310 = vector.extract_strided_slice %292 {offsets = [0, 256], sizes = [8, 128], strides = [1, 1]} : vector<8x384xf32> to vector<8x128xf32>
    %311 = arith.mulf %300, %310 : vector<8x128xf32>
    %312 = arith.addf %309, %311 : vector<8x128xf32>
    %313 = math.tanh %312 : vector<8x128xf32>
    %cst_88 = arith.constant 1.000000e+00 : f32
    %314 = vector.broadcast %cst_88 : f32 to vector<8x128xf32>
    %315 = arith.subf %314, %308 : vector<8x128xf32>
    %316 = arith.mulf %315, %313 : vector<8x128xf32>
    %317 = arith.mulf %308, %287 : vector<8x128xf32>
    %318 = arith.addf %316, %317 : vector<8x128xf32>
    %319 = arith.index_cast %288 : i32 to index
    %c0_89 = arith.constant 0 : index
    %320 = vector.load %arg13[%319, %c0_89] : memref<64x128xf32, #tpu.memory_space<vmem>>, vector<8x128xf32>
    tpu.vector_store %arg13[%319, %c0_89], %318 {strides = array<i32>} : memref<64x128xf32, #tpu.memory_space<vmem>>, vector<8x128xf32>,
    %c1_i32_90 = arith.constant 1 : i32
    %c8_i32_91 = arith.constant 8 : i32
    %321 = arith.muli %c1_i32_90, %c8_i32_91 : i32
    %322 = arith.index_cast %321 : i32 to index
    %c0_92 = arith.constant 0 : index
    %323 = vector.load %arg12[%322, %c0_92] : memref<64x384xf32, #tpu.memory_space<vmem>>, vector<8x384xf32>
    %cst_93 = arith.constant dense<0.000000e+00> : vector<8x384xf32>
    %324 = tpu.matmul %318, %283, %cst_93 {dimension_numbers = #tpu.dot_dimension_numbers<[1], [0], [0], [1], [0, 0, 1, 1], [], []>} : vector<8x128xf32>, vector<128x384xf32>, vector<8x384xf32> -> vector<8x384xf32>
    %325 = arith.addf %324, %286 : vector<8x384xf32>
    %326 = vector.extract_strided_slice %323 {offsets = [0, 0], sizes = [8, 128], strides = [1, 1]} : vector<8x384xf32> to vector<8x128xf32>
    %327 = vector.extract_strided_slice %325 {offsets = [0, 0], sizes = [8, 128], strides = [1, 1]} : vector<8x384xf32> to vector<8x128xf32>
    %328 = arith.addf %326, %327 : vector<8x128xf32>
    %329 = arith.negf %328 : vector<8x128xf32>
    %330 = math.exp %329 : vector<8x128xf32>
    %cst_94 = arith.constant 1.000000e+00 : f32
    %331 = vector.broadcast %cst_94 : f32 to vector<8x128xf32>
    %332 = arith.addf %331, %330 : vector<8x128xf32>
    %333 = arith.divf %331, %332 : vector<8x128xf32>
    %334 = vector.extract_strided_slice %323 {offsets = [0, 128], sizes = [8, 128], strides = [1, 1]} : vector<8x384xf32> to vector<8x128xf32>
    %335 = vector.extract_strided_slice %325 {offsets = [0, 128], sizes = [8, 128], strides = [1, 1]} : vector<8x384xf32> to vector<8x128xf32>
    %336 = arith.addf %334, %335 : vector<8x128xf32>
    %337 = arith.negf %336 : vector<8x128xf32>
    %338 = math.exp %337 : vector<8x128xf32>
    %cst_95 = arith.constant 1.000000e+00 : f32
    %339 = vector.broadcast %cst_95 : f32 to vector<8x128xf32>
    %340 = arith.addf %339, %338 : vector<8x128xf32>
    %341 = arith.divf %339, %340 : vector<8x128xf32>
    %342 = vector.extract_strided_slice %323 {offsets = [0, 256], sizes = [8, 128], strides = [1, 1]} : vector<8x384xf32> to vector<8x128xf32>
    %343 = vector.extract_strided_slice %325 {offsets = [0, 256], sizes = [8, 128], strides = [1, 1]} : vector<8x384xf32> to vector<8x128xf32>
    %344 = arith.mulf %333, %343 : vector<8x128xf32>
    %345 = arith.addf %342, %344 : vector<8x128xf32>
    %346 = math.tanh %345 : vector<8x128xf32>
    %cst_96 = arith.constant 1.000000e+00 : f32
    %347 = vector.broadcast %cst_96 : f32 to vector<8x128xf32>
    %348 = arith.subf %347, %341 : vector<8x128xf32>
    %349 = arith.mulf %348, %346 : vector<8x128xf32>
    %350 = arith.mulf %341, %318 : vector<8x128xf32>
    %351 = arith.addf %349, %350 : vector<8x128xf32>
    %352 = arith.index_cast %321 : i32 to index
    %c0_97 = arith.constant 0 : index
    %353 = vector.load %arg13[%352, %c0_97] : memref<64x128xf32, #tpu.memory_space<vmem>>, vector<8x128xf32>
    tpu.vector_store %arg13[%352, %c0_97], %351 {strides = array<i32>} : memref<64x128xf32, #tpu.memory_space<vmem>>, vector<8x128xf32>,
    %c2_i32_98 = arith.constant 2 : i32
    %c8_i32_99 = arith.constant 8 : i32
    %354 = arith.muli %c2_i32_98, %c8_i32_99 : i32
    %355 = arith.index_cast %354 : i32 to index
    %c0_100 = arith.constant 0 : index
    %356 = vector.load %arg12[%355, %c0_100] : memref<64x384xf32, #tpu.memory_space<vmem>>, vector<8x384xf32>
    %cst_101 = arith.constant dense<0.000000e+00> : vector<8x384xf32>
    %357 = tpu.matmul %351, %283, %cst_101 {dimension_numbers = #tpu.dot_dimension_numbers<[1], [0], [0], [1], [0, 0, 1, 1], [], []>} : vector<8x128xf32>, vector<128x384xf32>, vector<8x384xf32> -> vector<8x384xf32>
    %358 = arith.addf %357, %286 : vector<8x384xf32>
    %359 = vector.extract_strided_slice %356 {offsets = [0, 0], sizes = [8, 128], strides = [1, 1]} : vector<8x384xf32> to vector<8x128xf32>
    %360 = vector.extract_strided_slice %358 {offsets = [0, 0], sizes = [8, 128], strides = [1, 1]} : vector<8x384xf32> to vector<8x128xf32>
    %361 = arith.addf %359, %360 : vector<8x128xf32>
    %362 = arith.negf %361 : vector<8x128xf32>
    %363 = math.exp %362 : vector<8x128xf32>
    %cst_102 = arith.constant 1.000000e+00 : f32
    %364 = vector.broadcast %cst_102 : f32 to vector<8x128xf32>
    %365 = arith.addf %364, %363 : vector<8x128xf32>
    %366 = arith.divf %364, %365 : vector<8x128xf32>
    %367 = vector.extract_strided_slice %356 {offsets = [0, 128], sizes = [8, 128], strides = [1, 1]} : vector<8x384xf32> to vector<8x128xf32>
    %368 = vector.extract_strided_slice %358 {offsets = [0, 128], sizes = [8, 128], strides = [1, 1]} : vector<8x384xf32> to vector<8x128xf32>
    %369 = arith.addf %367, %368 : vector<8x128xf32>
    %370 = arith.negf %369 : vector<8x128xf32>
    %371 = math.exp %370 : vector<8x128xf32>
    %cst_103 = arith.constant 1.000000e+00 : f32
    %372 = vector.broadcast %cst_103 : f32 to vector<8x128xf32>
    %373 = arith.addf %372, %371 : vector<8x128xf32>
    %374 = arith.divf %372, %373 : vector<8x128xf32>
    %375 = vector.extract_strided_slice %356 {offsets = [0, 256], sizes = [8, 128], strides = [1, 1]} : vector<8x384xf32> to vector<8x128xf32>
    %376 = vector.extract_strided_slice %358 {offsets = [0, 256], sizes = [8, 128], strides = [1, 1]} : vector<8x384xf32> to vector<8x128xf32>
    %377 = arith.mulf %366, %376 : vector<8x128xf32>
    %378 = arith.addf %375, %377 : vector<8x128xf32>
    %379 = math.tanh %378 : vector<8x128xf32>
    %cst_104 = arith.constant 1.000000e+00 : f32
    %380 = vector.broadcast %cst_104 : f32 to vector<8x128xf32>
    %381 = arith.subf %380, %374 : vector<8x128xf32>
    %382 = arith.mulf %381, %379 : vector<8x128xf32>
    %383 = arith.mulf %374, %351 : vector<8x128xf32>
    %384 = arith.addf %382, %383 : vector<8x128xf32>
    %385 = arith.index_cast %354 : i32 to index
    %c0_105 = arith.constant 0 : index
    %386 = vector.load %arg13[%385, %c0_105] : memref<64x128xf32, #tpu.memory_space<vmem>>, vector<8x128xf32>
    tpu.vector_store %arg13[%385, %c0_105], %384 {strides = array<i32>} : memref<64x128xf32, #tpu.memory_space<vmem>>, vector<8x128xf32>,
    %c3_i32_106 = arith.constant 3 : i32
    %c8_i32_107 = arith.constant 8 : i32
    %387 = arith.muli %c3_i32_106, %c8_i32_107 : i32
    %388 = arith.index_cast %387 : i32 to index
    %c0_108 = arith.constant 0 : index
    %389 = vector.load %arg12[%388, %c0_108] : memref<64x384xf32, #tpu.memory_space<vmem>>, vector<8x384xf32>
    %cst_109 = arith.constant dense<0.000000e+00> : vector<8x384xf32>
    %390 = tpu.matmul %384, %283, %cst_109 {dimension_numbers = #tpu.dot_dimension_numbers<[1], [0], [0], [1], [0, 0, 1, 1], [], []>} : vector<8x128xf32>, vector<128x384xf32>, vector<8x384xf32> -> vector<8x384xf32>
    %391 = arith.addf %390, %286 : vector<8x384xf32>
    %392 = vector.extract_strided_slice %389 {offsets = [0, 0], sizes = [8, 128], strides = [1, 1]} : vector<8x384xf32> to vector<8x128xf32>
    %393 = vector.extract_strided_slice %391 {offsets = [0, 0], sizes = [8, 128], strides = [1, 1]} : vector<8x384xf32> to vector<8x128xf32>
    %394 = arith.addf %392, %393 : vector<8x128xf32>
    %395 = arith.negf %394 : vector<8x128xf32>
    %396 = math.exp %395 : vector<8x128xf32>
    %cst_110 = arith.constant 1.000000e+00 : f32
    %397 = vector.broadcast %cst_110 : f32 to vector<8x128xf32>
    %398 = arith.addf %397, %396 : vector<8x128xf32>
    %399 = arith.divf %397, %398 : vector<8x128xf32>
    %400 = vector.extract_strided_slice %389 {offsets = [0, 128], sizes = [8, 128], strides = [1, 1]} : vector<8x384xf32> to vector<8x128xf32>
    %401 = vector.extract_strided_slice %391 {offsets = [0, 128], sizes = [8, 128], strides = [1, 1]} : vector<8x384xf32> to vector<8x128xf32>
    %402 = arith.addf %400, %401 : vector<8x128xf32>
    %403 = arith.negf %402 : vector<8x128xf32>
    %404 = math.exp %403 : vector<8x128xf32>
    %cst_111 = arith.constant 1.000000e+00 : f32
    %405 = vector.broadcast %cst_111 : f32 to vector<8x128xf32>
    %406 = arith.addf %405, %404 : vector<8x128xf32>
    %407 = arith.divf %405, %406 : vector<8x128xf32>
    %408 = vector.extract_strided_slice %389 {offsets = [0, 256], sizes = [8, 128], strides = [1, 1]} : vector<8x384xf32> to vector<8x128xf32>
    %409 = vector.extract_strided_slice %391 {offsets = [0, 256], sizes = [8, 128], strides = [1, 1]} : vector<8x384xf32> to vector<8x128xf32>
    %410 = arith.mulf %399, %409 : vector<8x128xf32>
    %411 = arith.addf %408, %410 : vector<8x128xf32>
    %412 = math.tanh %411 : vector<8x128xf32>
    %cst_112 = arith.constant 1.000000e+00 : f32
    %413 = vector.broadcast %cst_112 : f32 to vector<8x128xf32>
    %414 = arith.subf %413, %407 : vector<8x128xf32>
    %415 = arith.mulf %414, %412 : vector<8x128xf32>
    %416 = arith.mulf %407, %384 : vector<8x128xf32>
    %417 = arith.addf %415, %416 : vector<8x128xf32>
    %418 = arith.index_cast %387 : i32 to index
    %c0_113 = arith.constant 0 : index
    %419 = vector.load %arg13[%418, %c0_113] : memref<64x128xf32, #tpu.memory_space<vmem>>, vector<8x128xf32>
    tpu.vector_store %arg13[%418, %c0_113], %417 {strides = array<i32>} : memref<64x128xf32, #tpu.memory_space<vmem>>, vector<8x128xf32>,
    %c4_i32_114 = arith.constant 4 : i32
    %c8_i32_115 = arith.constant 8 : i32
    %420 = arith.muli %c4_i32_114, %c8_i32_115 : i32
    %421 = arith.index_cast %420 : i32 to index
    %c0_116 = arith.constant 0 : index
    %422 = vector.load %arg12[%421, %c0_116] : memref<64x384xf32, #tpu.memory_space<vmem>>, vector<8x384xf32>
    %cst_117 = arith.constant dense<0.000000e+00> : vector<8x384xf32>
    %423 = tpu.matmul %417, %283, %cst_117 {dimension_numbers = #tpu.dot_dimension_numbers<[1], [0], [0], [1], [0, 0, 1, 1], [], []>} : vector<8x128xf32>, vector<128x384xf32>, vector<8x384xf32> -> vector<8x384xf32>
    %424 = arith.addf %423, %286 : vector<8x384xf32>
    %425 = vector.extract_strided_slice %422 {offsets = [0, 0], sizes = [8, 128], strides = [1, 1]} : vector<8x384xf32> to vector<8x128xf32>
    %426 = vector.extract_strided_slice %424 {offsets = [0, 0], sizes = [8, 128], strides = [1, 1]} : vector<8x384xf32> to vector<8x128xf32>
    %427 = arith.addf %425, %426 : vector<8x128xf32>
    %428 = arith.negf %427 : vector<8x128xf32>
    %429 = math.exp %428 : vector<8x128xf32>
    %cst_118 = arith.constant 1.000000e+00 : f32
    %430 = vector.broadcast %cst_118 : f32 to vector<8x128xf32>
    %431 = arith.addf %430, %429 : vector<8x128xf32>
    %432 = arith.divf %430, %431 : vector<8x128xf32>
    %433 = vector.extract_strided_slice %422 {offsets = [0, 128], sizes = [8, 128], strides = [1, 1]} : vector<8x384xf32> to vector<8x128xf32>
    %434 = vector.extract_strided_slice %424 {offsets = [0, 128], sizes = [8, 128], strides = [1, 1]} : vector<8x384xf32> to vector<8x128xf32>
    %435 = arith.addf %433, %434 : vector<8x128xf32>
    %436 = arith.negf %435 : vector<8x128xf32>
    %437 = math.exp %436 : vector<8x128xf32>
    %cst_119 = arith.constant 1.000000e+00 : f32
    %438 = vector.broadcast %cst_119 : f32 to vector<8x128xf32>
    %439 = arith.addf %438, %437 : vector<8x128xf32>
    %440 = arith.divf %438, %439 : vector<8x128xf32>
    %441 = vector.extract_strided_slice %422 {offsets = [0, 256], sizes = [8, 128], strides = [1, 1]} : vector<8x384xf32> to vector<8x128xf32>
    %442 = vector.extract_strided_slice %424 {offsets = [0, 256], sizes = [8, 128], strides = [1, 1]} : vector<8x384xf32> to vector<8x128xf32>
    %443 = arith.mulf %432, %442 : vector<8x128xf32>
    %444 = arith.addf %441, %443 : vector<8x128xf32>
    %445 = math.tanh %444 : vector<8x128xf32>
    %cst_120 = arith.constant 1.000000e+00 : f32
    %446 = vector.broadcast %cst_120 : f32 to vector<8x128xf32>
    %447 = arith.subf %446, %440 : vector<8x128xf32>
    %448 = arith.mulf %447, %445 : vector<8x128xf32>
    %449 = arith.mulf %440, %417 : vector<8x128xf32>
    %450 = arith.addf %448, %449 : vector<8x128xf32>
    %451 = arith.index_cast %420 : i32 to index
    %c0_121 = arith.constant 0 : index
    %452 = vector.load %arg13[%451, %c0_121] : memref<64x128xf32, #tpu.memory_space<vmem>>, vector<8x128xf32>
    tpu.vector_store %arg13[%451, %c0_121], %450 {strides = array<i32>} : memref<64x128xf32, #tpu.memory_space<vmem>>, vector<8x128xf32>,
    %c5_i32_122 = arith.constant 5 : i32
    %c8_i32_123 = arith.constant 8 : i32
    %453 = arith.muli %c5_i32_122, %c8_i32_123 : i32
    %454 = arith.index_cast %453 : i32 to index
    %c0_124 = arith.constant 0 : index
    %455 = vector.load %arg12[%454, %c0_124] : memref<64x384xf32, #tpu.memory_space<vmem>>, vector<8x384xf32>
    %cst_125 = arith.constant dense<0.000000e+00> : vector<8x384xf32>
    %456 = tpu.matmul %450, %283, %cst_125 {dimension_numbers = #tpu.dot_dimension_numbers<[1], [0], [0], [1], [0, 0, 1, 1], [], []>} : vector<8x128xf32>, vector<128x384xf32>, vector<8x384xf32> -> vector<8x384xf32>
    %457 = arith.addf %456, %286 : vector<8x384xf32>
    %458 = vector.extract_strided_slice %455 {offsets = [0, 0], sizes = [8, 128], strides = [1, 1]} : vector<8x384xf32> to vector<8x128xf32>
    %459 = vector.extract_strided_slice %457 {offsets = [0, 0], sizes = [8, 128], strides = [1, 1]} : vector<8x384xf32> to vector<8x128xf32>
    %460 = arith.addf %458, %459 : vector<8x128xf32>
    %461 = arith.negf %460 : vector<8x128xf32>
    %462 = math.exp %461 : vector<8x128xf32>
    %cst_126 = arith.constant 1.000000e+00 : f32
    %463 = vector.broadcast %cst_126 : f32 to vector<8x128xf32>
    %464 = arith.addf %463, %462 : vector<8x128xf32>
    %465 = arith.divf %463, %464 : vector<8x128xf32>
    %466 = vector.extract_strided_slice %455 {offsets = [0, 128], sizes = [8, 128], strides = [1, 1]} : vector<8x384xf32> to vector<8x128xf32>
    %467 = vector.extract_strided_slice %457 {offsets = [0, 128], sizes = [8, 128], strides = [1, 1]} : vector<8x384xf32> to vector<8x128xf32>
    %468 = arith.addf %466, %467 : vector<8x128xf32>
    %469 = arith.negf %468 : vector<8x128xf32>
    %470 = math.exp %469 : vector<8x128xf32>
    %cst_127 = arith.constant 1.000000e+00 : f32
    %471 = vector.broadcast %cst_127 : f32 to vector<8x128xf32>
    %472 = arith.addf %471, %470 : vector<8x128xf32>
    %473 = arith.divf %471, %472 : vector<8x128xf32>
    %474 = vector.extract_strided_slice %455 {offsets = [0, 256], sizes = [8, 128], strides = [1, 1]} : vector<8x384xf32> to vector<8x128xf32>
    %475 = vector.extract_strided_slice %457 {offsets = [0, 256], sizes = [8, 128], strides = [1, 1]} : vector<8x384xf32> to vector<8x128xf32>
    %476 = arith.mulf %465, %475 : vector<8x128xf32>
    %477 = arith.addf %474, %476 : vector<8x128xf32>
    %478 = math.tanh %477 : vector<8x128xf32>
    %cst_128 = arith.constant 1.000000e+00 : f32
    %479 = vector.broadcast %cst_128 : f32 to vector<8x128xf32>
    %480 = arith.subf %479, %473 : vector<8x128xf32>
    %481 = arith.mulf %480, %478 : vector<8x128xf32>
    %482 = arith.mulf %473, %450 : vector<8x128xf32>
    %483 = arith.addf %481, %482 : vector<8x128xf32>
    %484 = arith.index_cast %453 : i32 to index
    %c0_129 = arith.constant 0 : index
    %485 = vector.load %arg13[%484, %c0_129] : memref<64x128xf32, #tpu.memory_space<vmem>>, vector<8x128xf32>
    tpu.vector_store %arg13[%484, %c0_129], %483 {strides = array<i32>} : memref<64x128xf32, #tpu.memory_space<vmem>>, vector<8x128xf32>,
    %c6_i32_130 = arith.constant 6 : i32
    %c8_i32_131 = arith.constant 8 : i32
    %486 = arith.muli %c6_i32_130, %c8_i32_131 : i32
    %487 = arith.index_cast %486 : i32 to index
    %c0_132 = arith.constant 0 : index
    %488 = vector.load %arg12[%487, %c0_132] : memref<64x384xf32, #tpu.memory_space<vmem>>, vector<8x384xf32>
    %cst_133 = arith.constant dense<0.000000e+00> : vector<8x384xf32>
    %489 = tpu.matmul %483, %283, %cst_133 {dimension_numbers = #tpu.dot_dimension_numbers<[1], [0], [0], [1], [0, 0, 1, 1], [], []>} : vector<8x128xf32>, vector<128x384xf32>, vector<8x384xf32> -> vector<8x384xf32>
    %490 = arith.addf %489, %286 : vector<8x384xf32>
    %491 = vector.extract_strided_slice %488 {offsets = [0, 0], sizes = [8, 128], strides = [1, 1]} : vector<8x384xf32> to vector<8x128xf32>
    %492 = vector.extract_strided_slice %490 {offsets = [0, 0], sizes = [8, 128], strides = [1, 1]} : vector<8x384xf32> to vector<8x128xf32>
    %493 = arith.addf %491, %492 : vector<8x128xf32>
    %494 = arith.negf %493 : vector<8x128xf32>
    %495 = math.exp %494 : vector<8x128xf32>
    %cst_134 = arith.constant 1.000000e+00 : f32
    %496 = vector.broadcast %cst_134 : f32 to vector<8x128xf32>
    %497 = arith.addf %496, %495 : vector<8x128xf32>
    %498 = arith.divf %496, %497 : vector<8x128xf32>
    %499 = vector.extract_strided_slice %488 {offsets = [0, 128], sizes = [8, 128], strides = [1, 1]} : vector<8x384xf32> to vector<8x128xf32>
    %500 = vector.extract_strided_slice %490 {offsets = [0, 128], sizes = [8, 128], strides = [1, 1]} : vector<8x384xf32> to vector<8x128xf32>
    %501 = arith.addf %499, %500 : vector<8x128xf32>
    %502 = arith.negf %501 : vector<8x128xf32>
    %503 = math.exp %502 : vector<8x128xf32>
    %cst_135 = arith.constant 1.000000e+00 : f32
    %504 = vector.broadcast %cst_135 : f32 to vector<8x128xf32>
    %505 = arith.addf %504, %503 : vector<8x128xf32>
    %506 = arith.divf %504, %505 : vector<8x128xf32>
    %507 = vector.extract_strided_slice %488 {offsets = [0, 256], sizes = [8, 128], strides = [1, 1]} : vector<8x384xf32> to vector<8x128xf32>
    %508 = vector.extract_strided_slice %490 {offsets = [0, 256], sizes = [8, 128], strides = [1, 1]} : vector<8x384xf32> to vector<8x128xf32>
    %509 = arith.mulf %498, %508 : vector<8x128xf32>
    %510 = arith.addf %507, %509 : vector<8x128xf32>
    %511 = math.tanh %510 : vector<8x128xf32>
    %cst_136 = arith.constant 1.000000e+00 : f32
    %512 = vector.broadcast %cst_136 : f32 to vector<8x128xf32>
    %513 = arith.subf %512, %506 : vector<8x128xf32>
    %514 = arith.mulf %513, %511 : vector<8x128xf32>
    %515 = arith.mulf %506, %483 : vector<8x128xf32>
    %516 = arith.addf %514, %515 : vector<8x128xf32>
    %517 = arith.index_cast %486 : i32 to index
    %c0_137 = arith.constant 0 : index
    %518 = vector.load %arg13[%517, %c0_137] : memref<64x128xf32, #tpu.memory_space<vmem>>, vector<8x128xf32>
    tpu.vector_store %arg13[%517, %c0_137], %516 {strides = array<i32>} : memref<64x128xf32, #tpu.memory_space<vmem>>, vector<8x128xf32>,
    %c7_i32_138 = arith.constant 7 : i32
    %c8_i32_139 = arith.constant 8 : i32
    %519 = arith.muli %c7_i32_138, %c8_i32_139 : i32
    %520 = arith.index_cast %519 : i32 to index
    %c0_140 = arith.constant 0 : index
    %521 = vector.load %arg12[%520, %c0_140] : memref<64x384xf32, #tpu.memory_space<vmem>>, vector<8x384xf32>
    %cst_141 = arith.constant dense<0.000000e+00> : vector<8x384xf32>
    %522 = tpu.matmul %516, %283, %cst_141 {dimension_numbers = #tpu.dot_dimension_numbers<[1], [0], [0], [1], [0, 0, 1, 1], [], []>} : vector<8x128xf32>, vector<128x384xf32>, vector<8x384xf32> -> vector<8x384xf32>
    %523 = arith.addf %522, %286 : vector<8x384xf32>
    %524 = vector.extract_strided_slice %521 {offsets = [0, 0], sizes = [8, 128], strides = [1, 1]} : vector<8x384xf32> to vector<8x128xf32>
    %525 = vector.extract_strided_slice %523 {offsets = [0, 0], sizes = [8, 128], strides = [1, 1]} : vector<8x384xf32> to vector<8x128xf32>
    %526 = arith.addf %524, %525 : vector<8x128xf32>
    %527 = arith.negf %526 : vector<8x128xf32>
    %528 = math.exp %527 : vector<8x128xf32>
    %cst_142 = arith.constant 1.000000e+00 : f32
    %529 = vector.broadcast %cst_142 : f32 to vector<8x128xf32>
    %530 = arith.addf %529, %528 : vector<8x128xf32>
    %531 = arith.divf %529, %530 : vector<8x128xf32>
    %532 = vector.extract_strided_slice %521 {offsets = [0, 128], sizes = [8, 128], strides = [1, 1]} : vector<8x384xf32> to vector<8x128xf32>
    %533 = vector.extract_strided_slice %523 {offsets = [0, 128], sizes = [8, 128], strides = [1, 1]} : vector<8x384xf32> to vector<8x128xf32>
    %534 = arith.addf %532, %533 : vector<8x128xf32>
    %535 = arith.negf %534 : vector<8x128xf32>
    %536 = math.exp %535 : vector<8x128xf32>
    %cst_143 = arith.constant 1.000000e+00 : f32
    %537 = vector.broadcast %cst_143 : f32 to vector<8x128xf32>
    %538 = arith.addf %537, %536 : vector<8x128xf32>
    %539 = arith.divf %537, %538 : vector<8x128xf32>
    %540 = vector.extract_strided_slice %521 {offsets = [0, 256], sizes = [8, 128], strides = [1, 1]} : vector<8x384xf32> to vector<8x128xf32>
    %541 = vector.extract_strided_slice %523 {offsets = [0, 256], sizes = [8, 128], strides = [1, 1]} : vector<8x384xf32> to vector<8x128xf32>
    %542 = arith.mulf %531, %541 : vector<8x128xf32>
    %543 = arith.addf %540, %542 : vector<8x128xf32>
    %544 = math.tanh %543 : vector<8x128xf32>
    %cst_144 = arith.constant 1.000000e+00 : f32
    %545 = vector.broadcast %cst_144 : f32 to vector<8x128xf32>
    %546 = arith.subf %545, %539 : vector<8x128xf32>
    %547 = arith.mulf %546, %544 : vector<8x128xf32>
    %548 = arith.mulf %539, %516 : vector<8x128xf32>
    %549 = arith.addf %547, %548 : vector<8x128xf32>
    %550 = arith.index_cast %519 : i32 to index
    %c0_145 = arith.constant 0 : index
    %551 = vector.load %arg13[%550, %c0_145] : memref<64x128xf32, #tpu.memory_space<vmem>>, vector<8x128xf32>
    tpu.vector_store %arg13[%550, %c0_145], %549 {strides = array<i32>} : memref<64x128xf32, #tpu.memory_space<vmem>>, vector<8x128xf32>,
    %c8_i32_146 = arith.constant 8 : i32
    %c0_147 = arith.constant 0 : index
    %c0_148 = arith.constant 0 : index
    %552 = vector.load %arg13[%c0_147, %c0_148] : memref<64x128xf32, #tpu.memory_space<vmem>>, vector<64x128xf32>
    %c0_149 = arith.constant 0 : index
    %c0_150 = arith.constant 0 : index
    %553 = vector.load %arg9[%c0_149, %c0_150] : memref<128x128xf32, #tpu.memory_space<vmem>>, vector<128x128xf32>
    %cst_151 = arith.constant dense<0.000000e+00> : vector<64x128xf32>
    %554 = tpu.matmul %552, %553, %cst_151 {dimension_numbers = #tpu.dot_dimension_numbers<[1], [0], [0], [1], [0, 0, 1, 1], [], []>} : vector<64x128xf32>, vector<128x128xf32>, vector<64x128xf32> -> vector<64x128xf32>
    %c0_152 = arith.constant 0 : index
    %c0_153 = arith.constant 0 : index
    %555 = vector.load %arg10[%c0_152, %c0_153] : memref<1x128xf32, #tpu.memory_space<vmem>>, vector<1x128xf32>
    %556 = vector.broadcast %555 : vector<1x128xf32> to vector<64x128xf32>
    %557 = arith.addf %554, %556 : vector<64x128xf32>
    %558 = arith.negf %557 : vector<64x128xf32>
    %559 = math.exp %558 : vector<64x128xf32>
    %cst_154 = arith.constant 1.000000e+00 : f32
    %560 = vector.broadcast %cst_154 : f32 to vector<64x128xf32>
    %561 = arith.addf %560, %559 : vector<64x128xf32>
    %562 = arith.divf %560, %561 : vector<64x128xf32>
    %c0_155 = arith.constant 0 : index
    %c0_156 = arith.constant 0 : index
    %563 = vector.load %arg11[%c0_155, %c0_156] : memref<64x128xf32, #tpu.memory_space<vmem>>, vector<64x128xf32>
    tpu.vector_store %arg11[%c0_155, %c0_156], %562 {strides = array<i32>} : memref<64x128xf32, #tpu.memory_space<vmem>>, vector<64x128xf32>,
    return
  }
}

</mosaic_0001>

<bundles_post_ra>
// kernel: tpu_custom_call.1
= control target key start
LH: loop header
LB: loop body
LE: loop exit
PB: predicated region body
PF: predicated region fallthrough
CT: control target
= control target key end

     0   :  { %16 = vsyncpa [#allocation5], 0  ;;  %s5050_s0 = inlined_call_operand.hbm [shape: f32[64,128], index: 0, kind: input, shape index: {}]   ;;  %s5051_s1 = inlined_call_operand.hbm [shape: f32[128,384], index: 1, kind: input, shape index: {}]   ;;  %s5052_s2 = inlined_call_operand.hbm [shape: f32[128,384], index: 2, kind: input, shape index: {}]   ;;  %s5053_s3 = inlined_call_operand.hbm [shape: f32[1,384], index: 3, kind: input, shape index: {}]   ;;  %s5054_s4 = inlined_call_operand.vmem [shape: f32[1,384], index: 4, kind: input, shape index: {}]   ;;  %s5055_s5 = inlined_call_operand.hbm [shape: f32[128,384], index: 5, kind: input, shape index: {}]   ;;  %s5056_s6 = inlined_call_operand.hbm [shape: f32[128,384], index: 6, kind: input, shape index: {}]   ;;  %s5057_s7 = inlined_call_operand.vmem [shape: f32[1,384], index: 7, kind: input, shape index: {}]   ;;  %s5058_s8 = inlined_call_operand.hbm [shape: f32[1,384], index: 8, kind: input, shape index: {}]   ;;  %s5059_s9 = inlined_call_operand.hbm [shape: f32[128,128], index: 9, kind: input, shape index: {}]   ;;  %s5060_s10 = inlined_call_operand.vmem [shape: f32[1,128], index: 10, kind: input, shape index: {}]   ;;  %s5061_s11 = inlined_call_operand.hbm [shape: f32[64,128], index: 11, kind: output, shape index: {}]  }
   0x1   :  { %17 = vsyncpa [#allocation8], 0 }
   0x2   :  { %18 = vsyncpa [#allocation11], 0 }
   0x3   :  { %19 = vsyncpa [#allocation14], 0 }
   0x4   :  { %20 = vsyncpa [#allocation17], 0  ;;  %s39_s19 = sshll.u32 %s5051_s1, 4  ;;  %s40_s19 = int_to_ptr.hbm [resolvable:$true] %s39_s19 }
   0x5   :  { %21 = vsyncpa [#allocation6], 0  ;;  %s3309_s20 = smov [#allocation7]   ;;  %s66_s24 = sshll.u32 %s5053_s3, 4  ;;  %s67_s24 = int_to_ptr.hbm [resolvable:$true] %s66_s24 }
   0x6   :  { %s41_s21 = sshll.u32 %s3309_s20, 4  ;;  %s3310_s25 = smov 384   ;;  %s42_s21 = int_to_ptr.vmem [resolvable:$true] %s41_s21 }
   0x7   :  { %s3311_s26 = smov 24   ;;  %s3312_s27 = smov [#allocation10]  }
   0x8   :  { %47 = dma.hbm_to_vmem [thread:$0]  %s40_s19, 6144, %s42_s21, [#allocation8], %s3310_s25, %s3310_s25, %s3311_s26  }
   0x9   :  { %s68_s28 = sshll.u32 %s3312_s27, 4  ;;  %s91_s30 = sshll.u32 %s5056_s6, 4  ;;  %s69_s28 = int_to_ptr.vmem [resolvable:$true] %s68_s28  ;;  %s92_s30 = int_to_ptr.hbm [resolvable:$true] %s91_s30 }
   0xa   :  { %71 = dma.hbm_to_vmem [thread:$0]  %s67_s24, 48, %s69_s28, [#allocation11]  }
   0xb   :  { %s26_s3 = sshll.u32 %s5050_s0, 4  ;;  %s3313_s14 = smov [#allocation13]   ;;  %s27_s3 = int_to_ptr.hbm [resolvable:$true] %s26_s3 }
   0xc   :  { %s93_s15 = sshll.u32 %s3313_s14, 4  ;;  %s3314_s16 = smov [#allocation4]   ;;  %s94_s15 = int_to_ptr.vmem [resolvable:$true] %s93_s15 }
   0xd   :  { %99 = dma.hbm_to_vmem [thread:$0]  %s92_s30, 6144, %s94_s15, [#allocation14], %s3310_s25, %s3310_s25, %s3311_s26  }
   0xe   :  { %s28_s17 = sshll.u32 %s3314_s16, 4  ;;  %s3315_s18 = smov 128   ;;  %s29_s17 = int_to_ptr.vmem [resolvable:$true] %s28_s17 }
   0xf   :  { %s3316_s6 = smov 8   ;;  %s52_s0 = sshll.u32 %s5052_s2, 4  ;;  %s53_s0 = int_to_ptr.hbm [resolvable:$true] %s52_s0 }
  0x10   :  { %34 = dma.hbm_to_vmem [thread:$0]  %s27_s3, 1024, %s29_s17, [#allocation5], %s3315_s18, %s3315_s18, %s3316_s6  }
  0x11   :  { %s3317_s21 = smov [#allocation9]   ;;  %s78_s27 = sshll.u32 %s5055_s5, 4  ;;  %s79_s27 = int_to_ptr.hbm [resolvable:$true] %s78_s27 }
  0x12   :  { %s54_s22 = sshll.u32 %s3317_s21, 4  ;;  %s3318_s28 = smov [#allocation12]   ;;  %s55_s22 = int_to_ptr.vmem [resolvable:$true] %s54_s22 }
  0x13   :  { %60 = dma.hbm_to_vmem [thread:$0]  %s53_s0, 6144, %s55_s22, [#allocation8], %s3310_s25, %s3310_s25, %s3311_s26  }
  0x14   :  { %s80_s29 = sshll.u32 %s3318_s28, 4  ;;  %s107_s12 = sshll.u32 %s5058_s8, 4  ;;  %s81_s29 = int_to_ptr.vmem [resolvable:$true] %s80_s29  ;;  %s108_s12 = int_to_ptr.hbm [resolvable:$true] %s107_s12 }
  0x15   :  { %86 = dma.hbm_to_vmem [thread:$0]  %s79_s27, 6144, %s81_s29, [#allocation11], %s3310_s25, %s3310_s25, %s3311_s26  }
  0x16   :  { %s117_s5 = sshll.u32 %s5059_s9, 4  ;;  %s3319_s3 = smov [#allocation15]   ;;  %s118_s5 = int_to_ptr.hbm [resolvable:$true] %s117_s5 }
  0x17   :  { %s109_s14 = sshll.u32 %s3319_s3, 4  ;;  %s3320_s15 = smov [#allocation16]   ;;  %s110_s14 = int_to_ptr.vmem [resolvable:$true] %s109_s14 }
  0x18   :  { %112 = dma.hbm_to_vmem [thread:$0]  %s108_s12, 48, %s110_s14, [#allocation14]  }
  0x19   :  { %s119_s16 = sshll.u32 %s3320_s15, 4  ;;  %s120_s16 = int_to_ptr.vmem [resolvable:$true] %s119_s16 }
  0x1a   :  { %125 = dma.hbm_to_vmem [thread:$0]  %s118_s5, 2048, %s120_s16, [#allocation17], %s3315_s18, %s3315_s18, %s3316_s6  }
  0x1b   :  { %3297 = dma.done.wait [#allocation5], 1024  }
  0x1c   :  { %3298 = vsyncadd [#allocation5], 4294966272 }
  0x1d   :  { %3299 = dma.done.wait [#allocation8], 12288  }
  0x1e   :  { %3300 = vsyncadd [#allocation8], 4294955008 }
  0x1f   :  { %3301 = dma.done.wait [#allocation11], 6192  }
  0x20   :  { %3302 = vsyncadd [#allocation11], 4294961104 }
  0x21   :  { %3303 = dma.done.wait [#allocation14], 6192  }
  0x22   :  { %3304 = vsyncadd [#allocation14], 4294961104 }
  0x23   :  { %3305 = dma.done.wait [#allocation17], 2048  }
  0x24   :  { %3306 = vsyncadd [#allocation17], 4294965248  ;;  %v213_v0 = vld [vmem:[#allocation7 + $0x168] sm:$0xff]  ;;  %v210_v2 = vld [vmem:[#allocation7 + $0x150] sm:$0xff]  ;;  %v5062_v45 = vmov 0.0   ;;  %s2705_s0 = sshll.u32 %s5061_s11, 4  ;;  %s2706_s0 = int_to_ptr.hbm [resolvable:$true] %s2705_s0 }
  0x25   :  { %v3425_v1 = vld [vmem:[#allocation9 + $0x168] sm:$0xff]  ;;  %2762 = vmatpush.msra.mxu2 %v213_v0  ;;  %v3428_v3 = vld [vmem:[#allocation9 + $0x150] sm:$0xff]  ;;  %v207_v4 = vld [vmem:[#allocation7 + $0x138] sm:$0xff]  ;;  %224 = vmatpush.msra.mxu1 %v213_v0 }
  0x26   :  { %430 = vmatpush.msra.mxu3 %v3425_v1  ;;  %v3430_v5 = vld [vmem:[#allocation9 + $0x138] sm:$0xff]  ;;  %v204_v6 = vld [vmem:[#allocation7 + $0x120] sm:$0xff]  ;;  %v201_v8 = vld [vmem:[#allocation7 + $0x108] sm:$0xff] }
  0x27   :  { %2763 = vmatpush.msra.mxu2 %v210_v2  ;;  %v3433_v7 = vld [vmem:[#allocation9 + $0x120] sm:$0xff]  ;;  %225 = vmatpush.msra.mxu1 %v210_v2  ;;  %v3436_v9 = vld [vmem:[#allocation9 + $0x108] sm:$0xff]  ;;  %v198_v10 = vld [vmem:[#allocation7 + $0xf0] sm:$0xff] }
  0x28   :  { %431 = vmatpush.msra.mxu3 %v3428_v3  ;;  %v3439_v11 = vld [vmem:[#allocation9 + $0xf0] sm:$0xff]  ;;  %v195_v12 = vld [vmem:[#allocation7 + $0xd8] sm:$0xff]  ;;  %v192_v14 = vld [vmem:[#allocation7 + $0xc0] sm:$0xff] }
  0x29   :  { %2764 = vmatpush.msra.mxu2 %v207_v4  ;;  %226 = vmatpush.msra.mxu1 %v207_v4  ;;  %v3442_v13 = vld [vmem:[#allocation9 + $0xd8] sm:$0xff]  ;;  %v3445_v15 = vld [vmem:[#allocation9 + $0xc0] sm:$0xff]  ;;  %v189_v17 = vld [vmem:[#allocation7 + $0xa8] sm:$0xff] }
  0x2a   :  { %432 = vmatpush.msra.mxu3 %v3430_v5  ;;  %v3448_v16 = vld [vmem:[#allocation9 + $0x178] sm:$0xff]  ;;  %v3450_v18 = vld [vmem:[#allocation9 + $0xa8] sm:$0xff]  ;;  %v3454_v19 = vld [vmem:[#allocation9 + $0x160] sm:$0xff] }
  0x2b   :  { %2765 = vmatpush.msra.mxu2 %v204_v6  ;;  %227 = vmatpush.msra.mxu1 %v204_v6  ;;  %v186_v20 = vld [vmem:[#allocation7 + $0x90] sm:$0xff]  ;;  %v3459_v22 = vld [vmem:[#allocation9 + $0x148] sm:$0xff]  ;;  %v183_v23 = vld [vmem:[#allocation7 + $0x78] sm:$0xff] }
  0x2c   :  { %433 = vmatpush.msra.mxu3 %v3433_v7  ;;  %470 = vmatpush.msra.mxu0 %v3448_v16  ;;  %v3456_v21 = vld [vmem:[#allocation9 + $0x90] sm:$0xff]  ;;  %v3462_v24 = vld [vmem:[#allocation9 + $0x78] sm:$0xff]  ;;  %v180_v27 = vld [vmem:[#allocation7 + $0x60] sm:$0xff] }
  0x2d   :  { %2766 = vmatpush.msra.mxu2 %v201_v8  ;;  %228 = vmatpush.msra.mxu1 %v201_v8  ;;  %v3465_v25 = vld [vmem:[#allocation9 + $0x130] sm:$0xff]  ;;  %v3468_v26 = vld [vmem:[#allocation9 + $0x118] sm:$0xff]  ;;  %v3470_v28 = vld [vmem:[#allocation9 + $0x60] sm:$0xff] }
  0x2e   :  { %434 = vmatpush.msra.mxu3 %v3436_v9  ;;  %471 = vmatpush.msra.mxu0 %v3454_v19  ;;  %v3474_v29 = vld [vmem:[#allocation9 + $0x100] sm:$0xff]  ;;  %v177_v30 = vld [vmem:[#allocation7 + $0x48] sm:$0xff]  ;;  %v174_v33 = vld [vmem:[#allocation7 + $0x30] sm:$0xff] }
  0x2f   :  { %2767 = vmatpush.msra.mxu2 %v198_v10  ;;  %229 = vmatpush.msra.mxu1 %v198_v10  ;;  %v3476_v31 = vld [vmem:[#allocation9 + $0x48] sm:$0xff]  ;;  %v3482_v34 = vld [vmem:[#allocation9 + $0x30] sm:$0xff]  ;;  %v171_v36 = vld [vmem:[#allocation7 + $0x18] sm:$0xff] }
  0x30   :  { %435 = vmatpush.msra.mxu3 %v3439_v11  ;;  %472 = vmatpush.msra.mxu0 %v3459_v22  ;;  %v3480_v32 = vld [vmem:[#allocation9 + $0xe8] sm:$0xff]  ;;  %v3486_v35 = vld [vmem:[#allocation9 + $0xd0] sm:$0xff]  ;;  %v3488_v37 = vld [vmem:[#allocation9 + $0x18] sm:$0xff] }
  0x31   :  { %2768 = vmatpush.msra.mxu2 %v195_v12  ;;  %230 = vmatpush.msra.mxu1 %v195_v12  ;;  %5122 = vst [vmem:[#allocation25_spill] sm:$0xff] %v3488_v37  ;;  %v3492_v38 = vld [vmem:[#allocation9 + $0xb8] sm:$0xff]  ;;  %v168_v39 = vld [vmem:[#allocation7] sm:$0xff]  ;;  %v3500_v42 = vld [vmem:[#allocation9 + $0x170] sm:$0xff] }
  0x32   :  { %436 = vmatpush.msra.mxu3 %v3442_v13  ;;  %473 = vmatpush.msra.mxu0 %v3465_v25  ;;  %v3494_v40 = vld [vmem:[#allocation9] sm:$0xff]  ;;  %v215_v43 = vld [vmem:[#allocation7 + $0x178] sm:$0xff]  ;;  %v3513_v49 = vld [vmem:[#allocation9 + $0x88] sm:$0xff] }
  0x33   :  { %2769 = vmatpush.msra.mxu2 %v192_v14  ;;  %231 = vmatpush.msra.mxu1 %v192_v14  ;;  %5123 = vst [vmem:[#allocation26_spill] sm:$0xff] %v3494_v40  ;;  %v3498_v41 = vld [vmem:[#allocation4 + $0x20] sm:$0xff]  ;;  %v3508_v46 = vld [vmem:[#allocation9 + $0x158] sm:$0xff]  ;;  %v214_v51 = vld [vmem:[#allocation7 + $0x170] sm:$0xff] }
  0x34   :  { %437 = vmatpush.msra.mxu3 %v3445_v15  ;;  %474 = vmatpush.msra.mxu0 %v3468_v26  ;;  %v3504_v44 = vld [vmem:[#allocation9 + $0xa0] sm:$0xff]  ;;  %v209_v52 = vld [vmem:[#allocation7 + $0x148] sm:$0xff]  ;;  %v3519_v53 = vld [vmem:[#allocation9 + $0x70] sm:$0xff] }
  0x35   :  { %2770 = vmatpush.msra.mxu2 %v189_v17  ;;  %232 = vmatpush.msra.mxu1 %v189_v17  ;;  %v212_v47 = vld [vmem:[#allocation7 + $0x160] sm:$0xff]  ;;  %v3522_v54 = vld [vmem:[#allocation9 + $0x128] sm:$0xff]  ;;  %v211_v55 = vld [vmem:[#allocation7 + $0x158] sm:$0xff] }
  0x36   :  { %438 = vmatpush.msra.mxu3 %v3450_v18  ;;  %475 = vmatpush.msra.mxu0 %v3474_v29  ;;  %v3511_v48 = vld [vmem:[#allocation4] sm:$0xff]  ;;  %v206_v56 = vld [vmem:[#allocation7 + $0x130] sm:$0xff]  ;;  %v3526_v57 = vld [vmem:[#allocation9 + $0x58] sm:$0xff] }
  0x37   :  { %2771 = vmatpush.msra.mxu2 %v186_v20  ;;  %233 = vmatpush.msra.mxu1 %v186_v20  ;;  %v3515_v50 = vld [vmem:[#allocation9 + $0x140] sm:$0xff]  ;;  %v3528_v58 = vld [vmem:[#allocation4 + $0x28] sm:$0xff]  ;;  %v3530_v59 = vld [vmem:[#allocation9 + $0x110] sm:$0xff] }
  0x38   :  { %439 = vmatpush.msra.mxu3 %v3456_v21  ;;  %476 = vmatpush.msra.mxu0 %v3480_v32  ;;  %v208_v60 = vld [vmem:[#allocation7 + $0x140] sm:$0xff]  ;;  %v203_v61 = vld [vmem:[#allocation7 + $0x118] sm:$0xff]  ;;  %v205_v0 = vld [vmem:[#allocation7 + $0x128] sm:$0xff] }
  0x39   :  { %2772 = vmatpush.msra.mxu2 %v183_v23  ;;  %234 = vmatpush.msra.mxu1 %v183_v23  ;;  %v3534_v62 = vld [vmem:[#allocation9 + $0xf8] sm:$0xff]  ;;  %v3537_v63 = vld [vmem:[#allocation9 + $0x40] sm:$0xff]  ;;  %v3543_v6 = vld [vmem:[#allocation4 + $0x8] sm:$0xff] }
  0x3a   :  { %440 = vmatpush.msra.mxu3 %v3462_v24  ;;  %477 = vmatpush.msra.mxu0 %v3486_v35  ;;  %v200_v2 = vld [vmem:[#allocation7 + $0x100] sm:$0xff]  ;;  %v202_v8 = vld [vmem:[#allocation7 + $0x110] sm:$0xff]  ;;  %v197_v10 = vld [vmem:[#allocation7 + $0xe8] sm:$0xff] }
  0x3b   :  { %2773 = vmatpush.msra.mxu2 %v180_v27  ;;  %235 = vmatpush.msra.mxu1 %v180_v27  ;;  %v3541_v4 = vld [vmem:[#allocation9 + $0xe0] sm:$0xff]  ;;  %v3547_v12 = vld [vmem:[#allocation9 + $0xc8] sm:$0xff]  ;;  %v199_v17 = vld [vmem:[#allocation7 + $0xf8] sm:$0xff] }
  0x3c   :  { %441 = vmatpush.msra.mxu3 %v3470_v28  ;;  %478 = vmatpush.msra.mxu0 %v3492_v38  ;;  %v3549_v14 = vld [vmem:[#allocation9 + $0x28] sm:$0xff]  ;;  %v194_v20 = vld [vmem:[#allocation7 + $0xd0] sm:$0xff] }
  0x3d   :  { %2774 = vmatpush.msra.mxu2 %v177_v30  ;;  %236 = vmatpush.msra.mxu1 %v177_v30  ;;  %5124 = vst [vmem:[#allocation27_spill] sm:$0xff] %v3549_v14  ;;  %v3553_v23 = vld [vmem:[#allocation4 + $0x30] sm:$0xff]  ;;  %v196_v30 = vld [vmem:[#allocation7 + $0xe0] sm:$0xff] }
  0x3e   :  { %442 = vmatpush.msra.mxu3 %v3476_v31  ;;  %479 = vmatpush.msra.mxu0 %v3504_v44  ;;  %v3555_v27 = vld [vmem:[#allocation9 + $0xb0] sm:$0xff] }
  0x3f   :  { %2775 = vmatpush.msra.mxu2 %v174_v33  ;;  %237 = vmatpush.msra.mxu1 %v174_v33  ;;  %v191_v33 = vld [vmem:[#allocation7 + $0xb8] sm:$0xff] }
  0x40   :  { %443 = vmatpush.msra.mxu3 %v3482_v34  ;;  %480 = vmatpush.msra.mxu0 %v3513_v49 }
  0x41   :  { %2776 = vmatpush.msra.mxu2 %v171_v36  ;;  %238 = vmatpush.msra.mxu1 %v171_v36  ;;  %v3559_v36 = vld [vmem:[#allocation9 + $0x98] sm:$0xff] }
  0x42   :  { %444 = vmatpush.msra.mxu3 %v3488_v37  ;;  %481 = vmatpush.msra.mxu0 %v3519_v53 }
  0x43   :  { %2777 = vmatpush.msra.mxu2 %v168_v39  ;;  %239 = vmatpush.msra.mxu1 %v168_v39  ;;  %v3561_v39 = vld [vmem:[#allocation9 + $0x10] sm:$0xff] }
  0x44   :  { %445 = vmatpush.msra.mxu3 %v3494_v40  ;;  %252 = vmatmul.f32.vlgmr.msra.gmra.mxu2 %v3498_v41  ;;  %5125 = vst [vmem:[#allocation28_spill] sm:$0xff] %v3561_v39 }
  0x45   :  { %446 = vmatmul.f32.vlgmr.msra.gmra.mxu3 %v5062_v45  ;;  %306 = vmatpush.msrb.mxu2 %v215_v43  ;;  %v193_v43 = vld [vmem:[#allocation7 + $0xc8] sm:$0xff] }
  0x46   :  { %450 = vmatpush.msrb.mxu3 %v3500_v42  ;;  %240 = vmatmul.f32.vlgmr.msra.gmra.mxu1 %v3511_v48 }
  0x47   :  { %307 = vmatpush.msrb.mxu2 %v212_v47  ;;  %265 = vmatpush.msrb.mxu1 %v214_v51  ;;  %v188_v47 = vld [vmem:[#allocation7 + $0xa0] sm:$0xff] }
  0x48   :  { %451 = vmatpush.msrb.mxu3 %v3508_v46  ;;  %482 = vmatpush.msra.mxu0 %v3526_v57  ;;  %v3565_v51 = vld [vmem:[#allocation9 + $0x80] sm:$0xff] }
  0x49   :  { %308 = vmatpush.msrb.mxu2 %v209_v52  ;;  %266 = vmatpush.msrb.mxu1 %v211_v55  ;;  %v3567_v52 = vld [vmem:[#allocation4 + $0x10] sm:$0xff] }
  0x4a   :  { %452 = vmatpush.msrb.mxu3 %v3515_v50  ;;  %483 = vmatpush.msra.mxu0 %v3537_v63  ;;  %v190_v55 = vld [vmem:[#allocation7 + $0xb0] sm:$0xff] }
  0x4b   :  { %309 = vmatpush.msrb.mxu2 %v206_v56  ;;  %267 = vmatpush.msrb.mxu1 %v208_v60  ;;  %v185_v56 = vld [vmem:[#allocation7 + $0x88] sm:$0xff] }
  0x4c   :  { %453 = vmatpush.msrb.mxu3 %v3522_v54  ;;  %255 = vmatmul.f32.gmra.mxu2 %v3528_v58  ;;  %v3571_v60 = vld [vmem:[#allocation9 + $0x68] sm:$0xff] }
  0x4d   :  { %310 = vmatpush.msrb.mxu2 %v203_v61  ;;  %268 = vmatpush.msrb.mxu1 %v205_v0  ;;  %v187_v61 = vld [vmem:[#allocation7 + $0x98] sm:$0xff]  ;;  %v182_v0 = vld [vmem:[#allocation7 + $0x70] sm:$0xff] }
  0x4e   :  { %454 = vmatpush.msrb.mxu3 %v3530_v59  ;;  %243 = vmatmul.f32.gmra.mxu1 %v3543_v6 }
  0x4f   :  { %311 = vmatpush.msrb.mxu2 %v200_v2  ;;  %269 = vmatpush.msrb.mxu1 %v202_v8  ;;  %v3575_v2 = vld [vmem:[#allocation4 + $0x38] sm:$0xff]  ;;  %v3577_v8 = vld [vmem:[#allocation9 + $0x50] sm:$0xff] }
  0x50   :  { %455 = vmatpush.msrb.mxu3 %v3534_v62  ;;  %484 = vmatpush.msra.mxu0 %v3549_v14 }
  0x51   :  { %312 = vmatpush.msrb.mxu2 %v197_v10  ;;  %270 = vmatpush.msrb.mxu1 %v199_v17  ;;  %v184_v10 = vld [vmem:[#allocation7 + $0x80] sm:$0xff]  ;;  %v179_v17 = vld [vmem:[#allocation7 + $0x58] sm:$0xff] }
  0x52   :  { %456 = vmatpush.msrb.mxu3 %v3541_v4  ;;  %485 = vmatpush.msra.mxu0 %v3561_v39 }
  0x53   :  { %313 = vmatpush.msrb.mxu2 %v194_v20  ;;  %271 = vmatpush.msrb.mxu1 %v196_v30  ;;  %v3581_v20 = vld [vmem:[#allocation9 + $0x38] sm:$0xff]  ;;  %v181_v30 = vld [vmem:[#allocation7 + $0x68] sm:$0xff] }
  0x54   :  { %457 = vmatpush.msrb.mxu3 %v3547_v12  ;;  %258 = vmatmul.f32.gmra.mxu2 %v3553_v23  ;;  %5126 = vst [vmem:[#allocation29_spill] sm:$0xff] %v3581_v20 }
  0x55   :  { %314 = vmatpush.msrb.mxu2 %v191_v33  ;;  %272 = vmatpush.msrb.mxu1 %v193_v43  ;;  %v176_v33 = vld [vmem:[#allocation7 + $0x40] sm:$0xff] }
  0x56   :  { %458 = vmatpush.msrb.mxu3 %v3555_v27  ;;  %246 = vmatmul.f32.gmra.mxu1 %v3567_v52  ;;  %v3585_v43 = vld [vmem:[#allocation9 + $0x20] sm:$0xff] }
  0x57   :  { %315 = vmatpush.msrb.mxu2 %v188_v47  ;;  %273 = vmatpush.msrb.mxu1 %v190_v55  ;;  %5127 = vst [vmem:[#allocation30_spill] sm:$0xff] %v3585_v43  ;;  %v3587_v47 = vld [vmem:[#allocation4 + $0x18] sm:$0xff]  ;;  %v178_v55 = vld [vmem:[#allocation7 + $0x50] sm:$0xff] }
  0x58   :  { %459 = vmatpush.msrb.mxu3 %v3559_v36  ;;  %486 = vmatmul.f32.vlgmr.msra.gmra.mxu0 %v5062_v45 }
  0x59   :  { %316 = vmatpush.msrb.mxu2 %v185_v56  ;;  %274 = vmatpush.msrb.mxu1 %v187_v61  ;;  %v173_v56 = vld [vmem:[#allocation7 + $0x28] sm:$0xff] }
  0x5a   :  { %460 = vmatpush.msrb.mxu3 %v3565_v51  ;;  %652 = vmatpush.msrb.mxu0 %v3425_v1  ;;  %v3591_v61 = vld [vmem:[#allocation9 + $0x8] sm:$0xff] }
  0x5b   :  { %317 = vmatpush.msrb.mxu2 %v182_v0  ;;  %275 = vmatpush.msrb.mxu1 %v184_v10  ;;  %5128 = vst [vmem:[#allocation31_spill] sm:$0xff] %v3591_v61  ;;  %v175_v0 = vld [vmem:[#allocation7 + $0x38] sm:$0xff]  ;;  %v170_v10 = vld [vmem:[#allocation7 + $0x10] sm:$0xff] }
  0x5c   :  { %461 = vmatpush.msrb.mxu3 %v3571_v60  ;;  %261 = vmatmul.f32.gmra.mxu2 %v3575_v2 }
  0x5d   :  { %318 = vmatpush.msrb.mxu2 %v179_v17  ;;  %276 = vmatpush.msrb.mxu1 %v181_v30  ;;  %v172_v17 = vld [vmem:[#allocation7 + $0x20] sm:$0xff]  ;;  %v169_v30 = vld [vmem:[#allocation7 + $0x8] sm:$0xff] }
  0x5e   :  { %462 = vmatpush.msrb.mxu3 %v3577_v8  ;;  %249 = vmatmul.f32.gmra.mxu1 %v3587_v47 }
  0x5f   :  { %319 = vmatpush.msrb.mxu2 %v176_v33  ;;  %277 = vmatpush.msrb.mxu1 %v178_v55 }
  0x60   :  { %463 = vmatpush.msrb.mxu3 %v3581_v20  ;;  %653 = vmatpush.msrb.mxu0 %v3428_v3 }
  0x61   :  { %320 = vmatpush.msrb.mxu2 %v173_v56  ;;  %278 = vmatpush.msrb.mxu1 %v175_v0 }
  0x62   :  { %464 = vmatpush.msrb.mxu3 %v3585_v43  ;;  %654 = vmatpush.msrb.mxu0 %v3430_v5 }
  0x63   :  { %321 = vmatpush.msrb.mxu2 %v170_v10  ;;  %279 = vmatpush.msrb.mxu1 %v172_v17 }
  0x64   :  { %465 = vmatpush.msrb.mxu3 %v3591_v61  ;;  %322 = vmatmul.f32.vlgmr.msrb.gmra.mxu2 %v3511_v48 }
  0x65   :  { %466 = vmatmul.f32.vlgmr.msrb.gmra.mxu3 %v5062_v45  ;;  %561 = vmatpush.msra.mxu2 %v3500_v42 }
  0x66   :  { %581 = vmatpush.msra.mxu3 %v3448_v16  ;;  %280 = vmatpush.msrb.mxu1 %v169_v30 }
  0x67   :  { %562 = vmatpush.msra.mxu2 %v3508_v46  ;;  %281 = vmatmul.f32.vlgmr.msrb.gmra.mxu1 %v3511_v48  ;;  %v419_v48 = vld [vmem:[%s5054_s4] sm:$0x7] }
  0x68   :  { %582 = vmatpush.msra.mxu3 %v3454_v19  ;;  %541 = vmatpush.msra.mxu1 %v3425_v1 }
  0x69   :  { %563 = vmatpush.msra.mxu2 %v3515_v50  ;;  %655 = vmatpush.msrb.mxu0 %v3433_v7 }
  0x6a   :  { %583 = vmatpush.msra.mxu3 %v3459_v22  ;;  %542 = vmatpush.msra.mxu1 %v3428_v3 }
  0x6b   :  { %564 = vmatpush.msra.mxu2 %v3522_v54  ;;  %656 = vmatpush.msrb.mxu0 %v3436_v9 }
  0x6c   :  { %325 = vmatmul.f32.gmra.mxu2 %v3543_v6  ;;  %584 = vmatpush.msra.mxu3 %v3465_v25 }
  0x6d   :  { %543 = vmatpush.msra.mxu1 %v3430_v5  ;;  %565 = vmatpush.msra.mxu2 %v3530_v59 }
  0x6e   :  { %585 = vmatpush.msra.mxu3 %v3468_v26  ;;  %657 = vmatpush.msrb.mxu0 %v3439_v11 }
  0x6f   :  { %544 = vmatpush.msra.mxu1 %v3433_v7  ;;  %566 = vmatpush.msra.mxu2 %v3534_v62 }
  0x70   :  { %284 = vmatmul.f32.gmra.mxu1 %v3543_v6  ;;  %586 = vmatpush.msra.mxu3 %v3474_v29  ;;  %v3745_v6 = vperm.slane %v419_v48, 0 }
  0x71   :  { %545 = vmatpush.msra.mxu1 %v3436_v9  ;;  %567 = vmatpush.msra.mxu2 %v3541_v4 }
  0x72   :  { %587 = vmatpush.msra.mxu3 %v3480_v32  ;;  %658 = vmatpush.msrb.mxu0 %v3442_v13  ;;  %5130 = vst [vmem:[#allocation33_spill] sm:$0xff] %v3745_v6 }
  0x73   :  { %546 = vmatpush.msra.mxu1 %v3439_v11  ;;  %568 = vmatpush.msra.mxu2 %v3547_v12 }
  0x74   :  { %328 = vmatmul.f32.gmra.mxu2 %v3567_v52  ;;  %588 = vmatpush.msra.mxu3 %v3486_v35 }
  0x75   :  { %547 = vmatpush.msra.mxu1 %v3442_v13  ;;  %569 = vmatpush.msra.mxu2 %v3555_v27 }
  0x76   :  { %589 = vmatpush.msra.mxu3 %v3492_v38  ;;  %659 = vmatpush.msrb.mxu0 %v3445_v15 }
  0x77   :  { %548 = vmatpush.msra.mxu1 %v3445_v15  ;;  %570 = vmatpush.msra.mxu2 %v3559_v36 }
  0x78   :  { %287 = vmatmul.f32.gmra.mxu1 %v3567_v52  ;;  %590 = vmatpush.msra.mxu3 %v3504_v44 }
  0x79   :  { %549 = vmatpush.msra.mxu1 %v3450_v18  ;;  %571 = vmatpush.msra.mxu2 %v3565_v51 }
  0x7a   :  { %591 = vmatpush.msra.mxu3 %v3513_v49  ;;  %660 = vmatpush.msrb.mxu0 %v3450_v18 }
  0x7b   :  { %550 = vmatpush.msra.mxu1 %v3456_v21  ;;  %572 = vmatpush.msra.mxu2 %v3571_v60 }
  0x7c   :  { %331 = vmatmul.f32.gmra.mxu2 %v3587_v47  ;;  %592 = vmatpush.msra.mxu3 %v3519_v53 }
  0x7d   :  { %551 = vmatpush.msra.mxu1 %v3462_v24  ;;  %573 = vmatpush.msra.mxu2 %v3577_v8 }
  0x7e   :  { %593 = vmatpush.msra.mxu3 %v3526_v57  ;;  %661 = vmatpush.msrb.mxu0 %v3456_v21 }
  0x7f   :  { %552 = vmatpush.msra.mxu1 %v3470_v28  ;;  %574 = vmatpush.msra.mxu2 %v3581_v20 }
  0x80   :  { %290 = vmatmul.f32.gmra.mxu1 %v3587_v47  ;;  %594 = vmatpush.msra.mxu3 %v3537_v63 }
  0x81   :  { %553 = vmatpush.msra.mxu1 %v3476_v31  ;;  %575 = vmatpush.msra.mxu2 %v3585_v43 }
  0x82   :  { %595 = vmatpush.msra.mxu3 %v3549_v14  ;;  %662 = vmatpush.msrb.mxu0 %v3462_v24 }
  0x83   :  { %554 = vmatpush.msra.mxu1 %v3482_v34  ;;  %576 = vmatpush.msra.mxu2 %v3591_v61 }
  0x84   :  { %334 = vmatmul.f32.gmra.mxu2 %v3498_v41  ;;  %596 = vmatpush.msra.mxu3 %v3561_v39 }
  0x85   :  { %555 = vmatpush.msra.mxu1 %v3488_v37  ;;  %692 = vmatpush.msrb.mxu2 %v3448_v16 }
  0x86   :  { %763 = vmatpush.msrb.mxu3 %v3425_v1  ;;  %663 = vmatpush.msrb.mxu0 %v3470_v28 }
  0x87   :  { %556 = vmatpush.msra.mxu1 %v3494_v40  ;;  %693 = vmatpush.msrb.mxu2 %v3454_v19 }
  0x88   :  { %293 = vmatmul.f32.gmra.mxu1 %v3498_v41  ;;  %664 = vmatpush.msrb.mxu0 %v3476_v31  ;;  %v216_v41 = vld [vmem:[#allocation10] sm:$0x7] }
  0x89   :  { %672 = vmatpush.msrb.mxu1 %v3500_v42  ;;  %694 = vmatpush.msrb.mxu2 %v3459_v22 }
  0x8a   :  { %764 = vmatpush.msrb.mxu3 %v3428_v3  ;;  %665 = vmatpush.msrb.mxu0 %v3482_v34 }
  0x8b   :  { %673 = vmatpush.msrb.mxu1 %v3508_v46  ;;  %695 = vmatpush.msrb.mxu2 %v3465_v25 }
  0x8c   :  { %337 = vmatmul.f32.gmra.mxu2 %v3528_v58  ;;  %666 = vmatpush.msrb.mxu0 %v3488_v37 }
  0x8d   :  { %674 = vmatpush.msrb.mxu1 %v3515_v50  ;;  %696 = vmatpush.msrb.mxu2 %v3468_v26 }
  0x8e   :  { %765 = vmatpush.msrb.mxu3 %v3430_v5  ;;  %667 = vmatpush.msrb.mxu0 %v3494_v40 }
  0x8f   :  { %675 = vmatpush.msrb.mxu1 %v3522_v54  ;;  %697 = vmatpush.msrb.mxu2 %v3474_v29 }
  0x90   :  { %296 = vmatmul.f32.gmra.mxu1 %v3528_v58  ;;  %783 = vmatpush.msra.mxu0 %v3500_v42  ;;  %v3743_v58 = vperm.slane %v216_v41, 0 }
  0x91   :  { %676 = vmatpush.msrb.mxu1 %v3530_v59  ;;  %698 = vmatpush.msrb.mxu2 %v3480_v32 }
  0x92   :  { %766 = vmatpush.msrb.mxu3 %v3433_v7  ;;  %784 = vmatpush.msra.mxu0 %v3508_v46  ;;  %5129 = vst [vmem:[#allocation32_spill] sm:$0xff] %v3743_v58 }
  0x93   :  { %677 = vmatpush.msrb.mxu1 %v3534_v62  ;;  %699 = vmatpush.msrb.mxu2 %v3486_v35 }
  0x94   :  { %340 = vmatmul.f32.gmra.mxu2 %v3553_v23  ;;  %785 = vmatpush.msra.mxu0 %v3515_v50 }
  0x95   :  { %678 = vmatpush.msrb.mxu1 %v3541_v4  ;;  %700 = vmatpush.msrb.mxu2 %v3492_v38 }
  0x96   :  { %767 = vmatpush.msrb.mxu3 %v3436_v9  ;;  %786 = vmatpush.msra.mxu0 %v3522_v54 }
  0x97   :  { %679 = vmatpush.msrb.mxu1 %v3547_v12  ;;  %701 = vmatpush.msrb.mxu2 %v3504_v44 }
  0x98   :  { %299 = vmatmul.f32.gmra.mxu1 %v3553_v23  ;;  %787 = vmatpush.msra.mxu0 %v3530_v59 }
  0x99   :  { %680 = vmatpush.msrb.mxu1 %v3555_v27  ;;  %702 = vmatpush.msrb.mxu2 %v3513_v49 }
  0x9a   :  { %768 = vmatpush.msrb.mxu3 %v3439_v11  ;;  %788 = vmatpush.msra.mxu0 %v3534_v62 }
  0x9b   :  { %681 = vmatpush.msrb.mxu1 %v3559_v36  ;;  %703 = vmatpush.msrb.mxu2 %v3519_v53 }
  0x9c   :  { %343 = vmatmul.f32.gmra.mxu2 %v3575_v2  ;;  %769 = vmatpush.msrb.mxu3 %v3442_v13 }
  0x9d   :  { %682 = vmatpush.msrb.mxu1 %v3565_v51  ;;  %704 = vmatpush.msrb.mxu2 %v3526_v57 }
  0x9e   :  { %789 = vmatpush.msra.mxu0 %v3541_v4  ;;  %770 = vmatpush.msrb.mxu3 %v3445_v15 }
  0x9f   :  { %683 = vmatpush.msrb.mxu1 %v3571_v60  ;;  %705 = vmatpush.msrb.mxu2 %v3537_v63 }
  0xa0   :  { %302 = vmatmul.f32.gmra.mxu1 %v3575_v2  ;;  %790 = vmatpush.msra.mxu0 %v3547_v12 }
  0xa1   :  { %684 = vmatpush.msrb.mxu1 %v3577_v8  ;;  %706 = vmatpush.msrb.mxu2 %v3549_v14  ;;  %v3777_v14 = vperm.slane %v419_v48, 2 }
  0xa2   :  { %771 = vmatpush.msrb.mxu3 %v3450_v18  ;;  %791 = vmatpush.msra.mxu0 %v3555_v27 }
  0xa3   :  { %685 = vmatpush.msrb.mxu1 %v3581_v20  ;;  %707 = vmatpush.msrb.mxu2 %v3561_v39 }
  0xa4   :  { %772 = vmatpush.msrb.mxu3 %v3456_v21  ;;  %792 = vmatpush.msra.mxu0 %v3559_v36 }
  0xa5   :  { %686 = vmatpush.msrb.mxu1 %v3585_v43 }
  0xa6   :  { %773 = vmatpush.msrb.mxu3 %v3462_v24  ;;  %793 = vmatpush.msra.mxu0 %v3565_v51 }
  0xa7   :  { %687 = vmatpush.msrb.mxu1 %v3591_v61 }
  0xa8   :  { %774 = vmatpush.msrb.mxu3 %v3470_v28  ;;  %794 = vmatpush.msra.mxu0 %v3571_v60 }
  0xaa   :  { %775 = vmatpush.msrb.mxu3 %v3476_v31  ;;  %795 = vmatpush.msra.mxu0 %v3577_v8 }
  0xac   :  { %776 = vmatpush.msrb.mxu3 %v3482_v34  ;;  %796 = vmatpush.msra.mxu0 %v3581_v20 }
  0xae   :  { %777 = vmatpush.msrb.mxu3 %v3488_v37  ;;  %797 = vmatpush.msra.mxu0 %v3585_v43 }
  0xb0   :  { %778 = vmatpush.msrb.mxu3 %v3494_v40  ;;  %798 = vmatpush.msra.mxu0 %v3591_v61 }
  0xc3   :  { %v241_v23 = vpop.f32.mrf.mxu1 }
  0xc4   :  { %v242_v52 = vadd.f32 %v241_v23, %v3743_v58 }
  0xc7   :  { %v3748_v2 = vpop.f32.mrf.mxu2 }
  0xc8   :  { %5131 = vst [vmem:[#allocation34_spill] sm:$0xff] %v3748_v2  ;;  %v447_v33 = vpop.f32.mrf.mxu3 }
  0xc9   :  { %v448_v47 = vadd.f32 %v447_v33, %v3745_v6 }
  0xcb   :  { %v490_v55 = vadd.f32 %v448_v47, %v242_v52  ;;  %v244_v0 = vpop.f32.mrf.mxu1 }
  0xcc   :  { %v3752_v10 = vadd.f32 %v244_v0, %v3743_v58 }
  0xcd   :  { %v2722_v56 = vmul.f32 -1.442695, %v490_v55  ;;  %v3766_v55 = vperm.slane %v216_v41, 1 }
  0xce   :  { %5132 = vst [vmem:[#allocation35_spill] sm:$0xff] %v3752_v10 }
  0xcf   :  { %2793 = vpow2.f32 %v2722_v56  ;;  %v3754_v17 = vpop.f32.mrf.mxu2  ;;  %5138 = vst [vmem:[#allocation41_spill] sm:$0xff] %v3766_v55  ;;  %v3768_v56 = vperm.slane %v419_v48, 1 }
  0xd0   :  { %5133 = vst [vmem:[#allocation36_spill] sm:$0xff] %v3754_v17 }
  0xd1   :  { %5139 = vst [vmem:[#allocation42_spill] sm:$0xff] %v3768_v56 }
  0xd3   :  { %v247_v45 = vpop.f32.mrf.mxu1 }
  0xd4   :  { %v3757_v61 = vadd.f32 %v247_v45, %v3743_v58 }
  0xd5   :  { %v2794_v30 = vpop.eup %2793 }
  0xd6   :  { %5134 = vst [vmem:[#allocation37_spill] sm:$0xff] %v3757_v61  ;;  %v494_v2 = vadd.f32 1.0, %v2794_v30 }
  0xd7   :  { %v3759_v23 = vpop.f32.mrf.mxu2 }
  0xd8   :  { %5135 = vst [vmem:[#allocation38_spill] sm:$0xff] %v3759_v23  ;;  %2795 = vrcp.f32 %v494_v2  ;;  %v506_v37 = vand.u32 2147483648, %v494_v2  ;;  %vm500_vm1 = vweird.f32 %v494_v2 }
  0xdb   :  { %v250_v40 = vpop.f32.mrf.mxu1 }
  0xdc   :  { %v3762_v52 = vadd.f32 %v250_v40, %v3743_v58 }
  0xde   :  { %5136 = vst [vmem:[#allocation39_spill] sm:$0xff] %v3762_v52  ;;  %v2796_v47 = vpop.eup %2795 }
  0xdf   :  { %v3764_v33 = vpop.f32.mrf.mxu2  ;;  %v496_v0 = vmul.f32 %v2796_v47, %v494_v2  ;;  %vm501_vm0 = vweird.f32 %v2796_v47 }
  0xe0   :  { %5137 = vst [vmem:[#allocation40_spill] sm:$0xff] %v3764_v33  ;;  %vm502_vm2 = vmor %vm500_vm1, %vm501_vm0 }
  0xe1   :  { %v497_v23 = vsub.f32 1.0, %v496_v0 }
  0xe3   :  { %v498_v40 = vmul.f32 %v2796_v47, %v497_v23  ;;  %v507_v23 = vor.u32 1.1754944e-38, %v506_v37 }
  0xe4   :  { %v282_v17 = vpop.f32.mrf.mxu1 }
  0xe5   :  { %v283_v45 = vadd.f32 %v282_v17, %v3766_v55  ;;  %v499_v43 = vadd.f32 %v2796_v47, %v498_v40  ;;  %v504_v17 = vand.u32 2147483647, %v494_v2 }
  0xe7   :  { %v323_v10 = vpop.f32.mrf.mxu2  ;;  %v503_v0 = vsel %vm502_vm2, %v2796_v47, %v499_v43  ;;  %vm505_vm3 = vcmp.eq.f32.partialorder %v504_v17, 8.507059e+37 }
  0xe8   :  { %v467_v61 = vpop.f32.mrf.mxu3  ;;  %v508_v40 = vsel %vm505_vm3, %v507_v23, %v503_v0 }
  0xe9   :  { %v468_v30 = vadd.f32 %v467_v61, %v3768_v56  ;;  %v487_v61 = vpop.f32.mrf.mxu0 }
  0xeb   :  { %v510_v6 = vadd.f32 %v468_v30, %v283_v45  ;;  %v3780_v45 = vperm.slane %v216_v41, 2 }
  0xed   :  { %v2723_v39 = vmul.f32 -1.442695, %v510_v6  ;;  %v285_v58 = vpop.f32.mrf.mxu1  ;;  %5142 = vst [vmem:[#allocation45_spill] sm:$0xff] %v3780_v45 }
  0xee   :  { %v3775_v52 = vadd.f32 %v285_v58, %v3766_v55 }
  0xef   :  { %2797 = vpow2.f32 %v2723_v39  ;;  %v3772_v33 = vpop.f32.mrf.mxu2  ;;  %v488_v39 = vadd.f32 %v487_v61, %v3777_v14 }
  0xf0   :  { %5140 = vst [vmem:[#allocation43_spill] sm:$0xff] %v3772_v33  ;;  %v324_v33 = vadd.f32 %v323_v10, %v3780_v45 }
  0xf1   :  { %5141 = vst [vmem:[#allocation44_spill] sm:$0xff] %v3775_v52  ;;  %v530_v2 = vmul.f32 %v508_v40, %v488_v39 }
  0xf5   :  { %v2798_v20 = vpop.eup %2797  ;;  %v288_v58 = vpop.f32.mrf.mxu1 }
  0xf6   :  { %v514_v6 = vadd.f32 1.0, %v2798_v20  ;;  %v3785_v48 = vadd.f32 %v288_v58, %v3766_v55  ;;  %v531_v20 = vadd.f32 %v530_v2, %v324_v33 }
  0xf7   :  { %v3782_v30 = vpop.f32.mrf.mxu2 }
  0xf8   :  { %2799 = vrcp.f32 %v514_v6  ;;  %5143 = vst [vmem:[#allocation46_spill] sm:$0xff] %v3782_v30  ;;  %v526_v30 = vand.u32 2147483648, %v514_v6  ;;  %v524_v23 = vand.u32 2147483647, %v514_v6  ;;  %vm520_vm5 = vweird.f32 %v514_v6 }
  0xf9   :  { %2801 = vtanh.f32 %v531_v20 }
  0xfa   :  { %v527_v10 = vor.u32 1.1754944e-38, %v526_v30  ;;  %vm525_vm7 = vcmp.eq.f32.partialorder %v524_v23, 8.507059e+37 }
  0xfd   :  { %v291_v37 = vpop.f32.mrf.mxu1 }
  0xfe   :  { %v2800_v52 = vpop.eup %2799  ;;  %v3789_v17 = vadd.f32 %v291_v37, %v3766_v55 }
  0xff   :  { %v516_v43 = vmul.f32 %v2800_v52, %v514_v6  ;;  %v332_v47 = vpop.f32.mrf.mxu2  ;;  %vm521_vm4 = vweird.f32 %v2800_v52 }
 0x100   :  { %5144 = vst [vmem:[#allocation47_spill] sm:$0xff] %v3789_v17  ;;  %v3792_v41 = vadd.f32 %v332_v47, %v3780_v45  ;;  %vm522_vm6 = vmor %vm520_vm5, %vm521_vm4 }
 0x101   :  { %v517_v61 = vsub.f32 1.0, %v516_v43 }
 0x102   :  { %5145 = vst [vmem:[#allocation48_spill] sm:$0xff] %v3792_v41 }
 0x103   :  { %v518_v0 = vmul.f32 %v2800_v52, %v517_v61  ;;  %v2802_v61 = vpop.eup %2801 }
 0x105   :  { %v519_v39 = vadd.f32 %v2800_v52, %v518_v0  ;;  %v294_v40 = vpop.f32.mrf.mxu1 }
 0x106   :  { %v3795_v37 = vadd.f32 %v294_v40, %v3766_v55 }
 0x107   :  { %v523_v58 = vsel %vm522_vm6, %v2800_v52, %v519_v39  ;;  %v335_v2 = vpop.f32.mrf.mxu2 }
 0x108   :  { %v528_v33 = vsel %vm525_vm7, %v527_v10, %v523_v58  ;;  %5146 = vst [vmem:[#allocation49_spill] sm:$0xff] %v3795_v37  ;;  %v3798_v47 = vadd.f32 %v335_v2, %v3780_v45 }
 0x109   :  { %v533_v43 = vsub.f32 1.0, %v528_v33  ;;  %v535_v17 = vmul.f32 0.0, %v528_v33 }
 0x10a   :  { %5147 = vst [vmem:[#allocation50_spill] sm:$0xff] %v3798_v47 }
 0x10b   :  { %v534_v41 = vmul.f32 %v2802_v61, %v533_v43 }
 0x10d   :  { %v3800_v20 = vadd.f32 %v535_v17, %v534_v41  ;;  %v297_v52 = vpop.f32.mrf.mxu1 }
 0x10e   :  { %v3807_v30 = vadd.f32 %v297_v52, %v3766_v55 }
 0x10f   :  { %5148 = vst [vmem:[#allocation51_spill] sm:$0xff] %v3800_v20  ;;  %557 = vmatmul.f32.vlgmr.msra.gmra.mxu1 %v3800_v20  ;;  %577 = vmatmul.f32.vlgmr.msra.gmra.mxu2 %v3800_v20  ;;  %v338_v6 = vpop.f32.mrf.mxu2 }
 0x110   :  { %597 = vmatmul.f32.vlgmr.msra.gmra.mxu3 %v3800_v20  ;;  %803 = vmatpush.msra.mxu1 %v3448_v16  ;;  %5149 = vst [vmem:[#allocation52_spill] sm:$0xff] %v3807_v30  ;;  %v3810_v0 = vadd.f32 %v338_v6, %v3780_v45 }
 0x111   :  { %874 = vmatpush.msra.mxu2 %v3425_v1  ;;  %894 = vmatpush.msra.mxu3 %v3500_v42 }
 0x112   :  { %5150 = vst [vmem:[#allocation53_spill] sm:$0xff] %v3810_v0  ;;  %804 = vmatpush.msra.mxu1 %v3454_v19 }
 0x113   :  { %875 = vmatpush.msra.mxu2 %v3428_v3  ;;  %895 = vmatpush.msra.mxu3 %v3508_v46 }
 0x114   :  { %805 = vmatpush.msra.mxu1 %v3459_v22 }
 0x115   :  { %876 = vmatpush.msra.mxu2 %v3430_v5  ;;  %896 = vmatpush.msra.mxu3 %v3515_v50  ;;  %v300_v1 = vpop.f32.mrf.mxu1  ;;  %v5153_v5 = vld [vmem:[#allocation29_spill] sm:$0xff] }
 0x116   :  { %806 = vmatpush.msra.mxu1 %v3465_v25  ;;  %v3825_v3 = vadd.f32 %v300_v1, %v3766_v55  ;;  %v5162_v25 = vld [vmem:[#allocation33_spill] sm:$0xff] }
 0x117   :  { %877 = vmatpush.msra.mxu2 %v3433_v7  ;;  %897 = vmatpush.msra.mxu3 %v3522_v54  ;;  %v341_v16 = vpop.f32.mrf.mxu2  ;;  %v5154_v7 = vld [vmem:[#allocation27_spill] sm:$0xff] }
 0x118   :  { %807 = vmatpush.msra.mxu1 %v3468_v26  ;;  %5151 = vst [vmem:[#allocation54_spill] sm:$0xff] %v3825_v3  ;;  %v3828_v19 = vadd.f32 %v341_v16, %v3780_v45 }
 0x119   :  { %878 = vmatpush.msra.mxu2 %v3436_v9  ;;  %898 = vmatpush.msra.mxu3 %v3530_v59  ;;  %v5155_v9 = vld [vmem:[#allocation25_spill] sm:$0xff] }
 0x11a   :  { %5152 = vst [vmem:[#allocation55_spill] sm:$0xff] %v3828_v19  ;;  %808 = vmatpush.msra.mxu1 %v3474_v29 }
 0x11b   :  { %879 = vmatpush.msra.mxu2 %v3439_v11  ;;  %899 = vmatpush.msra.mxu3 %v3534_v62  ;;  %v5156_v11 = vld [vmem:[#allocation30_spill] sm:$0xff] }
 0x11c   :  { %809 = vmatpush.msra.mxu1 %v3480_v32 }
 0x11d   :  { %880 = vmatpush.msra.mxu2 %v3442_v13  ;;  %900 = vmatpush.msra.mxu3 %v3541_v4  ;;  %v5157_v13 = vld [vmem:[#allocation28_spill] sm:$0xff] }
 0x11e   :  { %810 = vmatpush.msra.mxu1 %v3486_v35  ;;  %v5164_v35 = vld [vmem:[#allocation44_spill] sm:$0xff] }
 0x11f   :  { %881 = vmatpush.msra.mxu2 %v3445_v15  ;;  %901 = vmatpush.msra.mxu3 %v3547_v12  ;;  %v5158_v15 = vld [vmem:[#allocation26_spill] sm:$0xff]  ;;  %v3867_v22 = vpop.f32.mrf.mxu2 }
 0x120   :  { %811 = vmatpush.msra.mxu1 %v3492_v38  ;;  %5161 = vst [vmem:[#allocation27_spill] sm:$0xff] %v3867_v22 }
 0x121   :  { %882 = vmatpush.msra.mxu2 %v3450_v18  ;;  %902 = vmatpush.msra.mxu3 %v3555_v27  ;;  %v5159_v18 = vld [vmem:[#allocation31_spill] sm:$0xff] }
 0x122   :  { %812 = vmatpush.msra.mxu1 %v3504_v44 }
 0x123   :  { %883 = vmatpush.msra.mxu2 %v3456_v21  ;;  %903 = vmatpush.msra.mxu3 %v3559_v36  ;;  %v3865_v21 = vpop.f32.mrf.mxu1 }
 0x124   :  { %813 = vmatpush.msra.mxu1 %v3513_v49  ;;  %5160 = vst [vmem:[#allocation29_spill] sm:$0xff] %v3865_v21  ;;  %v5177_v21 = vld [vmem:[#allocation47_spill] sm:$0xff] }
 0x125   :  { %884 = vmatpush.msra.mxu2 %v3462_v24  ;;  %904 = vmatpush.msra.mxu3 %v3565_v51 }
 0x126   :  { %814 = vmatpush.msra.mxu1 %v3519_v53 }
 0x127   :  { %885 = vmatpush.msra.mxu2 %v3470_v28  ;;  %905 = vmatpush.msra.mxu3 %v3571_v60  ;;  %v5163_v28 = vld [vmem:[#allocation35_spill] sm:$0xff] }
 0x128   :  { %815 = vmatpush.msra.mxu1 %v3526_v57 }
 0x129   :  { %886 = vmatpush.msra.mxu2 %v3476_v31  ;;  %906 = vmatpush.msra.mxu3 %v3577_v8 }
 0x12a   :  { %816 = vmatpush.msra.mxu1 %v3537_v63 }
 0x12b   :  { %887 = vmatpush.msra.mxu2 %v3482_v34  ;;  %907 = vmatpush.msra.mxu3 %v5153_v5 }
 0x12c   :  { %817 = vmatpush.msra.mxu1 %v5154_v7 }
 0x12d   :  { %888 = vmatpush.msra.mxu2 %v5155_v9  ;;  %908 = vmatpush.msra.mxu3 %v5156_v11 }
 0x12e   :  { %818 = vmatpush.msra.mxu1 %v5157_v13 }
 0x12f   :  { %889 = vmatpush.msra.mxu2 %v5158_v15  ;;  %909 = vmatpush.msra.mxu3 %v5159_v18 }
 0x18c   :  { %v558_v24 = vpop.f32.mrf.mxu1 }
 0x18d   :  { %v559_v26 = vadd.f32 %v558_v24, %v5162_v25 }
 0x18f   :  { %v601_v29 = vadd.f32 %v559_v26, %v5163_v28  ;;  %v5165_v28 = vld [vmem:[#allocation43_spill] sm:$0xff] }
 0x191   :  { %v2724_v31 = vmul.f32 -1.442695, %v601_v29  ;;  %v327_v29 = vadd.f32 %v5165_v28, %v3780_v45  ;;  %v3927_v28 = vld [vmem:[#allocation9 + $0xd8] sm:$0xff] }
 0x192   :  { %v578_v32 = vpop.f32.mrf.mxu2 }
 0x193   :  { %2803 = vpow2.f32 %v2724_v31  ;;  %v579_v34 = vadd.f32 %v578_v32, %v3768_v56  ;;  %v598_v6 = vpop.f32.mrf.mxu3 }
 0x194   :  { %v599_v24 = vadd.f32 %v598_v6, %v3777_v14  ;;  %v3889_v6 = vld [vmem:[#allocation9 + $0x160] sm:$0xff] }
 0x195   :  { %v621_v38 = vadd.f32 %v579_v34, %v5164_v35 }
 0x197   :  { %v2725_v17 = vmul.f32 -1.442695, %v621_v38 }
 0x199   :  { %v2804_v41 = vpop.eup %2803  ;;  %2805 = vpow2.f32 %v2725_v17 }
 0x19a   :  { %v605_v23 = vadd.f32 1.0, %v2804_v41 }
 0x19c   :  { %2807 = vrcp.f32 %v605_v23  ;;  %v617_v2 = vand.u32 2147483648, %v605_v23  ;;  %v615_v61 = vand.u32 2147483647, %v605_v23  ;;  %vm611_vm9 = vweird.f32 %v605_v23 }
 0x19e   :  { %v618_v9 = vor.u32 1.1754944e-38, %v617_v2  ;;  %vm616_vm11 = vcmp.eq.f32.partialorder %v615_v61, 8.507059e+37 }
 0x19f   :  { %v2806_v39 = vpop.eup %2805 }
 0x1a0   :  { %v625_v10 = vadd.f32 1.0, %v2806_v39 }
 0x1a2   :  { %v2808_v58 = vpop.eup %2807  ;;  %2809 = vrcp.f32 %v625_v10  ;;  %v637_v34 = vand.u32 2147483648, %v625_v10  ;;  %v635_v38 = vand.u32 2147483647, %v625_v10  ;;  %vm631_vm13 = vweird.f32 %v625_v10 }
 0x1a3   :  { %v607_v33 = vmul.f32 %v2808_v58, %v605_v23  ;;  %vm612_vm8 = vweird.f32 %v2808_v58 }
 0x1a4   :  { %vm613_vm10 = vmor %vm611_vm9, %vm612_vm8  ;;  %v638_v23 = vor.u32 1.1754944e-38, %v637_v34  ;;  %vm636_vm15 = vcmp.eq.f32.partialorder %v635_v38, 8.507059e+37 }
 0x1a5   :  { %v608_v40 = vsub.f32 1.0, %v607_v33 }
 0x1a7   :  { %v609_v43 = vmul.f32 %v2808_v58, %v608_v40 }
 0x1a8   :  { %v2810_v52 = vpop.eup %2809 }
 0x1a9   :  { %v627_v1 = vmul.f32 %v2810_v52, %v625_v10  ;;  %v610_v16 = vadd.f32 %v2808_v58, %v609_v43  ;;  %vm632_vm12 = vweird.f32 %v2810_v52  ;;  %v3882_v10 = vld [vmem:[#allocation9 + $0x178] sm:$0xff] }
 0x1aa   :  { %vm633_vm14 = vmor %vm631_vm13, %vm632_vm12 }
 0x1ab   :  { %v628_v15 = vsub.f32 1.0, %v627_v1  ;;  %v614_v26 = vsel %vm613_vm10, %v2808_v58, %v610_v16  ;;  %v3892_v1 = vld [vmem:[#allocation9 + $0x150] sm:$0xff]  ;;  %v3896_v16 = vld [vmem:[#allocation9 + $0x148] sm:$0xff] }
 0x1ac   :  { %v619_v31 = vsel %vm616_vm11, %v618_v9, %v614_v26  ;;  %v3899_v9 = vld [vmem:[#allocation9 + $0x138] sm:$0xff]  ;;  %v3920_v26 = vld [vmem:[#allocation9 + $0xf0] sm:$0xff] }
 0x1ad   :  { %v629_v32 = vmul.f32 %v2810_v52, %v628_v15  ;;  %v641_v35 = vmul.f32 %v619_v31, %v599_v24  ;;  %v3906_v15 = vld [vmem:[#allocation9 + $0x120] sm:$0xff]  ;;  %v3913_v24 = vld [vmem:[#allocation9 + $0x108] sm:$0xff] }
 0x1ae   :  { %v3941_v31 = vld [vmem:[#allocation9 + $0xa8] sm:$0xff] }
 0x1af   :  { %v630_v17 = vadd.f32 %v2810_v52, %v629_v32  ;;  %v642_v41 = vadd.f32 %v641_v35, %v327_v29  ;;  %v3934_v29 = vld [vmem:[#allocation9 + $0xc0] sm:$0xff] }
 0x1b0   :  { %v3956_v32 = vld [vmem:[#allocation9 + $0x60] sm:$0xff] }
 0x1b1   :  { %v634_v39 = vsel %vm633_vm14, %v2810_v52, %v630_v17  ;;  %2811 = vtanh.f32 %v642_v41  ;;  %v3885_v52 = vld [vmem:[#allocation9 + $0x168] sm:$0xff] }
 0x1b2   :  { %v639_v33 = vsel %vm636_vm15, %v638_v23, %v634_v39 }
 0x1b3   :  { %v644_v58 = vsub.f32 1.0, %v639_v33  ;;  %v646_v43 = vmul.f32 %v639_v33, %v3800_v20  ;;  %v5178_v20 = vld [vmem:[#allocation39_spill] sm:$0xff] }
 0x1b7   :  { %v2812_v40 = vpop.eup %2811 }
 0x1b8   :  { %v645_v2 = vmul.f32 %v2812_v40, %v644_v58 }
 0x1ba   :  { %v3877_v61 = vadd.f32 %v646_v43, %v645_v2 }
 0x1bc   :  { %5166 = vst [vmem:[#allocation25_spill] sm:$0xff] %v3877_v61  ;;  %668 = vmatmul.f32.vlgmr.msrb.gmra.mxu0 %v3877_v61  ;;  %688 = vmatmul.f32.vlgmr.msrb.gmra.mxu1 %v3877_v61 }
 0x1bd   :  { %708 = vmatmul.f32.vlgmr.msrb.gmra.mxu2 %v3877_v61  ;;  %914 = vmatpush.msrb.mxu0 %v3882_v10 }
 0x1be   :  { %985 = vmatpush.msrb.mxu1 %v3885_v52  ;;  %1005 = vmatpush.msrb.mxu2 %v3500_v42  ;;  %v3903_v42 = vld [vmem:[#allocation9 + $0x130] sm:$0xff] }
 0x1bf   :  { %915 = vmatpush.msrb.mxu0 %v3889_v6 }
 0x1c0   :  { %986 = vmatpush.msrb.mxu1 %v3892_v1  ;;  %1006 = vmatpush.msrb.mxu2 %v3508_v46  ;;  %v3910_v46 = vld [vmem:[#allocation9 + $0x118] sm:$0xff] }
 0x1c1   :  { %916 = vmatpush.msrb.mxu0 %v3896_v16 }
 0x1c2   :  { %987 = vmatpush.msrb.mxu1 %v3899_v9  ;;  %1007 = vmatpush.msrb.mxu2 %v3515_v50  ;;  %v3917_v50 = vld [vmem:[#allocation9 + $0x100] sm:$0xff] }
 0x1c3   :  { %917 = vmatpush.msrb.mxu0 %v3903_v42 }
 0x1c4   :  { %988 = vmatpush.msrb.mxu1 %v3906_v15  ;;  %1008 = vmatpush.msrb.mxu2 %v3522_v54  ;;  %v3924_v54 = vld [vmem:[#allocation9 + $0xe8] sm:$0xff] }
 0x1c5   :  { %918 = vmatpush.msrb.mxu0 %v3910_v46 }
 0x1c6   :  { %989 = vmatpush.msrb.mxu1 %v3913_v24  ;;  %1009 = vmatpush.msrb.mxu2 %v3530_v59  ;;  %v3931_v59 = vld [vmem:[#allocation9 + $0xd0] sm:$0xff] }
 0x1c7   :  { %919 = vmatpush.msrb.mxu0 %v3917_v50 }
 0x1c8   :  { %990 = vmatpush.msrb.mxu1 %v3920_v26  ;;  %1010 = vmatpush.msrb.mxu2 %v3534_v62  ;;  %v3938_v62 = vld [vmem:[#allocation9 + $0xb8] sm:$0xff] }
 0x1c9   :  { %920 = vmatpush.msrb.mxu0 %v3924_v54 }
 0x1ca   :  { %991 = vmatpush.msrb.mxu1 %v3927_v28  ;;  %1011 = vmatpush.msrb.mxu2 %v3541_v4  ;;  %v3946_v4 = vld [vmem:[#allocation9 + $0x90] sm:$0xff] }
 0x1cb   :  { %921 = vmatpush.msrb.mxu0 %v3931_v59 }
 0x1cc   :  { %992 = vmatpush.msrb.mxu1 %v3934_v29  ;;  %1012 = vmatpush.msrb.mxu2 %v3547_v12  ;;  %v3951_v12 = vld [vmem:[#allocation9 + $0x78] sm:$0xff] }
 0x1cd   :  { %922 = vmatpush.msrb.mxu0 %v3938_v62 }
 0x1ce   :  { %993 = vmatpush.msrb.mxu1 %v3941_v31  ;;  %1013 = vmatpush.msrb.mxu2 %v3555_v27 }
 0x1cf   :  { %923 = vmatpush.msrb.mxu0 %v3504_v44  ;;  %v3961_v44 = vld [vmem:[#allocation9 + $0x48] sm:$0xff] }
 0x1d0   :  { %994 = vmatpush.msrb.mxu1 %v3946_v4  ;;  %1014 = vmatpush.msrb.mxu2 %v3559_v36 }
 0x1d1   :  { %924 = vmatpush.msrb.mxu0 %v3513_v49  ;;  %v3966_v49 = vld [vmem:[#allocation9 + $0x30] sm:$0xff] }
 0x1d2   :  { %995 = vmatpush.msrb.mxu1 %v3951_v12  ;;  %1015 = vmatpush.msrb.mxu2 %v3565_v51  ;;  %5167 = vst [vmem:[#allocation30_spill] sm:$0xff] %v3966_v49 }
 0x1d3   :  { %925 = vmatpush.msrb.mxu0 %v3519_v53  ;;  %v3971_v53 = vld [vmem:[#allocation9 + $0x18] sm:$0xff] }
 0x1d4   :  { %996 = vmatpush.msrb.mxu1 %v3956_v32  ;;  %1016 = vmatpush.msrb.mxu2 %v3571_v60  ;;  %5168 = vst [vmem:[#allocation28_spill] sm:$0xff] %v3971_v53  ;;  %v5170_v60 = vld [vmem:[#allocation37_spill] sm:$0xff] }
 0x1d5   :  { %926 = vmatpush.msrb.mxu0 %v3526_v57  ;;  %v3976_v57 = vld [vmem:[#allocation9] sm:$0xff] }
 0x1d6   :  { %997 = vmatpush.msrb.mxu1 %v3961_v44  ;;  %1017 = vmatpush.msrb.mxu2 %v3577_v8  ;;  %5169 = vst [vmem:[#allocation26_spill] sm:$0xff] %v3976_v57 }
 0x1d7   :  { %927 = vmatpush.msrb.mxu0 %v3537_v63 }
 0x1d8   :  { %998 = vmatpush.msrb.mxu1 %v3966_v49  ;;  %1018 = vmatpush.msrb.mxu2 %v5153_v5 }
 0x1d9   :  { %928 = vmatpush.msrb.mxu0 %v5154_v7 }
 0x1da   :  { %999 = vmatpush.msrb.mxu1 %v3971_v53  ;;  %1019 = vmatpush.msrb.mxu2 %v5156_v11 }
 0x1db   :  { %929 = vmatpush.msrb.mxu0 %v5157_v13 }
 0x1dc   :  { %1000 = vmatpush.msrb.mxu1 %v3976_v57  ;;  %1020 = vmatpush.msrb.mxu2 %v5159_v18 }
 0x239   :  { %v669_v63 = vpop.f32.mrf.mxu0  ;;  %v689_v27 = vpop.f32.mrf.mxu1 }
 0x23a   :  { %v670_v36 = vadd.f32 %v669_v63, %v5162_v25  ;;  %v690_v51 = vadd.f32 %v689_v27, %v3768_v56 }
 0x23c   :  { %v712_v8 = vadd.f32 %v670_v36, %v5170_v60  ;;  %v732_v5 = vadd.f32 %v690_v51, %v3785_v48 }
 0x23e   :  { %v2726_v7 = vmul.f32 -1.442695, %v712_v8  ;;  %v2727_v11 = vmul.f32 -1.442695, %v732_v5  ;;  %v5171_v5 = vld [vmem:[#allocation46_spill] sm:$0xff] }
 0x240   :  { %2813 = vpow2.f32 %v2726_v7  ;;  %v709_v43 = vpop.f32.mrf.mxu2  ;;  %v330_v7 = vadd.f32 %v5171_v5, %v3780_v45  ;;  %v4042_v5 = vld [vmem:[#allocation9 + $0x98] sm:$0xff] }
 0x241   :  { %2815 = vpow2.f32 %v2727_v11  ;;  %v710_v36 = vadd.f32 %v709_v43, %v3777_v14  ;;  %v4010_v43 = vld [vmem:[#allocation9 + $0x128] sm:$0xff] }
 0x246   :  { %v2814_v13 = vpop.eup %2813 }
 0x247   :  { %v2816_v34 = vpop.eup %2815  ;;  %v716_v35 = vadd.f32 1.0, %v2814_v13 }
 0x248   :  { %v736_v38 = vadd.f32 1.0, %v2816_v34 }
 0x249   :  { %2817 = vrcp.f32 %v716_v35  ;;  %v728_v58 = vand.u32 2147483648, %v716_v35  ;;  %v726_v48 = vand.u32 2147483647, %v716_v35  ;;  %vm722_vm1 = vweird.f32 %v716_v35 }
 0x24a   :  { %2819 = vrcp.f32 %v736_v38  ;;  %v748_v11 = vand.u32 2147483648, %v736_v38  ;;  %vm742_vm5 = vweird.f32 %v736_v38  ;;  %v746_v34 = vand.u32 2147483647, %v736_v38 }
 0x24b   :  { %v729_v27 = vor.u32 1.1754944e-38, %v728_v58  ;;  %vm727_vm3 = vcmp.eq.f32.partialorder %v726_v48, 8.507059e+37 }
 0x24c   :  { %vm747_vm7 = vcmp.eq.f32.partialorder %v746_v34, 8.507059e+37  ;;  %v4056_v34 = vld [vmem:[#allocation9 + $0x68] sm:$0xff] }
 0x24f   :  { %v2818_v18 = vpop.eup %2817 }
 0x250   :  { %v2820_v17 = vpop.eup %2819  ;;  %v718_v41 = vmul.f32 %v2818_v18, %v716_v35  ;;  %vm723_vm0 = vweird.f32 %v2818_v18  ;;  %v749_v35 = vor.u32 1.1754944e-38, %v748_v11  ;;  %v4049_v11 = vld [vmem:[#allocation9 + $0x80] sm:$0xff] }
 0x251   :  { %v738_v23 = vmul.f32 %v2820_v17, %v736_v38  ;;  %vm724_vm2 = vmor %vm722_vm1, %vm723_vm0  ;;  %vm743_vm4 = vweird.f32 %v2820_v17  ;;  %v3995_v38 = vld [vmem:[#allocation9 + $0x170] sm:$0xff] }
 0x252   :  { %v719_v39 = vsub.f32 1.0, %v718_v41  ;;  %vm744_vm6 = vmor %vm742_vm5, %vm743_vm4 }
 0x253   :  { %v739_v33 = vsub.f32 1.0, %v738_v23 }
 0x254   :  { %v720_v40 = vmul.f32 %v2818_v18, %v719_v39 }
 0x255   :  { %v740_v2 = vmul.f32 %v2820_v17, %v739_v33 }
 0x256   :  { %v721_v63 = vadd.f32 %v2818_v18, %v720_v40 }
 0x257   :  { %v741_v8 = vadd.f32 %v2820_v17, %v740_v2  ;;  %v4005_v2 = vld [vmem:[#allocation9 + $0x140] sm:$0xff] }
 0x258   :  { %v725_v51 = vsel %vm724_vm2, %v2818_v18, %v721_v63  ;;  %v4015_v63 = vld [vmem:[#allocation9 + $0x110] sm:$0xff] }
 0x259   :  { %v730_v60 = vsel %vm727_vm3, %v729_v27, %v725_v51  ;;  %v745_v23 = vsel %vm744_vm6, %v2820_v17, %v741_v8  ;;  %v4000_v17 = vld [vmem:[#allocation9 + $0x158] sm:$0xff]  ;;  %v4030_v51 = vld [vmem:[#allocation9 + $0xc8] sm:$0xff]  ;;  %v4038_v8 = vld [vmem:[#allocation9 + $0xa0] sm:$0xff] }
 0x25a   :  { %v752_v13 = vmul.f32 %v730_v60, %v710_v36  ;;  %v750_v39 = vsel %vm747_vm7, %v749_v35, %v745_v23  ;;  %v4020_v27 = vld [vmem:[#allocation9 + $0xf8] sm:$0xff]  ;;  %v4025_v36 = vld [vmem:[#allocation9 + $0xe0] sm:$0xff]  ;;  %v4035_v60 = vld [vmem:[#allocation9 + $0xb0] sm:$0xff] }
 0x25b   :  { %v755_v33 = vsub.f32 1.0, %v750_v39  ;;  %v757_v40 = vmul.f32 %v750_v39, %v3877_v61  ;;  %v4063_v23 = vld [vmem:[#allocation9 + $0x50] sm:$0xff]  ;;  %v4066_v35 = vld [vmem:[#allocation9 + $0x40] sm:$0xff]  ;;  %v4070_v39 = vld [vmem:[#allocation9 + $0x38] sm:$0xff] }
 0x25c   :  { %v753_v41 = vadd.f32 %v752_v13, %v330_v7  ;;  %v4045_v7 = vld [vmem:[#allocation9 + $0x88] sm:$0xff]  ;;  %v4052_v13 = vld [vmem:[#allocation9 + $0x70] sm:$0xff]  ;;  %5172 = vst [vmem:[#allocation31_spill] sm:$0xff] %v4070_v39 }
 0x25e   :  { %2821 = vtanh.f32 %v753_v41  ;;  %v4059_v41 = vld [vmem:[#allocation9 + $0x58] sm:$0xff] }
 0x264   :  { %v2822_v18 = vpop.eup %2821 }
 0x265   :  { %v756_v58 = vmul.f32 %v2822_v18, %v755_v33  ;;  %v4073_v33 = vld [vmem:[#allocation9 + $0x28] sm:$0xff]  ;;  %v4077_v18 = vld [vmem:[#allocation9 + $0x20] sm:$0xff] }
 0x266   :  { %5173 = vst [vmem:[#allocation35_spill] sm:$0xff] %v4073_v33 }
 0x267   :  { %v3988_v48 = vadd.f32 %v757_v40, %v756_v58  ;;  %5174 = vst [vmem:[#allocation44_spill] sm:$0xff] %v4077_v18  ;;  %v4080_v58 = vld [vmem:[#allocation9 + $0x10] sm:$0xff]  ;;  %v4084_v40 = vld [vmem:[#allocation9 + $0x8] sm:$0xff] }
 0x268   :  { %5175 = vst [vmem:[#allocation43_spill] sm:$0xff] %v4080_v58 }
 0x269   :  { %779 = vmatmul.f32.vlgmr.msrb.gmra.mxu3 %v3988_v48  ;;  %799 = vmatmul.f32.vlgmr.msra.gmra.mxu0 %v3988_v48  ;;  %5176 = vst [vmem:[#allocation37_spill] sm:$0xff] %v4084_v40 }
 0x26a   :  { %819 = vmatmul.f32.vlgmr.msra.gmra.mxu1 %v3988_v48  ;;  %1025 = vmatpush.msrb.mxu3 %v3882_v10 }
 0x26b   :  { %1096 = vmatpush.msra.mxu0 %v3885_v52  ;;  %1116 = vmatpush.msra.mxu1 %v3995_v38 }
 0x26c   :  { %1026 = vmatpush.msrb.mxu3 %v3889_v6 }
 0x26d   :  { %1097 = vmatpush.msra.mxu0 %v3892_v1  ;;  %1117 = vmatpush.msra.mxu1 %v4000_v17 }
 0x26e   :  { %1027 = vmatpush.msrb.mxu3 %v3896_v16 }
 0x26f   :  { %1098 = vmatpush.msra.mxu0 %v3899_v9  ;;  %1118 = vmatpush.msra.mxu1 %v4005_v2 }
 0x270   :  { %1028 = vmatpush.msrb.mxu3 %v3903_v42 }
 0x271   :  { %1099 = vmatpush.msra.mxu0 %v3906_v15  ;;  %1119 = vmatpush.msra.mxu1 %v4010_v43 }
 0x272   :  { %1029 = vmatpush.msrb.mxu3 %v3910_v46 }
 0x273   :  { %1100 = vmatpush.msra.mxu0 %v3913_v24  ;;  %1120 = vmatpush.msra.mxu1 %v4015_v63 }
 0x274   :  { %1030 = vmatpush.msrb.mxu3 %v3917_v50 }
 0x275   :  { %1101 = vmatpush.msra.mxu0 %v3920_v26  ;;  %1121 = vmatpush.msra.mxu1 %v4020_v27 }
 0x276   :  { %1031 = vmatpush.msrb.mxu3 %v3924_v54 }
 0x277   :  { %1102 = vmatpush.msra.mxu0 %v3927_v28  ;;  %1122 = vmatpush.msra.mxu1 %v4025_v36 }
 0x278   :  { %1032 = vmatpush.msrb.mxu3 %v3931_v59 }
 0x279   :  { %1103 = vmatpush.msra.mxu0 %v3934_v29  ;;  %1123 = vmatpush.msra.mxu1 %v4030_v51 }
 0x27a   :  { %1033 = vmatpush.msrb.mxu3 %v3938_v62 }
 0x27b   :  { %1104 = vmatpush.msra.mxu0 %v3941_v31  ;;  %1124 = vmatpush.msra.mxu1 %v4035_v60 }
 0x27c   :  { %1034 = vmatpush.msrb.mxu3 %v4038_v8 }
 0x27d   :  { %1105 = vmatpush.msra.mxu0 %v3946_v4  ;;  %1125 = vmatpush.msra.mxu1 %v4042_v5 }
 0x27e   :  { %1035 = vmatpush.msrb.mxu3 %v4045_v7 }
 0x27f   :  { %1106 = vmatpush.msra.mxu0 %v3951_v12  ;;  %1126 = vmatpush.msra.mxu1 %v4049_v11 }
 0x280   :  { %1036 = vmatpush.msrb.mxu3 %v4052_v13 }
 0x281   :  { %1107 = vmatpush.msra.mxu0 %v3956_v32  ;;  %1127 = vmatpush.msra.mxu1 %v4056_v34 }
 0x282   :  { %1037 = vmatpush.msrb.mxu3 %v4059_v41 }
 0x283   :  { %1108 = vmatpush.msra.mxu0 %v3961_v44  ;;  %1128 = vmatpush.msra.mxu1 %v4063_v23 }
 0x284   :  { %1038 = vmatpush.msrb.mxu3 %v4066_v35 }
 0x285   :  { %1109 = vmatpush.msra.mxu0 %v3966_v49  ;;  %1129 = vmatpush.msra.mxu1 %v4070_v39 }
 0x286   :  { %1039 = vmatpush.msrb.mxu3 %v4073_v33 }
 0x287   :  { %1110 = vmatpush.msra.mxu0 %v3971_v53  ;;  %1130 = vmatpush.msra.mxu1 %v4077_v18 }
 0x288   :  { %1040 = vmatpush.msrb.mxu3 %v4080_v58 }
 0x289   :  { %1111 = vmatpush.msra.mxu0 %v3976_v57  ;;  %1131 = vmatpush.msra.mxu1 %v4084_v40 }
 0x2e6   :  { %v800_v22 = vpop.f32.mrf.mxu0 }
 0x2e7   :  { %v801_v45 = vadd.f32 %v800_v22, %v3768_v56 }
 0x2e9   :  { %v843_v55 = vadd.f32 %v801_v45, %v5177_v21 }
 0x2eb   :  { %v2729_v19 = vmul.f32 -1.442695, %v843_v55 }
 0x2ec   :  { %v780_v3 = vpop.f32.mrf.mxu3 }
 0x2ed   :  { %2823 = vpow2.f32 %v2729_v19  ;;  %v781_v61 = vadd.f32 %v780_v3, %v5162_v25 }
 0x2ef   :  { %v823_v0 = vadd.f32 %v781_v61, %v5178_v20  ;;  %v820_v20 = vpop.f32.mrf.mxu1 }
 0x2f1   :  { %v2728_v30 = vmul.f32 -1.442695, %v823_v0 }
 0x2f3   :  { %v2824_v47 = vpop.eup %2823  ;;  %2825 = vpow2.f32 %v2728_v30  ;;  %v821_v30 = vadd.f32 %v820_v20, %v3777_v14 }
 0x2f4   :  { %v847_v37 = vadd.f32 1.0, %v2824_v47 }
 0x2f6   :  { %2827 = vrcp.f32 %v847_v37  ;;  %v859_v33 = vand.u32 2147483648, %v847_v37  ;;  %vm853_vm13 = vweird.f32 %v847_v37 }
 0x2f8   :  { %v860_v49 = vor.u32 1.1754944e-38, %v859_v33 }
 0x2f9   :  { %v2826_v57 = vpop.eup %2825 }
 0x2fa   :  { %v827_v58 = vadd.f32 1.0, %v2826_v57 }
 0x2fc   :  { %2829 = vrcp.f32 %v827_v58  ;;  %v2828_v40 = vpop.eup %2827  ;;  %v839_v21 = vand.u32 2147483648, %v827_v58  ;;  %v837_v3 = vand.u32 2147483647, %v827_v58  ;;  %vm833_vm9 = vweird.f32 %v827_v58 }
 0x2fd   :  { %v849_v18 = vmul.f32 %v2828_v40, %v847_v37  ;;  %vm854_vm12 = vweird.f32 %v2828_v40 }
 0x2fe   :  { %v840_v47 = vor.u32 1.1754944e-38, %v839_v21  ;;  %vm838_vm11 = vcmp.eq.f32.partialorder %v837_v3, 8.507059e+37  ;;  %vm855_vm14 = vmor %vm853_vm13, %vm854_vm12 }
 0x2ff   :  { %v850_v45 = vsub.f32 1.0, %v849_v18 }
 0x301   :  { %v851_v25 = vmul.f32 %v2828_v40, %v850_v45 }
 0x302   :  { %v2830_v22 = vpop.eup %2829 }
 0x303   :  { %v829_v56 = vmul.f32 %v2830_v22, %v827_v58  ;;  %vm834_vm8 = vweird.f32 %v2830_v22  ;;  %v852_v57 = vadd.f32 %v2828_v40, %v851_v25 }
 0x304   :  { %vm835_vm10 = vmor %vm833_vm9, %vm834_vm8 }
 0x305   :  { %v830_v55 = vsub.f32 1.0, %v829_v56  ;;  %v857_v56 = vand.u32 2147483647, %v847_v37  ;;  %v856_v45 = vsel %vm855_vm14, %v2828_v40, %v852_v57  ;;  %v5180_v37 = vld [vmem:[#allocation30_spill] sm:$0xff] }
 0x307   :  { %v831_v19 = vmul.f32 %v2830_v22, %v830_v55  ;;  %v5179_v55 = vld [vmem:[#allocation48_spill] sm:$0xff]  ;;  %vm858_vm15 = vcmp.eq.f32.partialorder %v857_v56, 8.507059e+37 }
 0x308   :  { %v861_v58 = vsel %vm858_vm15, %v860_v49, %v856_v45 }
 0x309   :  { %v832_v0 = vadd.f32 %v2830_v22, %v831_v19  ;;  %v866_v21 = vsub.f32 1.0, %v861_v58 }
 0x30b   :  { %v836_v61 = vsel %vm835_vm10, %v2830_v22, %v832_v0  ;;  %v868_v22 = vmul.f32 %v861_v58, %v3988_v48 }
 0x30c   :  { %v841_v53 = vsel %vm838_vm11, %v840_v47, %v836_v61 }
 0x30d   :  { %v863_v18 = vmul.f32 %v841_v53, %v821_v30  ;;  %v5191_v53 = vld [vmem:[#allocation42_spill] sm:$0xff] }
 0x30f   :  { %v864_v39 = vadd.f32 %v863_v18, %v5179_v55 }
 0x311   :  { %2831 = vtanh.f32 %v864_v39 }
 0x317   :  { %v2832_v19 = vpop.eup %2831 }
 0x318   :  { %v867_v3 = vmul.f32 %v2832_v19, %v866_v21 }
 0x31a   :  { %v4094_v25 = vadd.f32 %v868_v22, %v867_v3  ;;  %v5193_v3 = vld [vmem:[#allocation50_spill] sm:$0xff] }
 0x31c   :  { %890 = vmatmul.f32.vlgmr.msra.gmra.mxu2 %v4094_v25  ;;  %910 = vmatmul.f32.vlgmr.msra.gmra.mxu3 %v4094_v25 }
 0x31d   :  { %930 = vmatmul.f32.vlgmr.msrb.gmra.mxu0 %v4094_v25  ;;  %1136 = vmatpush.msra.mxu2 %v3882_v10 }
 0x31e   :  { %1207 = vmatpush.msra.mxu3 %v3885_v52  ;;  %1227 = vmatpush.msrb.mxu0 %v3995_v38  ;;  %v5181_v52 = vld [vmem:[#allocation31_spill] sm:$0xff] }
 0x31f   :  { %1137 = vmatpush.msra.mxu2 %v3889_v6 }
 0x320   :  { %1208 = vmatpush.msra.mxu3 %v3892_v1  ;;  %1228 = vmatpush.msrb.mxu0 %v4000_v17  ;;  %v5182_v1 = vld [vmem:[#allocation35_spill] sm:$0xff] }
 0x321   :  { %1138 = vmatpush.msra.mxu2 %v3896_v16 }
 0x322   :  { %1209 = vmatpush.msra.mxu3 %v3899_v9  ;;  %1229 = vmatpush.msrb.mxu0 %v4005_v2  ;;  %v5183_v9 = vld [vmem:[#allocation28_spill] sm:$0xff]  ;;  %v5192_v2 = vld [vmem:[#allocation49_spill] sm:$0xff] }
 0x323   :  { %1139 = vmatpush.msra.mxu2 %v3903_v42 }
 0x324   :  { %1210 = vmatpush.msra.mxu3 %v3906_v15  ;;  %1230 = vmatpush.msrb.mxu0 %v4010_v43  ;;  %v5184_v15 = vld [vmem:[#allocation44_spill] sm:$0xff] }
 0x325   :  { %1140 = vmatpush.msra.mxu2 %v3910_v46 }
 0x326   :  { %1211 = vmatpush.msra.mxu3 %v3913_v24  ;;  %1231 = vmatpush.msrb.mxu0 %v4015_v63  ;;  %v5185_v24 = vld [vmem:[#allocation43_spill] sm:$0xff] }
 0x327   :  { %1141 = vmatpush.msra.mxu2 %v3917_v50 }
 0x328   :  { %1212 = vmatpush.msra.mxu3 %v3920_v26  ;;  %1232 = vmatpush.msrb.mxu0 %v4020_v27  ;;  %v5186_v26 = vld [vmem:[#allocation26_spill] sm:$0xff] }
 0x329   :  { %1142 = vmatpush.msra.mxu2 %v3924_v54 }
 0x32a   :  { %1213 = vmatpush.msra.mxu3 %v3927_v28  ;;  %1233 = vmatpush.msrb.mxu0 %v4025_v36  ;;  %v5187_v28 = vld [vmem:[#allocation37_spill] sm:$0xff] }
 0x32b   :  { %1143 = vmatpush.msra.mxu2 %v3931_v59 }
 0x32c   :  { %1214 = vmatpush.msra.mxu3 %v3934_v29  ;;  %1234 = vmatpush.msrb.mxu0 %v4030_v51 }
 0x32d   :  { %1144 = vmatpush.msra.mxu2 %v3938_v62 }
 0x32e   :  { %1215 = vmatpush.msra.mxu3 %v3941_v31  ;;  %1235 = vmatpush.msrb.mxu0 %v4035_v60 }
 0x32f   :  { %1145 = vmatpush.msra.mxu2 %v4038_v8 }
 0x330   :  { %1216 = vmatpush.msra.mxu3 %v3946_v4  ;;  %1236 = vmatpush.msrb.mxu0 %v4042_v5  ;;  %v5188_v4 = vld [vmem:[#allocation32_spill] sm:$0xff] }
 0x331   :  { %1146 = vmatpush.msra.mxu2 %v4045_v7 }
 0x332   :  { %1217 = vmatpush.msra.mxu3 %v3951_v12  ;;  %1237 = vmatpush.msrb.mxu0 %v4049_v11  ;;  %v5189_v12 = vld [vmem:[#allocation34_spill] sm:$0xff] }
 0x333   :  { %1147 = vmatpush.msra.mxu2 %v4052_v13 }
 0x334   :  { %1218 = vmatpush.msra.mxu3 %v3956_v32  ;;  %1238 = vmatpush.msrb.mxu0 %v4056_v34  ;;  %v254_v32 = vadd.f32 %v5189_v12, %v5188_v4 }
 0x335   :  { %1148 = vmatpush.msra.mxu2 %v4059_v41 }
 0x336   :  { %1219 = vmatpush.msra.mxu3 %v3961_v44  ;;  %1239 = vmatpush.msrb.mxu0 %v4063_v23  ;;  %v5190_v44 = vld [vmem:[#allocation33_spill] sm:$0xff] }
 0x337   :  { %1149 = vmatpush.msra.mxu2 %v4066_v35 }
 0x338   :  { %1220 = vmatpush.msra.mxu3 %v5180_v37  ;;  %1240 = vmatpush.msrb.mxu0 %v5181_v52 }
 0x339   :  { %1150 = vmatpush.msra.mxu2 %v5182_v1 }
 0x33a   :  { %1221 = vmatpush.msra.mxu3 %v5183_v9  ;;  %1241 = vmatpush.msrb.mxu0 %v5184_v15 }
 0x33b   :  { %1151 = vmatpush.msra.mxu2 %v5185_v24 }
 0x33c   :  { %1222 = vmatpush.msra.mxu3 %v5186_v26  ;;  %1242 = vmatpush.msrb.mxu0 %v5187_v28 }
 0x39a   :  { %v931_v30 = vpop.f32.mrf.mxu0 }
 0x39b   :  { %v932_v56 = vadd.f32 %v931_v30, %v3777_v14 }
 0x39f   :  { %v891_v29 = vpop.f32.mrf.mxu2  ;;  %v911_v31 = vpop.f32.mrf.mxu3 }
 0x3a0   :  { %v892_v49 = vadd.f32 %v891_v29, %v5190_v44  ;;  %v912_v38 = vadd.f32 %v911_v31, %v5191_v53 }
 0x3a2   :  { %v934_v17 = vadd.f32 %v892_v49, %v254_v32  ;;  %v954_v43 = vadd.f32 %v912_v38, %v5192_v2  ;;  %v5195_v32 = vld [vmem:[#allocation52_spill] sm:$0xff]  ;;  %v1344_v38 = vld [vmem:[#allocation12 + $0xa8] sm:$0xff]  ;;  %v1341_v2 = vld [vmem:[#allocation12 + $0x90] sm:$0xff] }
 0x3a4   :  { %v2730_v63 = vmul.f32 -1.442695, %v934_v17  ;;  %v2731_v27 = vmul.f32 -1.442695, %v954_v43 }
 0x3a6   :  { %2833 = vpow2.f32 %v2730_v63  ;;  %v1338_v63 = vld [vmem:[#allocation12 + $0x78] sm:$0xff] }
 0x3a7   :  { %2835 = vpow2.f32 %v2731_v27 }
 0x3ac   :  { %v2834_v36 = vpop.eup %2833 }
 0x3ad   :  { %v2836_v51 = vpop.eup %2835  ;;  %v938_v60 = vadd.f32 1.0, %v2834_v36  ;;  %v1335_v36 = vld [vmem:[#allocation12 + $0x60] sm:$0xff] }
 0x3ae   :  { %v958_v5 = vadd.f32 1.0, %v2836_v51  ;;  %v1332_v51 = vld [vmem:[#allocation12 + $0x48] sm:$0xff] }
 0x3af   :  { %2837 = vrcp.f32 %v938_v60  ;;  %v950_v40 = vand.u32 2147483648, %v938_v60  ;;  %v948_v47 = vand.u32 2147483647, %v938_v60  ;;  %vm944_vm1 = vweird.f32 %v938_v60 }
 0x3b0   :  { %2839 = vrcp.f32 %v958_v5  ;;  %v970_v19 = vand.u32 2147483648, %v958_v5  ;;  %vm964_vm5 = vweird.f32 %v958_v5  ;;  %v968_v22 = vand.u32 2147483647, %v958_v5 }
 0x3b1   :  { %v951_v18 = vor.u32 1.1754944e-38, %v950_v40  ;;  %vm949_vm3 = vcmp.eq.f32.partialorder %v948_v47, 8.507059e+37 }
 0x3b2   :  { %v971_v9 = vor.u32 1.1754944e-38, %v970_v19  ;;  %vm969_vm7 = vcmp.eq.f32.partialorder %v968_v22, 8.507059e+37 }
 0x3b5   :  { %v2838_v11 = vpop.eup %2837 }
 0x3b6   :  { %v2840_v34 = vpop.eup %2839  ;;  %v940_v23 = vmul.f32 %v2838_v11, %v938_v60  ;;  %vm945_vm0 = vweird.f32 %v2838_v11  ;;  %v1329_v60 = vld [vmem:[#allocation12 + $0x30] sm:$0xff] }
 0x3b7   :  { %v960_v39 = vmul.f32 %v2840_v34, %v958_v5  ;;  %vm946_vm2 = vmor %vm944_vm1, %vm945_vm0  ;;  %vm965_vm4 = vweird.f32 %v2840_v34 }
 0x3b8   :  { %v941_v33 = vsub.f32 1.0, %v940_v23  ;;  %vm966_vm6 = vmor %vm964_vm5, %vm965_vm4  ;;  %v1323_v23 = vld [vmem:[#allocation12] sm:$0xff] }
 0x3b9   :  { %v961_v20 = vsub.f32 1.0, %v960_v39 }
 0x3ba   :  { %v942_v0 = vmul.f32 %v2838_v11, %v941_v33 }
 0x3bb   :  { %v962_v61 = vmul.f32 %v2840_v34, %v961_v20 }
 0x3bc   :  { %v943_v57 = vadd.f32 %v2838_v11, %v942_v0 }
 0x3bd   :  { %v963_v58 = vadd.f32 %v2840_v34, %v962_v61 }
 0x3be   :  { %v947_v55 = vsel %vm946_vm2, %v2838_v11, %v943_v57  ;;  %v1326_v11 = vld [vmem:[#allocation12 + $0x18] sm:$0xff] }
 0x3bf   :  { %v952_v45 = vsel %vm949_vm3, %v951_v18, %v947_v55  ;;  %v967_v52 = vsel %vm966_vm6, %v2840_v34, %v963_v58 }
 0x3c0   :  { %v974_v21 = vmul.f32 %v952_v45, %v932_v56  ;;  %v972_v15 = vsel %vm969_vm7, %v971_v9, %v967_v52  ;;  %v5196_v9 = vld [vmem:[#allocation53_spill] sm:$0xff] }
 0x3c1   :  { %v977_v26 = vsub.f32 1.0, %v972_v15  ;;  %v979_v31 = vmul.f32 %v972_v15, %v4094_v25 }
 0x3c2   :  { %v975_v37 = vadd.f32 %v974_v21, %v5193_v3 }
 0x3c4   :  { %2841 = vtanh.f32 %v975_v37 }
 0x3ca   :  { %v2842_v28 = vpop.eup %2841 }
 0x3cb   :  { %v978_v29 = vmul.f32 %v2842_v28, %v977_v26 }
 0x3cd   :  { %v4155_v12 = vadd.f32 %v979_v31, %v978_v29 }
 0x3cf   :  { %1001 = vmatmul.f32.vlgmr.msrb.gmra.mxu1 %v4155_v12  ;;  %1021 = vmatmul.f32.vlgmr.msrb.gmra.mxu2 %v4155_v12 }
 0x3d0   :  { %1041 = vmatmul.f32.vlgmr.msrb.gmra.mxu3 %v4155_v12  ;;  %1247 = vmatpush.msrb.mxu1 %v3882_v10  ;;  %v1368_v10 = vld [vmem:[#allocation12 + $0x168] sm:$0xff] }
 0x3d1   :  { %1379 = vmatpush.msrb.mxu2 %v1368_v10 }
 0x3d2   :  { %1248 = vmatpush.msrb.mxu1 %v3889_v6  ;;  %v1365_v6 = vld [vmem:[#allocation12 + $0x150] sm:$0xff] }
 0x3d3   :  { %1380 = vmatpush.msrb.mxu2 %v1365_v6 }
 0x3d4   :  { %1249 = vmatpush.msrb.mxu1 %v3896_v16  ;;  %v1362_v16 = vld [vmem:[#allocation12 + $0x138] sm:$0xff] }
 0x3d5   :  { %1381 = vmatpush.msrb.mxu2 %v1362_v16 }
 0x3d6   :  { %1250 = vmatpush.msrb.mxu1 %v3903_v42  ;;  %v1359_v42 = vld [vmem:[#allocation12 + $0x120] sm:$0xff] }
 0x3d7   :  { %1382 = vmatpush.msrb.mxu2 %v1359_v42 }
 0x3d8   :  { %1251 = vmatpush.msrb.mxu1 %v3910_v46 }
 0x3da   :  { %1252 = vmatpush.msrb.mxu1 %v3917_v50  ;;  %v5194_v50 = vld [vmem:[#allocation36_spill] sm:$0xff] }
 0x3dc   :  { %1253 = vmatpush.msrb.mxu1 %v3924_v54  ;;  %v257_v54 = vadd.f32 %v5194_v50, %v5188_v4  ;;  %v5198_v50 = vld [vmem:[#allocation25_spill] sm:$0xff] }
 0x3de   :  { %1254 = vmatpush.msrb.mxu1 %v3931_v59 }
 0x3e0   :  { %1255 = vmatpush.msrb.mxu1 %v3938_v62  ;;  %v1356_v62 = vld [vmem:[#allocation12 + $0x108] sm:$0xff] }
 0x3e1   :  { %1383 = vmatpush.msrb.mxu2 %v1356_v62  ;;  %v4201_v62 = vld [vmem:[#allocation13 + $0x138] sm:$0xff] }
 0x3e2   :  { %1256 = vmatpush.msrb.mxu1 %v4038_v8 }
 0x3e4   :  { %1257 = vmatpush.msrb.mxu1 %v4045_v7  ;;  %v1353_v7 = vld [vmem:[#allocation12 + $0xf0] sm:$0xff] }
 0x3e5   :  { %1384 = vmatpush.msrb.mxu2 %v1353_v7  ;;  %v1369_v7 = vld [vmem:[#allocation12 + $0x170] sm:$0xff] }
 0x3e6   :  { %1258 = vmatpush.msrb.mxu1 %v4052_v13  ;;  %1420 = vmatpush.msrb.mxu3 %v1369_v7  ;;  %v4244_v7 = vld [vmem:[#allocation13] sm:$0xff] }
 0x3e7   :  { %5201 = vst [vmem:[#allocation46_spill] sm:$0xff] %v4244_v7 }
 0x3e8   :  { %1259 = vmatpush.msrb.mxu1 %v4059_v41  ;;  %v1350_v41 = vld [vmem:[#allocation12 + $0xd8] sm:$0xff] }
 0x3e9   :  { %1385 = vmatpush.msrb.mxu2 %v1350_v41  ;;  %v4207_v41 = vld [vmem:[#allocation13 + $0x108] sm:$0xff] }
 0x3ea   :  { %1260 = vmatpush.msrb.mxu1 %v4066_v35 }
 0x3ec   :  { %1261 = vmatpush.msrb.mxu1 %v5182_v1 }
 0x3ee   :  { %1262 = vmatpush.msrb.mxu1 %v5185_v24  ;;  %v1347_v24 = vld [vmem:[#allocation12 + $0xc0] sm:$0xff] }
 0x3ef   :  { %1386 = vmatpush.msrb.mxu2 %v1347_v24  ;;  %v4210_v24 = vld [vmem:[#allocation13 + $0xf0] sm:$0xff] }
 0x3f1   :  { %1387 = vmatpush.msrb.mxu2 %v1344_v38  ;;  %v4213_v38 = vld [vmem:[#allocation13 + $0xd8] sm:$0xff] }
 0x3f3   :  { %1388 = vmatpush.msrb.mxu2 %v1341_v2 }
 0x3f5   :  { %1389 = vmatpush.msrb.mxu2 %v1338_v63 }
 0x3f7   :  { %1390 = vmatpush.msrb.mxu2 %v1335_v36 }
 0x3f9   :  { %1391 = vmatpush.msrb.mxu2 %v1332_v51  ;;  %v1360_v51 = vld [vmem:[#allocation12 + $0x128] sm:$0xff] }
 0x3fb   :  { %1392 = vmatpush.msrb.mxu2 %v1329_v60  ;;  %v1361_v60 = vld [vmem:[#allocation12 + $0x130] sm:$0xff] }
 0x3fd   :  { %1393 = vmatpush.msrb.mxu2 %v1326_v11 }
 0x3ff   :  { %1394 = vmatpush.msrb.mxu2 %v1323_v23 }
 0x44c   :  { %v1002_v46 = vpop.f32.mrf.mxu1 }
 0x44d   :  { %v1003_v59 = vadd.f32 %v1002_v46, %v5190_v44  ;;  %v5197_v46 = vld [vmem:[#allocation51_spill] sm:$0xff] }
 0x44f   :  { %v1045_v8 = vadd.f32 %v1003_v59, %v257_v54  ;;  %v4195_v54 = vld [vmem:[#allocation13 + $0x168] sm:$0xff]  ;;  %v4198_v59 = vld [vmem:[#allocation13 + $0x150] sm:$0xff] }
 0x451   :  { %v2732_v13 = vmul.f32 -1.442695, %v1045_v8  ;;  %v4204_v8 = vld [vmem:[#allocation13 + $0x120] sm:$0xff] }
 0x452   :  { %v1022_v35 = vpop.f32.mrf.mxu2 }
 0x453   :  { %2843 = vpow2.f32 %v2732_v13  ;;  %v1023_v1 = vadd.f32 %v1022_v35, %v5191_v53  ;;  %v1042_v61 = vpop.f32.mrf.mxu3  ;;  %v1370_v13 = vld [vmem:[#allocation12 + $0x178] sm:$0xff] }
 0x454   :  { %v1043_v45 = vadd.f32 %v1042_v61, %v3777_v14  ;;  %v1366_v35 = vld [vmem:[#allocation12 + $0x158] sm:$0xff]  ;;  %v4227_v61 = vld [vmem:[#allocation13 + $0x90] sm:$0xff] }
 0x455   :  { %v1065_v49 = vadd.f32 %v1023_v1, %v5195_v32  ;;  %v1367_v1 = vld [vmem:[#allocation12 + $0x160] sm:$0xff]  ;;  %1421 = vmatpush.msrb.mxu3 %v1366_v35  ;;  %v1334_v35 = vld [vmem:[#allocation12 + $0x58] sm:$0xff] }
 0x456   :  { %v1363_v32 = vld [vmem:[#allocation12 + $0x140] sm:$0xff] }
 0x457   :  { %v2733_v17 = vmul.f32 -1.442695, %v1065_v49  ;;  %v1364_v49 = vld [vmem:[#allocation12 + $0x148] sm:$0xff]  ;;  %1422 = vmatpush.msrb.mxu3 %v1363_v32  ;;  %v1331_v32 = vld [vmem:[#allocation12 + $0x40] sm:$0xff] }
 0x459   :  { %v2844_v43 = vpop.eup %2843  ;;  %2845 = vpow2.f32 %v2733_v17  ;;  %1423 = vmatpush.msrb.mxu3 %v1360_v51 }
 0x45a   :  { %v1049_v27 = vadd.f32 1.0, %v2844_v43  ;;  %v5199_v43 = vld [vmem:[#allocation38_spill] sm:$0xff] }
 0x45b   :  { %v260_v63 = vadd.f32 %v5199_v43, %v5188_v4 }
 0x45c   :  { %2847 = vrcp.f32 %v1049_v27  ;;  %v1061_v20 = vand.u32 2147483648, %v1049_v27  ;;  %v1059_v47 = vand.u32 2147483647, %v1049_v27  ;;  %vm1055_vm9 = vweird.f32 %v1049_v27 }
 0x45e   :  { %v1062_v56 = vor.u32 1.1754944e-38, %v1061_v20  ;;  %vm1060_vm11 = vcmp.eq.f32.partialorder %v1059_v47, 8.507059e+37  ;;  %v1354_v47 = vld [vmem:[#allocation12 + $0xf8] sm:$0xff] }
 0x45f   :  { %v2846_v5 = vpop.eup %2845 }
 0x460   :  { %v1069_v34 = vadd.f32 1.0, %v2846_v5  ;;  %v4220_v5 = vld [vmem:[#allocation13 + $0xc0] sm:$0xff] }
 0x462   :  { %v2848_v39 = vpop.eup %2847  ;;  %2849 = vrcp.f32 %v1069_v34  ;;  %v1081_v22 = vand.u32 2147483648, %v1069_v34  ;;  %v1079_v37 = vand.u32 2147483647, %v1069_v34  ;;  %vm1075_vm13 = vweird.f32 %v1069_v34 }
 0x463   :  { %v1051_v33 = vmul.f32 %v2848_v39, %v1049_v27  ;;  %vm1056_vm8 = vweird.f32 %v2848_v39 }
 0x464   :  { %vm1057_vm10 = vmor %vm1055_vm9, %vm1056_vm8  ;;  %v1082_v26 = vor.u32 1.1754944e-38, %v1081_v22  ;;  %vm1080_vm15 = vcmp.eq.f32.partialorder %v1079_v37, 8.507059e+37  ;;  %v4236_v22 = vld [vmem:[#allocation13 + $0x48] sm:$0xff]  ;;  %v1342_v37 = vld [vmem:[#allocation12 + $0x98] sm:$0xff] }
 0x465   :  { %v1052_v40 = vsub.f32 1.0, %v1051_v33  ;;  %v1358_v33 = vld [vmem:[#allocation12 + $0x118] sm:$0xff] }
 0x467   :  { %v1053_v0 = vmul.f32 %v2848_v39, %v1052_v40  ;;  %v4224_v40 = vld [vmem:[#allocation13 + $0xa8] sm:$0xff] }
 0x468   :  { %v2850_v30 = vpop.eup %2849 }
 0x469   :  { %v1071_v57 = vmul.f32 %v2850_v30, %v1069_v34  ;;  %v1054_v18 = vadd.f32 %v2848_v39, %v1053_v0  ;;  %vm1076_vm12 = vweird.f32 %v2850_v30  ;;  %v5200_v34 = vld [vmem:[#allocation54_spill] sm:$0xff] }
 0x46a   :  { %vm1077_vm14 = vmor %vm1075_vm13, %vm1076_vm12 }
 0x46b   :  { %v1072_v55 = vsub.f32 1.0, %v1071_v57  ;;  %v1058_v58 = vsel %vm1057_vm10, %v2848_v39, %v1054_v18  ;;  %v1357_v39 = vld [vmem:[#allocation12 + $0x110] sm:$0xff]  ;;  %v1351_v57 = vld [vmem:[#allocation12 + $0xe0] sm:$0xff]  ;;  %v1352_v18 = vld [vmem:[#allocation12 + $0xe8] sm:$0xff] }
 0x46c   :  { %v1063_v21 = vsel %vm1060_vm11, %v1062_v56, %v1058_v58  ;;  %1424 = vmatpush.msrb.mxu3 %v1357_v39  ;;  %v4230_v56 = vld [vmem:[#allocation13 + $0x78] sm:$0xff]  ;;  %v4233_v58 = vld [vmem:[#allocation13 + $0x60] sm:$0xff] }
 0x46d   :  { %v1073_v19 = vmul.f32 %v2850_v30, %v1072_v55  ;;  %v1085_v3 = vmul.f32 %v1063_v21, %v1043_v45  ;;  %v1348_v55 = vld [vmem:[#allocation12 + $0xc8] sm:$0xff]  ;;  %v1349_v45 = vld [vmem:[#allocation12 + $0xd0] sm:$0xff] }
 0x46e   :  { %1425 = vmatpush.msrb.mxu3 %v1354_v47  ;;  %v1345_v21 = vld [vmem:[#allocation12 + $0xb0] sm:$0xff] }
 0x46f   :  { %v1074_v52 = vadd.f32 %v2850_v30, %v1073_v19  ;;  %v1086_v15 = vadd.f32 %v1085_v3, %v5196_v9  ;;  %v1346_v19 = vld [vmem:[#allocation12 + $0xb8] sm:$0xff]  ;;  %v4239_v9 = vld [vmem:[#allocation13 + $0x30] sm:$0xff] }
 0x470   :  { %1426 = vmatpush.msrb.mxu3 %v1351_v57 }
 0x471   :  { %v1078_v28 = vsel %vm1077_vm14, %v2850_v30, %v1074_v52  ;;  %2851 = vtanh.f32 %v1086_v15  ;;  %v1355_v30 = vld [vmem:[#allocation12 + $0x100] sm:$0xff] }
 0x472   :  { %v1083_v29 = vsel %vm1080_vm15, %v1082_v26, %v1078_v28  ;;  %1427 = vmatpush.msrb.mxu3 %v1348_v55  ;;  %v1343_v52 = vld [vmem:[#allocation12 + $0xa0] sm:$0xff] }
 0x473   :  { %v1088_v31 = vsub.f32 1.0, %v1083_v29  ;;  %v1090_v16 = vmul.f32 %v1083_v29, %v4155_v12  ;;  %v1339_v28 = vld [vmem:[#allocation12 + $0x80] sm:$0xff]  ;;  %v1340_v29 = vld [vmem:[#allocation12 + $0x88] sm:$0xff] }
 0x474   :  { %1428 = vmatpush.msrb.mxu3 %v1345_v21 }
 0x476   :  { %1429 = vmatpush.msrb.mxu3 %v1342_v37 }
 0x477   :  { %v2852_v10 = vpop.eup %2851 }
 0x478   :  { %v1089_v6 = vmul.f32 %v2852_v10, %v1088_v31  ;;  %v4241_v31 = vld [vmem:[#allocation13 + $0x18] sm:$0xff]  ;;  %1430 = vmatpush.msrb.mxu3 %v1339_v28 }
 0x47a   :  { %v4184_v42 = vadd.f32 %v1090_v16, %v1089_v6  ;;  %v1336_v6 = vld [vmem:[#allocation12 + $0x68] sm:$0xff]  ;;  %v1337_v16 = vld [vmem:[#allocation12 + $0x70] sm:$0xff] }
 0x47b   :  { %1431 = vmatpush.msrb.mxu3 %v1336_v6 }
 0x47c   :  { %1112 = vmatmul.f32.vlgmr.msra.gmra.mxu0 %v4184_v42  ;;  %1132 = vmatmul.f32.vlgmr.msra.gmra.mxu1 %v4184_v42 }
 0x47d   :  { %1152 = vmatmul.f32.vlgmr.msra.gmra.mxu2 %v4184_v42  ;;  %1585 = vmatpush.msra.mxu1 %v4195_v54 }
 0x47e   :  { %1461 = vmatpush.msra.mxu0 %v1370_v13  ;;  %v1333_v13 = vld [vmem:[#allocation12 + $0x50] sm:$0xff] }
 0x47f   :  { %1586 = vmatpush.msra.mxu1 %v4198_v59  ;;  %1432 = vmatpush.msrb.mxu3 %v1333_v13 }
 0x480   :  { %1462 = vmatpush.msra.mxu0 %v1367_v1  ;;  %v1330_v1 = vld [vmem:[#allocation12 + $0x38] sm:$0xff] }
 0x481   :  { %1587 = vmatpush.msra.mxu1 %v4201_v62  ;;  %1433 = vmatpush.msrb.mxu3 %v1330_v1  ;;  %v4263_v1 = vld [vmem:[#allocation13 + $0x140] sm:$0xff] }
 0x482   :  { %1463 = vmatpush.msra.mxu0 %v1364_v49 }
 0x483   :  { %1588 = vmatpush.msra.mxu1 %v4204_v8 }
 0x484   :  { %1464 = vmatpush.msra.mxu0 %v1361_v60  ;;  %v1325_v60 = vld [vmem:[#allocation12 + $0x10] sm:$0xff] }
 0x485   :  { %1395 = vmatmul.f32.vlgmr.msrb.gmra.mxu2 %v5197_v46  ;;  %1589 = vmatpush.msra.mxu1 %v4207_v41 }
 0x486   :  { %1465 = vmatpush.msra.mxu0 %v1358_v33 }
 0x487   :  { %1590 = vmatpush.msra.mxu1 %v4210_v24 }
 0x488   :  { %1466 = vmatpush.msra.mxu0 %v1355_v30 }
 0x489   :  { %1591 = vmatpush.msra.mxu1 %v4213_v38 }
 0x48a   :  { %1467 = vmatpush.msra.mxu0 %v1352_v18 }
 0x48b   :  { %1592 = vmatpush.msra.mxu1 %v4220_v5 }
 0x48c   :  { %1468 = vmatpush.msra.mxu0 %v1349_v45 }
 0x48d   :  { %1398 = vmatmul.f32.gmra.mxu2 %v5198_v50  ;;  %1593 = vmatpush.msra.mxu1 %v4224_v40 }
 0x48e   :  { %1469 = vmatpush.msra.mxu0 %v1346_v19 }
 0x48f   :  { %1594 = vmatpush.msra.mxu1 %v4227_v61 }
 0x490   :  { %1470 = vmatpush.msra.mxu0 %v1343_v52 }
 0x491   :  { %1595 = vmatpush.msra.mxu1 %v4230_v56 }
 0x492   :  { %1471 = vmatpush.msra.mxu0 %v1340_v29 }
 0x493   :  { %1596 = vmatpush.msra.mxu1 %v4233_v58 }
 0x494   :  { %1472 = vmatpush.msra.mxu0 %v1337_v16 }
 0x495   :  { %1401 = vmatmul.f32.gmra.mxu2 %v3988_v48  ;;  %1597 = vmatpush.msra.mxu1 %v4236_v22 }
 0x496   :  { %1473 = vmatpush.msra.mxu0 %v1334_v35  ;;  %v4253_v35 = vld [vmem:[#allocation13 + $0x170] sm:$0xff] }
 0x497   :  { %1598 = vmatpush.msra.mxu1 %v4239_v9 }
 0x498   :  { %1474 = vmatpush.msra.mxu0 %v1331_v32  ;;  %v4268_v32 = vld [vmem:[#allocation13 + $0x128] sm:$0xff] }
 0x499   :  { %1599 = vmatpush.msra.mxu1 %v4241_v31 }
 0x49b   :  { %1600 = vmatpush.msra.mxu1 %v4244_v7 }
 0x49d   :  { %1404 = vmatmul.f32.gmra.mxu2 %v4094_v25 }
 0x4a5   :  { %1407 = vmatmul.f32.gmra.mxu2 %v4155_v12 }
 0x4ad   :  { %1410 = vmatmul.f32.gmra.mxu2 %v4184_v42 }
 0x4f9   :  { %v1113_v17 = vpop.f32.mrf.mxu0  ;;  %v1133_v2 = vpop.f32.mrf.mxu1 }
 0x4fa   :  { %v1114_v27 = vadd.f32 %v1113_v17, %v5190_v44  ;;  %v1134_v36 = vadd.f32 %v1133_v2, %v5191_v53  ;;  %v1327_v17 = vld [vmem:[#allocation12 + $0x20] sm:$0xff]  ;;  %v1328_v2 = vld [vmem:[#allocation12 + $0x28] sm:$0xff] }
 0x4fb   :  { %1434 = vmatpush.msrb.mxu3 %v1327_v17  ;;  %1475 = vmatpush.msra.mxu0 %v1328_v2  ;;  %v5203_v17 = vmov 0.0   ;;  %v4280_v2 = vld [vmem:[#allocation13 + $0xf8] sm:$0xff] }
 0x4fc   :  { %v1156_v11 = vadd.f32 %v1114_v27, %v260_v63  ;;  %v1176_v23 = vadd.f32 %v1134_v36, %v5200_v34  ;;  %v1324_v36 = vld [vmem:[#allocation12 + $0x8] sm:$0xff] }
 0x4fd   :  { %1435 = vmatpush.msrb.mxu3 %v1324_v36  ;;  %1476 = vmatpush.msra.mxu0 %v1325_v60  ;;  %v4305_v36 = vld [vmem:[#allocation13 + $0x80] sm:$0xff]  ;;  %v4321_v60 = vld [vmem:[#allocation13 + $0x38] sm:$0xff] }
 0x4fe   :  { %v2734_v20 = vmul.f32 -1.442695, %v1156_v11  ;;  %v2735_v0 = vmul.f32 -1.442695, %v1176_v23 }
 0x500   :  { %2853 = vpow2.f32 %v2734_v20  ;;  %v1153_v20 = vpop.f32.mrf.mxu2 }
 0x501   :  { %2855 = vpow2.f32 %v2735_v0  ;;  %v1154_v30 = vadd.f32 %v1153_v20, %v3777_v14 }
 0x506   :  { %v2854_v3 = vpop.eup %2853 }
 0x507   :  { %v2856_v15 = vpop.eup %2855  ;;  %v1160_v26 = vadd.f32 1.0, %v2854_v3  ;;  %v5202_v3 = vld [vmem:[#allocation55_spill] sm:$0xff] }
 0x508   :  { %v1180_v10 = vadd.f32 1.0, %v2856_v15 }
 0x509   :  { %2857 = vrcp.f32 %v1160_v26  ;;  %v1172_v34 = vand.u32 2147483648, %v1160_v26  ;;  %v1170_v39 = vand.u32 2147483647, %v1160_v26  ;;  %vm1166_vm1 = vweird.f32 %v1160_v26 }
 0x50a   :  { %2859 = vrcp.f32 %v1180_v10  ;;  %v1192_v45 = vand.u32 2147483648, %v1180_v10  ;;  %vm1186_vm5 = vweird.f32 %v1180_v10  ;;  %v1190_v19 = vand.u32 2147483647, %v1180_v10 }
 0x50b   :  { %v1173_v47 = vor.u32 1.1754944e-38, %v1172_v34  ;;  %vm1171_vm3 = vcmp.eq.f32.partialorder %v1170_v39, 8.507059e+37  ;;  %v4328_v34 = vld [vmem:[#allocation13 + $0x20] sm:$0xff] }
 0x50c   :  { %v1193_v15 = vor.u32 1.1754944e-38, %v1192_v45  ;;  %vm1191_vm7 = vcmp.eq.f32.partialorder %v1190_v19, 8.507059e+37  ;;  %5204 = vst [vmem:[#allocation47_spill] sm:$0xff] %v4328_v34 }
 0x50f   :  { %v2858_v49 = vpop.eup %2857 }
 0x510   :  { %v2860_v43 = vpop.eup %2859  ;;  %v1162_v63 = vmul.f32 %v2858_v49, %v1160_v26  ;;  %vm1167_vm0 = vweird.f32 %v2858_v49 }
 0x511   :  { %v1182_v27 = vmul.f32 %v2860_v43, %v1180_v10  ;;  %vm1168_vm2 = vmor %vm1166_vm1, %vm1167_vm0  ;;  %vm1187_vm4 = vweird.f32 %v2860_v43  ;;  %v4259_v10 = vld [vmem:[#allocation13 + $0x158] sm:$0xff] }
 0x512   :  { %v1163_v51 = vsub.f32 1.0, %v1162_v63  ;;  %vm1188_vm6 = vmor %vm1186_vm5, %vm1187_vm4  ;;  %v4289_v63 = vld [vmem:[#allocation13 + $0xc8] sm:$0xff] }
 0x513   :  { %v1183_v11 = vsub.f32 1.0, %v1182_v27  ;;  %v4300_v27 = vld [vmem:[#allocation13 + $0x98] sm:$0xff] }
 0x514   :  { %v1164_v23 = vmul.f32 %v2858_v49, %v1163_v51  ;;  %v4310_v51 = vld [vmem:[#allocation13 + $0x68] sm:$0xff] }
 0x515   :  { %v1184_v33 = vmul.f32 %v2860_v43, %v1183_v11  ;;  %v4323_v11 = vld [vmem:[#allocation13 + $0x178] sm:$0xff] }
 0x516   :  { %v1165_v0 = vadd.f32 %v2858_v49, %v1164_v23  ;;  %1625 = vmatpush.msra.mxu2 %v4323_v11  ;;  %v4333_v23 = vld [vmem:[#allocation13 + $0x8] sm:$0xff] }
 0x517   :  { %v1185_v55 = vadd.f32 %v2860_v43, %v1184_v33  ;;  %5205 = vst [vmem:[#allocation39_spill] sm:$0xff] %v4333_v23 }
 0x518   :  { %v1169_v57 = vsel %vm1168_vm2, %v2858_v49, %v1165_v0  ;;  %v4273_v49 = vld [vmem:[#allocation13 + $0x110] sm:$0xff]  ;;  %v4382_v0 = vld [vmem:[#allocation13 + $0x148] sm:$0xff] }
 0x519   :  { %v1174_v18 = vsel %vm1171_vm3, %v1173_v47, %v1169_v57  ;;  %v1189_v52 = vsel %vm1188_vm6, %v2860_v43, %v1185_v55  ;;  %v4284_v43 = vld [vmem:[#allocation13 + $0xe0] sm:$0xff]  ;;  %v4384_v47 = vld [vmem:[#allocation13 + $0x130] sm:$0xff]  ;;  %v4388_v57 = vld [vmem:[#allocation13 + $0x118] sm:$0xff] }
 0x51a   :  { %v1196_v21 = vmul.f32 %v1174_v18, %v1154_v30  ;;  %v1194_v26 = vsel %vm1191_vm7, %v1193_v15, %v1189_v52  ;;  %v4411_v52 = vld [vmem:[#allocation13 + $0xb8] sm:$0xff] }
 0x51b   :  { %v1199_v28 = vsub.f32 1.0, %v1194_v26  ;;  %v1201_v16 = vmul.f32 %v1194_v26, %v4184_v42 }
 0x51c   :  { %v1197_v37 = vadd.f32 %v1196_v21, %v5202_v3  ;;  %v4396_v21 = vld [vmem:[#allocation13 + $0x100] sm:$0xff]  ;;  %v4401_v3 = vld [vmem:[#allocation13 + $0xe8] sm:$0xff] }
 0x51e   :  { %2861 = vtanh.f32 %v1197_v37  ;;  %v4406_v37 = vld [vmem:[#allocation13 + $0xd0] sm:$0xff] }
 0x524   :  { %v2862_v29 = vpop.eup %2861 }
 0x525   :  { %v1200_v6 = vmul.f32 %v2862_v29, %v1199_v28  ;;  %v4423_v28 = vld [vmem:[#allocation13 + $0xa0] sm:$0xff] }
 0x527   :  { %v4251_v13 = vadd.f32 %v1201_v16, %v1200_v6  ;;  %v4427_v6 = vld [vmem:[#allocation13 + $0x88] sm:$0xff] }
 0x529   :  { %1223 = vmatmul.f32.vlgmr.msra.gmra.mxu3 %v4251_v13  ;;  %1243 = vmatmul.f32.vlgmr.msrb.gmra.mxu0 %v4251_v13 }
 0x52a   :  { %1263 = vmatmul.f32.vlgmr.msrb.gmra.mxu1 %v4251_v13  ;;  %1413 = vmatmul.f32.gmra.mxu2 %v4251_v13 }
 0x52b   :  { %1605 = vmatpush.msrb.mxu1 %v4253_v35  ;;  %1696 = vmatpush.msra.mxu3 %v4195_v54 }
 0x52c   :  { %1716 = vmatpush.msrb.mxu0 %v4253_v35 }
 0x52d   :  { %1606 = vmatpush.msrb.mxu1 %v4259_v10  ;;  %1697 = vmatpush.msra.mxu3 %v4198_v59 }
 0x52e   :  { %1717 = vmatpush.msrb.mxu0 %v4259_v10 }
 0x52f   :  { %1607 = vmatpush.msrb.mxu1 %v4263_v1  ;;  %1698 = vmatpush.msra.mxu3 %v4201_v62 }
 0x530   :  { %1718 = vmatpush.msrb.mxu0 %v4263_v1 }
 0x531   :  { %1608 = vmatpush.msrb.mxu1 %v4268_v32  ;;  %1436 = vmatmul.f32.vlgmr.msrb.gmra.mxu3 %v5197_v46 }
 0x532   :  { %1477 = vmatmul.f32.vlgmr.msra.gmra.mxu0 %v5197_v46  ;;  %1601 = vmatmul.f32.vlgmr.msra.gmra.mxu1 %v5203_v17  ;;  %v4294_v46 = vld [vmem:[#allocation13 + $0xb0] sm:$0xff] }
 0x533   :  { %1609 = vmatpush.msrb.mxu1 %v4273_v49  ;;  %1699 = vmatpush.msra.mxu3 %v4204_v8 }
 0x534   :  { %1719 = vmatpush.msrb.mxu0 %v4268_v32 }
 0x535   :  { %1610 = vmatpush.msrb.mxu1 %v4280_v2  ;;  %1700 = vmatpush.msra.mxu3 %v4207_v41 }
 0x536   :  { %1720 = vmatpush.msrb.mxu0 %v4273_v49 }
 0x537   :  { %1611 = vmatpush.msrb.mxu1 %v4284_v43  ;;  %1701 = vmatpush.msra.mxu3 %v4210_v24 }
 0x538   :  { %1721 = vmatpush.msrb.mxu0 %v4280_v2 }
 0x539   :  { %1612 = vmatpush.msrb.mxu1 %v4289_v63  ;;  %1439 = vmatmul.f32.gmra.mxu3 %v5198_v50 }
 0x53a   :  { %1480 = vmatmul.f32.gmra.mxu0 %v5198_v50  ;;  %1702 = vmatpush.msra.mxu3 %v4213_v38  ;;  %v4315_v50 = vld [vmem:[#allocation13 + $0x50] sm:$0xff] }
 0x53b   :  { %1613 = vmatpush.msrb.mxu1 %v4294_v46  ;;  %1722 = vmatpush.msrb.mxu0 %v4284_v43 }
 0x53c   :  { %1703 = vmatpush.msra.mxu3 %v4220_v5 }
 0x53d   :  { %1614 = vmatpush.msrb.mxu1 %v4300_v27  ;;  %1723 = vmatpush.msrb.mxu0 %v4289_v63 }
 0x53e   :  { %1704 = vmatpush.msra.mxu3 %v4224_v40 }
 0x53f   :  { %1615 = vmatpush.msrb.mxu1 %v4305_v36  ;;  %1724 = vmatpush.msrb.mxu0 %v4294_v46 }
 0x540   :  { %1705 = vmatpush.msra.mxu3 %v4227_v61 }
 0x541   :  { %1616 = vmatpush.msrb.mxu1 %v4310_v51  ;;  %1442 = vmatmul.f32.gmra.mxu3 %v3988_v48 }
 0x542   :  { %1483 = vmatmul.f32.gmra.mxu0 %v3988_v48  ;;  %1706 = vmatpush.msra.mxu3 %v4230_v56  ;;  %v4374_v48 = vld [vmem:[#allocation13 + $0x160] sm:$0xff] }
 0x543   :  { %1617 = vmatpush.msrb.mxu1 %v4315_v50  ;;  %1725 = vmatpush.msrb.mxu0 %v4300_v27 }
 0x544   :  { %1707 = vmatpush.msra.mxu3 %v4233_v58  ;;  %1626 = vmatpush.msra.mxu2 %v4374_v48 }
 0x545   :  { %1618 = vmatpush.msrb.mxu1 %v4321_v60  ;;  %1726 = vmatpush.msrb.mxu0 %v4305_v36 }
 0x546   :  { %1708 = vmatpush.msra.mxu3 %v4236_v22  ;;  %1627 = vmatpush.msra.mxu2 %v4382_v0 }
 0x547   :  { %1619 = vmatpush.msrb.mxu1 %v4328_v34  ;;  %1727 = vmatpush.msrb.mxu0 %v4310_v51 }
 0x548   :  { %1709 = vmatpush.msra.mxu3 %v4239_v9  ;;  %1628 = vmatpush.msra.mxu2 %v4384_v47 }
 0x549   :  { %1620 = vmatpush.msrb.mxu1 %v4333_v23  ;;  %1445 = vmatmul.f32.gmra.mxu3 %v4094_v25 }
 0x54a   :  { %1621 = vmatmul.f32.vlgmr.msrb.gmra.mxu1 %v5203_v17  ;;  %1486 = vmatmul.f32.gmra.mxu0 %v4094_v25 }
 0x54b   :  { %1736 = vmatpush.msra.mxu1 %v4323_v11  ;;  %1710 = vmatpush.msra.mxu3 %v4241_v31 }
 0x54c   :  { %1728 = vmatpush.msrb.mxu0 %v4315_v50  ;;  %1629 = vmatpush.msra.mxu2 %v4388_v57 }
 0x54d   :  { %1711 = vmatpush.msra.mxu3 %v4244_v7  ;;  %1737 = vmatpush.msra.mxu1 %v4374_v48 }
 0x54e   :  { %1729 = vmatpush.msrb.mxu0 %v4321_v60  ;;  %1630 = vmatpush.msra.mxu2 %v4396_v21 }
 0x54f   :  { %1827 = vmatpush.msrb.mxu3 %v4253_v35  ;;  %1738 = vmatpush.msra.mxu1 %v4382_v0 }
 0x550   :  { %1730 = vmatpush.msrb.mxu0 %v4328_v34  ;;  %1631 = vmatpush.msra.mxu2 %v4401_v3 }
 0x551   :  { %1828 = vmatpush.msrb.mxu3 %v4259_v10  ;;  %1739 = vmatpush.msra.mxu1 %v4384_v47 }
 0x552   :  { %1448 = vmatmul.f32.gmra.mxu3 %v4155_v12  ;;  %1489 = vmatmul.f32.gmra.mxu0 %v4155_v12  ;;  %v5206_v12 = vld [vmem:[#allocation41_spill] sm:$0xff] }
 0x553   :  { %1829 = vmatpush.msrb.mxu3 %v4263_v1  ;;  %1731 = vmatpush.msrb.mxu0 %v4333_v23 }
 0x554   :  { %1740 = vmatpush.msra.mxu1 %v4388_v57  ;;  %1632 = vmatpush.msra.mxu2 %v4406_v37 }
 0x555   :  { %1847 = vmatpush.msra.mxu0 %v4323_v11  ;;  %1830 = vmatpush.msrb.mxu3 %v4268_v32 }
 0x556   :  { %1741 = vmatpush.msra.mxu1 %v4396_v21  ;;  %1633 = vmatpush.msra.mxu2 %v4411_v52 }
 0x557   :  { %1831 = vmatpush.msrb.mxu3 %v4273_v49  ;;  %1848 = vmatpush.msra.mxu0 %v4374_v48 }
 0x558   :  { %1742 = vmatpush.msra.mxu1 %v4401_v3  ;;  %1634 = vmatpush.msra.mxu2 %v4423_v28 }
 0x559   :  { %1832 = vmatpush.msrb.mxu3 %v4280_v2  ;;  %1849 = vmatpush.msra.mxu0 %v4382_v0 }
 0x55a   :  { %1451 = vmatmul.f32.gmra.mxu3 %v4184_v42  ;;  %1492 = vmatmul.f32.gmra.mxu0 %v4184_v42  ;;  %v5207_v42 = vld [vmem:[#allocation29_spill] sm:$0xff] }
 0x55b   :  { %1833 = vmatpush.msrb.mxu3 %v4284_v43  ;;  %v304_v39 = vadd.f32 %v5207_v42, %v5206_v12  ;;  %1850 = vmatpush.msra.mxu0 %v4384_v47  ;;  %v4439_v12 = vld [vmem:[#allocation13 + $0x58] sm:$0xff] }
 0x55c   :  { %1743 = vmatpush.msra.mxu1 %v4406_v37  ;;  %1635 = vmatpush.msra.mxu2 %v4427_v6  ;;  %5209 = vst [vmem:[#allocation48_spill] sm:$0xff] %v4439_v12 }
 0x55d   :  { %1834 = vmatpush.msrb.mxu3 %v4289_v63  ;;  %1851 = vmatpush.msra.mxu0 %v4388_v57 }
 0x55e   :  { %1744 = vmatpush.msra.mxu1 %v4411_v52 }
 0x55f   :  { %1835 = vmatpush.msrb.mxu3 %v4294_v46  ;;  %1852 = vmatpush.msra.mxu0 %v4396_v21 }
 0x560   :  { %1745 = vmatpush.msra.mxu1 %v4423_v28 }
 0x561   :  { %1836 = vmatpush.msrb.mxu3 %v4300_v27  ;;  %1853 = vmatpush.msra.mxu0 %v4401_v3 }
 0x562   :  { %1454 = vmatmul.f32.gmra.mxu3 %v4251_v13  ;;  %1495 = vmatmul.f32.gmra.mxu0 %v4251_v13 }
 0x563   :  { %1837 = vmatpush.msrb.mxu3 %v4305_v36  ;;  %1854 = vmatpush.msra.mxu0 %v4406_v37 }
 0x564   :  { %1746 = vmatpush.msra.mxu1 %v4427_v6 }
 0x565   :  { %1838 = vmatpush.msrb.mxu3 %v4310_v51  ;;  %1855 = vmatpush.msra.mxu0 %v4411_v52 }
 0x567   :  { %1839 = vmatpush.msrb.mxu3 %v4315_v50  ;;  %1856 = vmatpush.msra.mxu0 %v4423_v28 }
 0x569   :  { %1840 = vmatpush.msrb.mxu3 %v4321_v60  ;;  %1857 = vmatpush.msra.mxu0 %v4427_v6 }
 0x56b   :  { %1841 = vmatpush.msrb.mxu3 %v4328_v34 }
 0x56d   :  { %1842 = vmatpush.msrb.mxu3 %v4333_v23 }
 0x5a6   :  { %v1244_v25 = vpop.f32.mrf.mxu0 }
 0x5a7   :  { %v1245_v33 = vadd.f32 %v1244_v25, %v5191_v53  ;;  %v5208_v53 = vld [vmem:[#allocation40_spill] sm:$0xff]  ;;  %v4434_v25 = vld [vmem:[#allocation13 + $0x70] sm:$0xff] }
 0x5a8   :  { %v263_v55 = vadd.f32 %v5208_v53, %v5188_v4  ;;  %1636 = vmatpush.msra.mxu2 %v4434_v25  ;;  %1747 = vmatpush.msra.mxu1 %v4434_v25 }
 0x5a9   :  { %v1287_v20 = vadd.f32 %v1245_v33, %v304_v39  ;;  %1858 = vmatpush.msra.mxu0 %v4434_v25  ;;  %v4446_v39 = vld [vmem:[#allocation13 + $0x40] sm:$0xff] }
 0x5aa   :  { %1637 = vmatpush.msra.mxu2 %v4439_v12  ;;  %1748 = vmatpush.msra.mxu1 %v4439_v12  ;;  %5210 = vst [vmem:[#allocation30_spill] sm:$0xff] %v4446_v39 }
 0x5ab   :  { %v2737_v30 = vmul.f32 -1.442695, %v1287_v20  ;;  %1859 = vmatpush.msra.mxu0 %v4439_v12  ;;  %v4450_v20 = vld [vmem:[#allocation13 + $0x28] sm:$0xff] }
 0x5ac   :  { %v1224_v18 = vpop.f32.mrf.mxu3  ;;  %1638 = vmatpush.msra.mxu2 %v4446_v39  ;;  %5211 = vst [vmem:[#allocation31_spill] sm:$0xff] %v4450_v20  ;;  %1749 = vmatpush.msra.mxu1 %v4446_v39 }
 0x5ad   :  { %2863 = vpow2.f32 %v2737_v30  ;;  %v1225_v45 = vadd.f32 %v1224_v18, %v5190_v44  ;;  %v4453_v18 = vld [vmem:[#allocation13 + $0x10] sm:$0xff]  ;;  %1860 = vmatpush.msra.mxu0 %v4446_v39 }
 0x5ae   :  { %5212 = vst [vmem:[#allocation35_spill] sm:$0xff] %v4453_v18  ;;  %1639 = vmatpush.msra.mxu2 %v4450_v20  ;;  %1750 = vmatpush.msra.mxu1 %v4450_v20 }
 0x5af   :  { %v1267_v19 = vadd.f32 %v1225_v45, %v263_v55  ;;  %1861 = vmatpush.msra.mxu0 %v4450_v20 }
 0x5b0   :  { %1640 = vmatpush.msra.mxu2 %v4453_v18  ;;  %1751 = vmatpush.msra.mxu1 %v4453_v18 }
 0x5b1   :  { %v2736_v4 = vmul.f32 -1.442695, %v1267_v19  ;;  %1862 = vmatpush.msra.mxu0 %v4453_v18 }
 0x5b2   :  { %1807 = vmatpush.msrb.mxu2 %v4195_v54  ;;  %1918 = vmatpush.msrb.mxu1 %v4195_v54 }
 0x5b3   :  { %v2864_v44 = vpop.eup %2863  ;;  %2865 = vpow2.f32 %v2736_v4 }
 0x5b4   :  { %v4414_v15 = vadd.f32 1.0, %v2864_v44  ;;  %v1264_v44 = vpop.f32.mrf.mxu1  ;;  %1808 = vmatpush.msrb.mxu2 %v4198_v59  ;;  %1919 = vmatpush.msrb.mxu1 %v4198_v59 }
 0x5b6   :  { %2867 = vrcp.f32 %v4414_v15  ;;  %1809 = vmatpush.msrb.mxu2 %v4201_v62  ;;  %1920 = vmatpush.msrb.mxu1 %v4201_v62  ;;  %vm1297_vm13 = vweird.f32 %v4414_v15 }
 0x5b8   :  { %1810 = vmatpush.msrb.mxu2 %v4204_v8  ;;  %1921 = vmatpush.msrb.mxu1 %v4204_v8 }
 0x5b9   :  { %v2866_v26 = vpop.eup %2865 }
 0x5ba   :  { %v1271_v29 = vadd.f32 1.0, %v2866_v26  ;;  %1811 = vmatpush.msrb.mxu2 %v4207_v41  ;;  %1922 = vmatpush.msrb.mxu1 %v4207_v41 }
 0x5bc   :  { %2869 = vrcp.f32 %v1271_v29  ;;  %v4432_v16 = vpop.eup %2867  ;;  %v1283_v45 = vand.u32 2147483648, %v1271_v29  ;;  %v1281_v4 = vand.u32 2147483647, %v1271_v29  ;;  %vm1277_vm9 = vweird.f32 %v1271_v29  ;;  %1812 = vmatpush.msrb.mxu2 %v4210_v24  ;;  %1923 = vmatpush.msrb.mxu1 %v4210_v24 }
 0x5bd   :  { %v1293_v42 = vmul.f32 %v4432_v16, %v4414_v15  ;;  %vm1298_vm12 = vweird.f32 %v4432_v16 }
 0x5be   :  { %vm1282_vm11 = vcmp.eq.f32.partialorder %v1281_v4, 8.507059e+37  ;;  %vm1299_vm14 = vmor %vm1297_vm13, %vm1298_vm12  ;;  %1813 = vmatpush.msrb.mxu2 %v4213_v38  ;;  %1924 = vmatpush.msrb.mxu1 %v4213_v38 }
 0x5bf   :  { %v1294_v53 = vsub.f32 1.0, %v1293_v42 }
 0x5c0   :  { %1814 = vmatpush.msrb.mxu2 %v4220_v5  ;;  %1925 = vmatpush.msrb.mxu1 %v4220_v5 }
 0x5c1   :  { %v1295_v26 = vmul.f32 %v4432_v16, %v1294_v53  ;;  %v5214_v53 = vld [vmem:[#allocation27_spill] sm:$0xff] }
 0x5c2   :  { %v2870_v33 = vpop.eup %2869  ;;  %1815 = vmatpush.msrb.mxu2 %v4224_v40  ;;  %1926 = vmatpush.msrb.mxu1 %v4224_v40 }
 0x5c3   :  { %v1273_v30 = vmul.f32 %v2870_v33, %v1271_v29  ;;  %vm1278_vm8 = vweird.f32 %v2870_v33  ;;  %v1296_v39 = vadd.f32 %v4432_v16, %v1295_v26  ;;  %v5213_v29 = vld [vmem:[#allocation45_spill] sm:$0xff]  ;;  %v1574_v26 = vld [vmem:[#allocation15] sm:$0x7] }
 0x5c4   :  { %vm1279_vm10 = vmor %vm1277_vm9, %vm1278_vm8  ;;  %1816 = vmatpush.msrb.mxu2 %v4227_v61  ;;  %1927 = vmatpush.msrb.mxu1 %v4227_v61 }
 0x5c5   :  { %v1274_v55 = vsub.f32 1.0, %v1273_v30  ;;  %v1284_v30 = vor.u32 1.1754944e-38, %v1283_v45  ;;  %v1303_v45 = vand.u32 2147483648, %v4414_v15 }
 0x5c6   :  { %1817 = vmatpush.msrb.mxu2 %v4230_v56  ;;  %1928 = vmatpush.msrb.mxu1 %v4230_v56 }
 0x5c7   :  { %v1275_v19 = vmul.f32 %v2870_v33, %v1274_v55  ;;  %v1265_v55 = vadd.f32 %v1264_v44, %v3777_v14  ;;  %v1301_v14 = vand.u32 2147483647, %v4414_v15  ;;  %v1304_v4 = vor.u32 1.1754944e-38, %v1303_v45 }
 0x5c8   :  { %1818 = vmatpush.msrb.mxu2 %v4233_v58  ;;  %1929 = vmatpush.msrb.mxu1 %v4233_v58 }
 0x5c9   :  { %v1276_v42 = vadd.f32 %v2870_v33, %v1275_v19  ;;  %v345_v19 = vadd.f32 %v5214_v53, %v5213_v29  ;;  %vm1302_vm15 = vcmp.eq.f32.partialorder %v1301_v14, 8.507059e+37  ;;  %v4535_v14 = vperm.slane %v1574_v26, 1 }
 0x5ca   :  { %1819 = vmatpush.msrb.mxu2 %v4236_v22  ;;  %1930 = vmatpush.msrb.mxu1 %v4236_v22 }
 0x5cb   :  { %v1280_v20 = vsel %vm1279_vm10, %v2870_v33, %v1276_v42  ;;  %v1371_v42 = vld [vmem:[%s5057_s7] sm:$0x7]  ;;  %5219 = vst [vmem:[#allocation37_spill] sm:$0xff] %v4535_v14 }
 0x5cc   :  { %v1285_v18 = vsel %vm1282_vm11, %v1284_v30, %v1280_v20  ;;  %v1300_v20 = vsel %vm1299_vm14, %v4432_v16, %v1296_v39  ;;  %1820 = vmatpush.msrb.mxu2 %v4239_v9  ;;  %1931 = vmatpush.msrb.mxu1 %v4239_v9  ;;  %v4527_v30 = vperm.slane %v1574_v26, 0  ;;  %v4531_v53 = vperm.slane %v1371_v42, 0 }
 0x5cd   :  { %v1307_v12 = vmul.f32 %v1285_v18, %v1265_v55  ;;  %v1305_v18 = vsel %vm1302_vm15, %v1304_v4, %v1300_v20  ;;  %v1602_v55 = vpop.f32.mrf.mxu1  ;;  %v4537_v4 = vperm.slane %v1371_v42, 1 }
 0x5ce   :  { %v1310_v15 = vsub.f32 1.0, %v1305_v18  ;;  %v1312_v39 = vmul.f32 %v1305_v18, %v4251_v13  ;;  %1821 = vmatpush.msrb.mxu2 %v4241_v31  ;;  %1932 = vmatpush.msrb.mxu1 %v4241_v31  ;;  %v1396_v13 = vpop.f32.mrf.mxu2  ;;  %5216 = vst [vmem:[#allocation44_spill] sm:$0xff] %v4527_v30  ;;  %v1437_v18 = vpop.f32.mrf.mxu3 }
 0x5cf   :  { %v1308_v33 = vadd.f32 %v1307_v12, %v345_v19  ;;  %5218 = vst [vmem:[#allocation26_spill] sm:$0xff] %v4531_v53  ;;  %v1603_v19 = vadd.f32 %v1602_v55, %v4527_v30  ;;  %v1397_v45 = vadd.f32 %v1396_v13, %v4531_v53 }
 0x5d0   :  { %1822 = vmatpush.msrb.mxu2 %v4244_v7  ;;  %1933 = vmatpush.msrb.mxu1 %v4244_v7  ;;  %5220 = vst [vmem:[#allocation32_spill] sm:$0xff] %v4537_v4 }
 0x5d1   :  { %2871 = vtanh.f32 %v1308_v33  ;;  %v1645_v33 = vadd.f32 %v1603_v19, %v1397_v45 }
 0x5d5   :  { %v1622_v20 = vpop.f32.mrf.mxu1 }
 0x5d7   :  { %v2872_v16 = vpop.eup %2871 }
 0x5d8   :  { %v1311_v12 = vmul.f32 %v2872_v16, %v1310_v15  ;;  %v1623_v16 = vadd.f32 %v1622_v20, %v4535_v14  ;;  %v4553_v14 = vperm.slane %v1371_v42, 2 }
 0x5da   :  { %v1313_v44 = vadd.f32 %v1312_v39, %v1311_v12  ;;  %v2738_v12 = vmul.f32 -1.442695, %v1645_v33  ;;  %v1438_v39 = vadd.f32 %v1437_v18, %v4537_v4 }
 0x5dc   :  { %1416 = vmatmul.f32.gmra.mxu2 %v1313_v44  ;;  %1457 = vmatmul.f32.gmra.mxu3 %v1313_v44  ;;  %2873 = vpow2.f32 %v2738_v12 }
 0x5dd   :  { %1498 = vmatmul.f32.gmra.mxu0 %v1313_v44  ;;  %v1665_v44 = vadd.f32 %v1623_v16, %v1438_v39 }
 0x5e2   :  { %v2874_v13 = vpop.eup %2873 }
 0x5e3   :  { %v1649_v30 = vadd.f32 1.0, %v2874_v13  ;;  %v4551_v13 = vperm.slane %v1574_v26, 2 }
 0x5e4   :  { %1641 = vmatmul.f32.vlgmr.msra.gmra.mxu2 %v5203_v17  ;;  %v4522_v17 = vpop.f32.mrf.mxu2 }
 0x5e5   :  { %1938 = vmatpush.msra.mxu2 %v4253_v35  ;;  %5215 = vst [vmem:[#allocation28_spill] sm:$0xff] %v4522_v17  ;;  %vm1655_vm1 = vweird.f32 %v1649_v30 }
 0x5e6   :  { %5226 = vst [vmem:[#allocation36_spill] sm:$0xff] %v4551_v13 }
 0x5e7   :  { %1939 = vmatpush.msra.mxu2 %v4259_v10 }
 0x5e9   :  { %1940 = vmatpush.msra.mxu2 %v4263_v1 }
 0x5eb   :  { %1941 = vmatpush.msra.mxu2 %v4268_v32 }
 0x5ec   :  { %v4529_v29 = vpop.f32.mrf.mxu2 }
 0x5ed   :  { %1942 = vmatpush.msra.mxu2 %v4273_v49  ;;  %5217 = vst [vmem:[#allocation43_spill] sm:$0xff] %v4529_v29  ;;  %v2739_v29 = vmul.f32 -1.442695, %v1665_v44 }
 0x5ef   :  { %1943 = vmatpush.msra.mxu2 %v4280_v2  ;;  %2875 = vpow2.f32 %v2739_v29  ;;  %v1661_v29 = vand.u32 2147483648, %v1649_v30 }
 0x5f0   :  { %2877 = vrcp.f32 %v1649_v30 }
 0x5f1   :  { %1944 = vmatpush.msra.mxu2 %v4284_v43 }
 0x5f3   :  { %1945 = vmatpush.msra.mxu2 %v4289_v63 }
 0x5f4   :  { %v4539_v15 = vpop.f32.mrf.mxu2 }
 0x5f5   :  { %1946 = vmatpush.msra.mxu2 %v4294_v46  ;;  %5221 = vst [vmem:[#allocation34_spill] sm:$0xff] %v4539_v15  ;;  %v2876_v19 = vpop.eup %2875 }
 0x5f6   :  { %v1669_v17 = vadd.f32 1.0, %v2876_v19  ;;  %v2878_v53 = vpop.eup %2877 }
 0x5f7   :  { %1947 = vmatpush.msra.mxu2 %v4300_v27  ;;  %v1651_v15 = vmul.f32 %v2878_v53, %v1649_v30  ;;  %vm1656_vm0 = vweird.f32 %v2878_v53 }
 0x5f8   :  { %2879 = vrcp.f32 %v1669_v17  ;;  %vm1657_vm2 = vmor %vm1655_vm1, %vm1656_vm0  ;;  %v1681_v26 = vand.u32 2147483648, %v1669_v17  ;;  %vm1675_vm5 = vweird.f32 %v1669_v17 }
 0x5f9   :  { %1948 = vmatpush.msra.mxu2 %v4305_v36  ;;  %v1652_v18 = vsub.f32 1.0, %v1651_v15  ;;  %v1662_v15 = vor.u32 1.1754944e-38, %v1661_v29 }
 0x5fb   :  { %1949 = vmatpush.msra.mxu2 %v4310_v51  ;;  %v1653_v12 = vmul.f32 %v2878_v53, %v1652_v18 }
 0x5fc   :  { %v4543_v55 = vpop.f32.mrf.mxu2 }
 0x5fd   :  { %1950 = vmatpush.msra.mxu2 %v4315_v50  ;;  %5222 = vst [vmem:[#allocation33_spill] sm:$0xff] %v4543_v55  ;;  %v1654_v55 = vadd.f32 %v2878_v53, %v1653_v12 }
 0x5fe   :  { %v2880_v33 = vpop.eup %2879 }
 0x5ff   :  { %1951 = vmatpush.msra.mxu2 %v4321_v60  ;;  %v1671_v16 = vmul.f32 %v2880_v33, %v1669_v17  ;;  %v1658_v4 = vsel %vm1657_vm2, %v2878_v53, %v1654_v55  ;;  %vm1676_vm4 = vweird.f32 %v2880_v33 }
 0x600   :  { %vm1677_vm6 = vmor %vm1675_vm5, %vm1676_vm4 }
 0x601   :  { %1952 = vmatpush.msra.mxu2 %v4328_v34  ;;  %v1672_v44 = vsub.f32 1.0, %v1671_v16  ;;  %v1682_v34 = vor.u32 1.1754944e-38, %v1681_v26 }
 0x603   :  { %1953 = vmatpush.msra.mxu2 %v4333_v23  ;;  %v1673_v19 = vmul.f32 %v2880_v33, %v1672_v44 }
 0x604   :  { %v4545_v45 = vpop.f32.mrf.mxu2 }
 0x605   :  { %5223 = vst [vmem:[#allocation42_spill] sm:$0xff] %v4545_v45  ;;  %v1659_v45 = vand.u32 2147483647, %v1649_v30  ;;  %v1674_v12 = vadd.f32 %v2880_v33, %v1673_v19  ;;  %v1679_v30 = vand.u32 2147483647, %v1669_v17  ;;  %v5243_v19 = vld [vmem:[#allocation32_spill] sm:$0xff] }
 0x607   :  { %vm1660_vm3 = vcmp.eq.f32.partialorder %v1659_v45, 8.507059e+37  ;;  %v1678_v42 = vsel %vm1677_vm6, %v2880_v33, %v1674_v12  ;;  %vm1680_vm7 = vcmp.eq.f32.partialorder %v1679_v30, 8.507059e+37 }
 0x608   :  { %v1663_v16 = vsel %vm1660_vm3, %v1662_v15, %v1658_v4  ;;  %v1683_v53 = vsel %vm1680_vm7, %v1682_v34, %v1678_v42  ;;  %v5246_v42 = vld [vmem:[#allocation28_spill] sm:$0xff] }
 0x609   :  { %v1688_v55 = vsub.f32 1.0, %v1683_v53  ;;  %v1690_v45 = vmul.f32 0.0, %v1683_v53 }
 0x60c   :  { %v4547_v20 = vpop.f32.mrf.mxu2 }
 0x60d   :  { %5224 = vst [vmem:[#allocation49_spill] sm:$0xff] %v4547_v20  ;;  %v1478_v20 = vpop.f32.mrf.mxu0 }
 0x65f   :  { %v4549_v39 = vpop.f32.mrf.mxu2 }
 0x660   :  { %5225 = vst [vmem:[#allocation50_spill] sm:$0xff] %v4549_v39  ;;  %v1479_v39 = vadd.f32 %v1478_v20, %v4553_v14 }
 0x667   :  { %v1642_v23 = vpop.f32.mrf.mxu2 }
 0x668   :  { %v1643_v18 = vadd.f32 %v1642_v23, %v4551_v13 }
 0x66a   :  { %v1685_v7 = vmul.f32 %v1663_v16, %v1643_v18  ;;  %v5244_v18 = vld [vmem:[#allocation37_spill] sm:$0xff] }
 0x66c   :  { %v1686_v44 = vadd.f32 %v1685_v7, %v1479_v39 }
 0x66e   :  { %2881 = vtanh.f32 %v1686_v44  ;;  %v5245_v44 = vld [vmem:[#allocation26_spill] sm:$0xff] }
 0x66f   :  { %v1400_v53 = vadd.f32 %v5246_v42, %v5245_v44 }
 0x674   :  { %v2882_v29 = vpop.eup %2881 }
 0x675   :  { %v1689_v23 = vmul.f32 %v2882_v29, %v1688_v55  ;;  %v5247_v55 = vld [vmem:[#allocation44_spill] sm:$0xff] }
 0x677   :  { %v4557_v13 = vadd.f32 %v1690_v45, %v1689_v23 }
 0x679   :  { %1712 = vmatmul.f32.vlgmr.msra.gmra.mxu3 %v4557_v13  ;;  %1732 = vmatmul.f32.vlgmr.msrb.gmra.mxu0 %v4557_v13 }
 0x67a   :  { %1752 = vmatmul.f32.vlgmr.msra.gmra.mxu1 %v4557_v13  ;;  %1958 = vmatpush.msra.mxu3 %v4323_v11 }
 0x67b   :  { %2029 = vmatpush.msrb.mxu0 %v4195_v54  ;;  %2049 = vmatpush.msra.mxu1 %v4253_v35  ;;  %v5227_v54 = vld [vmem:[#allocation48_spill] sm:$0xff] }
 0x67c   :  { %1959 = vmatpush.msra.mxu3 %v4374_v48 }
 0x67d   :  { %2030 = vmatpush.msrb.mxu0 %v4198_v59  ;;  %2050 = vmatpush.msra.mxu1 %v4259_v10  ;;  %v5228_v59 = vld [vmem:[#allocation30_spill] sm:$0xff] }
 0x67e   :  { %1960 = vmatpush.msra.mxu3 %v4382_v0 }
 0x67f   :  { %2031 = vmatpush.msrb.mxu0 %v4201_v62  ;;  %2051 = vmatpush.msra.mxu1 %v4263_v1  ;;  %v5229_v62 = vld [vmem:[#allocation31_spill] sm:$0xff] }
 0x680   :  { %1961 = vmatpush.msra.mxu3 %v4384_v47 }
 0x681   :  { %2032 = vmatpush.msrb.mxu0 %v4204_v8  ;;  %2052 = vmatpush.msra.mxu1 %v4268_v32  ;;  %v5230_v8 = vld [vmem:[#allocation47_spill] sm:$0xff] }
 0x682   :  { %1962 = vmatpush.msra.mxu3 %v4388_v57 }
 0x683   :  { %2033 = vmatpush.msrb.mxu0 %v4207_v41  ;;  %2053 = vmatpush.msra.mxu1 %v4273_v49  ;;  %v5231_v41 = vld [vmem:[#allocation35_spill] sm:$0xff] }
 0x684   :  { %1963 = vmatpush.msra.mxu3 %v4396_v21 }
 0x685   :  { %2034 = vmatpush.msrb.mxu0 %v4210_v24  ;;  %2054 = vmatpush.msra.mxu1 %v4280_v2  ;;  %v5232_v24 = vld [vmem:[#allocation46_spill] sm:$0xff] }
 0x686   :  { %1964 = vmatpush.msra.mxu3 %v4401_v3 }
 0x687   :  { %2035 = vmatpush.msrb.mxu0 %v4213_v38  ;;  %2055 = vmatpush.msra.mxu1 %v4284_v43  ;;  %v5233_v38 = vld [vmem:[#allocation39_spill] sm:$0xff] }
 0x688   :  { %1965 = vmatpush.msra.mxu3 %v4406_v37 }
 0x689   :  { %2036 = vmatpush.msrb.mxu0 %v4220_v5  ;;  %2056 = vmatpush.msra.mxu1 %v4289_v63  ;;  %v1481_v5 = vpop.f32.mrf.mxu0 }
 0x68a   :  { %1966 = vmatpush.msra.mxu3 %v4411_v52 }
 0x68b   :  { %2037 = vmatpush.msrb.mxu0 %v4224_v40  ;;  %2057 = vmatpush.msra.mxu1 %v4294_v46  ;;  %v1440_v40 = vpop.f32.mrf.mxu3 }
 0x68c   :  { %1967 = vmatpush.msra.mxu3 %v4423_v28  ;;  %v1441_v15 = vadd.f32 %v1440_v40, %v5243_v19 }
 0x68d   :  { %2038 = vmatpush.msrb.mxu0 %v4227_v61  ;;  %2058 = vmatpush.msra.mxu1 %v4300_v27 }
 0x68e   :  { %1968 = vmatpush.msra.mxu3 %v4427_v6 }
 0x68f   :  { %2039 = vmatpush.msrb.mxu0 %v4230_v56  ;;  %2059 = vmatpush.msra.mxu1 %v4305_v36 }
 0x690   :  { %1969 = vmatpush.msra.mxu3 %v4434_v25 }
 0x691   :  { %2040 = vmatpush.msrb.mxu0 %v4233_v58  ;;  %2060 = vmatpush.msra.mxu1 %v4310_v51  ;;  %v4610_v61 = vpop.f32.mrf.mxu0 }
 0x692   :  { %1970 = vmatpush.msra.mxu3 %v5227_v54 }
 0x693   :  { %2041 = vmatpush.msrb.mxu0 %v4236_v22  ;;  %2061 = vmatpush.msra.mxu1 %v4315_v50  ;;  %v4612_v56 = vpop.f32.mrf.mxu3 }
 0x694   :  { %1971 = vmatpush.msra.mxu3 %v5228_v59 }
 0x695   :  { %2042 = vmatpush.msrb.mxu0 %v4239_v9  ;;  %2062 = vmatpush.msra.mxu1 %v4321_v60 }
 0x696   :  { %1972 = vmatpush.msra.mxu3 %v5229_v62 }
 0x697   :  { %2043 = vmatpush.msrb.mxu0 %v4241_v31  ;;  %2063 = vmatpush.msra.mxu1 %v5230_v8 }
 0x698   :  { %1973 = vmatpush.msra.mxu3 %v5231_v41 }
 0x699   :  { %2044 = vmatpush.msrb.mxu0 %v5232_v24  ;;  %2064 = vmatpush.msra.mxu1 %v5233_v38  ;;  %v4614_v58 = vpop.f32.mrf.mxu0 }
 0x69a   :  { %5234 = vst [vmem:[#allocation52_spill] sm:$0xff] %v4614_v58 }
 0x69b   :  { %v4616_v22 = vpop.f32.mrf.mxu3 }
 0x6a1   :  { %v4618_v9 = vpop.f32.mrf.mxu0 }
 0x6a2   :  { %5235 = vst [vmem:[#allocation53_spill] sm:$0xff] %v4618_v9 }
 0x6a3   :  { %v4620_v31 = vpop.f32.mrf.mxu3 }
 0x6a4   :  { %5236 = vst [vmem:[#allocation51_spill] sm:$0xff] %v4620_v31 }
 0x6a9   :  { %v4622_v7 = vpop.f32.mrf.mxu0 }
 0x6aa   :  { %5237 = vst [vmem:[#allocation25_spill] sm:$0xff] %v4622_v7 }
 0x6ab   :  { %v4624_v34 = vpop.f32.mrf.mxu3 }
 0x6ac   :  { %5238 = vst [vmem:[#allocation38_spill] sm:$0xff] %v4624_v34 }
 0x6b1   :  { %v4626_v17 = vpop.f32.mrf.mxu0 }
 0x6b2   :  { %5239 = vst [vmem:[#allocation54_spill] sm:$0xff] %v4626_v17 }
 0x6b3   :  { %v4628_v4 = vpop.f32.mrf.mxu3 }
 0x6b4   :  { %5240 = vst [vmem:[#allocation55_spill] sm:$0xff] %v4628_v4 }
 0x6b9   :  { %v4630_v20 = vpop.f32.mrf.mxu0 }
 0x6ba   :  { %5241 = vst [vmem:[#allocation41_spill] sm:$0xff] %v4630_v20 }
 0x6bb   :  { %v4632_v33 = vpop.f32.mrf.mxu3 }
 0x6bc   :  { %5242 = vst [vmem:[#allocation29_spill] sm:$0xff] %v4632_v33 }
 0x6f6   :  { %v1733_v39 = vpop.f32.mrf.mxu0 }
 0x6f7   :  { %v1734_v16 = vadd.f32 %v1733_v39, %v5244_v18 }
 0x6f9   :  { %v1776_v12 = vadd.f32 %v1734_v16, %v1441_v15 }
 0x6fb   :  { %v2741_v26 = vmul.f32 -1.442695, %v1776_v12 }
 0x6fc   :  { %v1713_v30 = vpop.f32.mrf.mxu3 }
 0x6fd   :  { %2883 = vpow2.f32 %v2741_v26  ;;  %v1714_v29 = vadd.f32 %v1713_v30, %v5247_v55 }
 0x6ff   :  { %v1756_v23 = vadd.f32 %v1714_v29, %v1400_v53  ;;  %v1753_v53 = vpop.f32.mrf.mxu1 }
 0x701   :  { %v2740_v45 = vmul.f32 -1.442695, %v1756_v23 }
 0x703   :  { %v2884_v24 = vpop.eup %2883  ;;  %2885 = vpow2.f32 %v2740_v45  ;;  %v5248_v45 = vld [vmem:[#allocation36_spill] sm:$0xff] }
 0x704   :  { %v1780_v20 = vadd.f32 1.0, %v2884_v24  ;;  %v1754_v24 = vadd.f32 %v1753_v53, %v5248_v45 }
 0x706   :  { %2887 = vrcp.f32 %v1780_v20  ;;  %vm1786_vm13 = vweird.f32 %v1780_v20 }
 0x709   :  { %v2886_v33 = vpop.eup %2885 }
 0x70a   :  { %v1760_v17 = vadd.f32 1.0, %v2886_v33 }
 0x70c   :  { %2889 = vrcp.f32 %v1760_v17  ;;  %v2888_v40 = vpop.eup %2887  ;;  %v1772_v7 = vand.u32 2147483648, %v1760_v17  ;;  %v1770_v26 = vand.u32 2147483647, %v1760_v17  ;;  %vm1766_vm9 = vweird.f32 %v1760_v17 }
 0x70d   :  { %v1782_v39 = vmul.f32 %v2888_v40, %v1780_v20  ;;  %vm1787_vm12 = vweird.f32 %v2888_v40 }
 0x70e   :  { %v1773_v23 = vor.u32 1.1754944e-38, %v1772_v7  ;;  %vm1771_vm11 = vcmp.eq.f32.partialorder %v1770_v26, 8.507059e+37  ;;  %vm1788_vm14 = vmor %vm1786_vm13, %vm1787_vm12 }
 0x70f   :  { %v1783_v12 = vsub.f32 1.0, %v1782_v39  ;;  %v1482_v39 = vadd.f32 %v1481_v5, %v4553_v14  ;;  %v4648_v5 = vld [vmem:[#allocation13 + $0x168] sm:$0xff] }
 0x711   :  { %v1784_v30 = vmul.f32 %v2888_v40, %v1783_v12 }
 0x712   :  { %v2890_v15 = vpop.eup %2889 }
 0x713   :  { %v1762_v16 = vmul.f32 %v2890_v15, %v1760_v17  ;;  %vm1767_vm8 = vweird.f32 %v2890_v15  ;;  %v1785_v9 = vadd.f32 %v2888_v40, %v1784_v30 }
 0x714   :  { %vm1768_vm10 = vmor %vm1766_vm9, %vm1767_vm8 }
 0x715   :  { %v1763_v4 = vsub.f32 1.0, %v1762_v16  ;;  %v1792_v16 = vand.u32 2147483648, %v1780_v20  ;;  %v1789_v58 = vsel %vm1788_vm14, %v2888_v40, %v1785_v9  ;;  %v4658_v9 = vld [vmem:[#allocation13 + $0x138] sm:$0xff] }
 0x717   :  { %v1764_v42 = vmul.f32 %v2890_v15, %v1763_v4  ;;  %v1790_v4 = vand.u32 2147483647, %v1780_v20  ;;  %v1444_v20 = vadd.f32 %v4612_v56, %v5243_v19 }
 0x719   :  { %v1765_v29 = vadd.f32 %v2890_v15, %v1764_v42  ;;  %v1793_v42 = vor.u32 1.1754944e-38, %v1792_v16  ;;  %vm1791_vm15 = vcmp.eq.f32.partialorder %v1790_v4, 8.507059e+37 }
 0x71b   :  { %v1769_v33 = vsel %vm1768_vm10, %v2890_v15, %v1765_v29  ;;  %v1794_v7 = vsel %vm1791_vm15, %v1793_v42, %v1789_v58  ;;  %v4653_v58 = vld [vmem:[#allocation13 + $0x150] sm:$0xff] }
 0x71c   :  { %v1774_v34 = vsel %vm1771_vm11, %v1773_v23, %v1769_v33  ;;  %v1799_v17 = vsub.f32 1.0, %v1794_v7  ;;  %v1801_v26 = vmul.f32 %v1794_v7, %v4557_v13 }
 0x71d   :  { %v1796_v31 = vmul.f32 %v1774_v34, %v1754_v24 }
 0x71f   :  { %v1797_v12 = vadd.f32 %v1796_v31, %v1482_v39 }
 0x721   :  { %2891 = vtanh.f32 %v1797_v12 }
 0x727   :  { %v2892_v53 = vpop.eup %2891 }
 0x728   :  { %v1800_v15 = vmul.f32 %v2892_v53, %v1799_v17 }
 0x72a   :  { %v4642_v29 = vadd.f32 %v1801_v26, %v1800_v15 }
 0x72c   :  { %1823 = vmatmul.f32.vlgmr.msrb.gmra.mxu2 %v4642_v29  ;;  %1843 = vmatmul.f32.vlgmr.msrb.gmra.mxu3 %v4642_v29 }
 0x72d   :  { %1863 = vmatmul.f32.vlgmr.msra.gmra.mxu0 %v4642_v29  ;;  %2069 = vmatpush.msrb.mxu2 %v4323_v11  ;;  %v4663_v11 = vld [vmem:[#allocation13 + $0x120] sm:$0xff] }
 0x72e   :  { %2140 = vmatpush.msrb.mxu3 %v4648_v5  ;;  %2160 = vmatpush.msra.mxu0 %v4253_v35  ;;  %v4668_v35 = vld [vmem:[#allocation13 + $0x108] sm:$0xff] }
 0x72f   :  { %2070 = vmatpush.msrb.mxu2 %v4374_v48 }
 0x730   :  { %2141 = vmatpush.msrb.mxu3 %v4653_v58  ;;  %2161 = vmatpush.msra.mxu0 %v4259_v10  ;;  %v4673_v10 = vld [vmem:[#allocation13 + $0xf0] sm:$0xff] }
 0x731   :  { %2071 = vmatpush.msrb.mxu2 %v4382_v0 }
 0x732   :  { %2142 = vmatpush.msrb.mxu3 %v4658_v9  ;;  %2162 = vmatpush.msra.mxu0 %v4263_v1  ;;  %v4678_v1 = vld [vmem:[#allocation13 + $0xd8] sm:$0xff] }
 0x733   :  { %2072 = vmatpush.msrb.mxu2 %v4384_v47 }
 0x734   :  { %2143 = vmatpush.msrb.mxu3 %v4663_v11  ;;  %2163 = vmatpush.msra.mxu0 %v4268_v32  ;;  %v4683_v32 = vld [vmem:[#allocation13 + $0xc0] sm:$0xff] }
 0x735   :  { %2073 = vmatpush.msrb.mxu2 %v4388_v57 }
 0x736   :  { %2144 = vmatpush.msrb.mxu3 %v4668_v35  ;;  %2164 = vmatpush.msra.mxu0 %v4273_v49  ;;  %v4688_v49 = vld [vmem:[#allocation13 + $0xa8] sm:$0xff] }
 0x737   :  { %2074 = vmatpush.msrb.mxu2 %v4396_v21 }
 0x738   :  { %2145 = vmatpush.msrb.mxu3 %v4673_v10  ;;  %2165 = vmatpush.msra.mxu0 %v4280_v2  ;;  %v4693_v2 = vld [vmem:[#allocation13 + $0x90] sm:$0xff] }
 0x739   :  { %2075 = vmatpush.msrb.mxu2 %v4401_v3 }
 0x73a   :  { %2146 = vmatpush.msrb.mxu3 %v4678_v1  ;;  %2166 = vmatpush.msra.mxu0 %v4284_v43  ;;  %v4698_v43 = vld [vmem:[#allocation13 + $0x78] sm:$0xff] }
 0x73b   :  { %2076 = vmatpush.msrb.mxu2 %v4406_v37 }
 0x73c   :  { %2147 = vmatpush.msrb.mxu3 %v4683_v32  ;;  %2167 = vmatpush.msra.mxu0 %v4289_v63  ;;  %v4703_v63 = vld [vmem:[#allocation13 + $0x60] sm:$0xff] }
 0x73d   :  { %2077 = vmatpush.msrb.mxu2 %v4411_v52 }
 0x73e   :  { %2148 = vmatpush.msrb.mxu3 %v4688_v49  ;;  %2168 = vmatpush.msra.mxu0 %v4294_v46  ;;  %v4708_v46 = vld [vmem:[#allocation13 + $0x48] sm:$0xff] }
 0x73f   :  { %2078 = vmatpush.msrb.mxu2 %v4423_v28 }
 0x740   :  { %2149 = vmatpush.msrb.mxu3 %v4693_v2  ;;  %2169 = vmatpush.msra.mxu0 %v4300_v27  ;;  %v4713_v27 = vld [vmem:[#allocation13 + $0x30] sm:$0xff] }
 0x741   :  { %2079 = vmatpush.msrb.mxu2 %v4427_v6 }
 0x742   :  { %2150 = vmatpush.msrb.mxu3 %v4698_v43  ;;  %2170 = vmatpush.msra.mxu0 %v4305_v36  ;;  %v4718_v36 = vld [vmem:[#allocation13 + $0x18] sm:$0xff] }
 0x743   :  { %2080 = vmatpush.msrb.mxu2 %v4434_v25 }
 0x744   :  { %2151 = vmatpush.msrb.mxu3 %v4703_v63  ;;  %2171 = vmatpush.msra.mxu0 %v4310_v51  ;;  %v4723_v51 = vld [vmem:[#allocation13] sm:$0xff] }
 0x745   :  { %2081 = vmatpush.msrb.mxu2 %v5227_v54 }
 0x746   :  { %2152 = vmatpush.msrb.mxu3 %v4708_v46  ;;  %2172 = vmatpush.msra.mxu0 %v4315_v50 }
 0x747   :  { %2082 = vmatpush.msrb.mxu2 %v5228_v59 }
 0x748   :  { %2153 = vmatpush.msrb.mxu3 %v4713_v27  ;;  %2173 = vmatpush.msra.mxu0 %v4321_v60  ;;  %v5249_v60 = vld [vmem:[#allocation43_spill] sm:$0xff] }
 0x749   :  { %2083 = vmatpush.msrb.mxu2 %v5229_v62  ;;  %v1403_v34 = vadd.f32 %v5249_v60, %v5245_v44 }
 0x74a   :  { %2154 = vmatpush.msrb.mxu3 %v4718_v36  ;;  %2174 = vmatpush.msra.mxu0 %v5230_v8 }
 0x74b   :  { %2084 = vmatpush.msrb.mxu2 %v5231_v41 }
 0x74c   :  { %2155 = vmatpush.msrb.mxu3 %v4723_v51  ;;  %2175 = vmatpush.msra.mxu0 %v5233_v38 }
 0x7af   :  { %v1824_v50 = vpop.f32.mrf.mxu2  ;;  %v1844_v31 = vpop.f32.mrf.mxu3 }
 0x7b0   :  { %v1825_v40 = vadd.f32 %v1824_v50, %v5247_v55  ;;  %v1845_v8 = vadd.f32 %v1844_v31, %v5244_v18  ;;  %v1864_v31 = vpop.f32.mrf.mxu0 }
 0x7b2   :  { %v1867_v30 = vadd.f32 %v1825_v40, %v1403_v34  ;;  %v1887_v23 = vadd.f32 %v1845_v8, %v1444_v20  ;;  %v1865_v40 = vadd.f32 %v1864_v31, %v5248_v45  ;;  %v4756_v31 = vld [vmem:[#allocation13 + $0x140] sm:$0xff] }
 0x7b4   :  { %v2742_v24 = vmul.f32 -1.442695, %v1867_v30  ;;  %v2743_v33 = vmul.f32 -1.442695, %v1887_v23 }
 0x7b6   :  { %2893 = vpow2.f32 %v2742_v24  ;;  %v1485_v24 = vadd.f32 %v4610_v61, %v4553_v14  ;;  %v4742_v61 = vld [vmem:[#allocation13 + $0x178] sm:$0xff] }
 0x7b7   :  { %2895 = vpow2.f32 %v2743_v33 }
 0x7bc   :  { %v2894_v39 = vpop.eup %2893 }
 0x7bd   :  { %v2896_v38 = vpop.eup %2895  ;;  %v1871_v16 = vadd.f32 1.0, %v2894_v39 }
 0x7be   :  { %v1891_v4 = vadd.f32 1.0, %v2896_v38 }
 0x7bf   :  { %2897 = vrcp.f32 %v1871_v16  ;;  %v1883_v53 = vand.u32 2147483648, %v1871_v16  ;;  %v1881_v50 = vand.u32 2147483647, %v1871_v16  ;;  %vm1877_vm1 = vweird.f32 %v1871_v16 }
 0x7c0   :  { %2899 = vrcp.f32 %v1891_v4  ;;  %v1903_v39 = vand.u32 2147483648, %v1891_v4  ;;  %vm1897_vm5 = vweird.f32 %v1891_v4  ;;  %v1901_v38 = vand.u32 2147483647, %v1891_v4 }
 0x7c1   :  { %v1884_v20 = vor.u32 1.1754944e-38, %v1883_v53  ;;  %vm1882_vm3 = vcmp.eq.f32.partialorder %v1881_v50, 8.507059e+37 }
 0x7c2   :  { %vm1902_vm7 = vcmp.eq.f32.partialorder %v1901_v38, 8.507059e+37 }
 0x7c5   :  { %v2898_v12 = vpop.eup %2897 }
 0x7c6   :  { %v2900_v42 = vpop.eup %2899  ;;  %v1873_v7 = vmul.f32 %v2898_v12, %v1871_v16  ;;  %vm1878_vm0 = vweird.f32 %v2898_v12  ;;  %v1904_v16 = vor.u32 1.1754944e-38, %v1903_v39 }
 0x7c7   :  { %v1893_v56 = vmul.f32 %v2900_v42, %v1891_v4  ;;  %vm1879_vm2 = vmor %vm1877_vm1, %vm1878_vm0  ;;  %vm1898_vm4 = vweird.f32 %v2900_v42  ;;  %v4746_v4 = vld [vmem:[#allocation13 + $0x170] sm:$0xff] }
 0x7c8   :  { %v1874_v17 = vsub.f32 1.0, %v1873_v7  ;;  %vm1899_vm6 = vmor %vm1897_vm5, %vm1898_vm4 }
 0x7c9   :  { %v1894_v15 = vsub.f32 1.0, %v1893_v56 }
 0x7ca   :  { %v1875_v26 = vmul.f32 %v2898_v12, %v1874_v17 }
 0x7cb   :  { %v1895_v60 = vmul.f32 %v2900_v42, %v1894_v15 }
 0x7cc   :  { %v1876_v34 = vadd.f32 %v2898_v12, %v1875_v26 }
 0x7cd   :  { %v1896_v23 = vadd.f32 %v2900_v42, %v1895_v60  ;;  %v4761_v60 = vld [vmem:[#allocation13 + $0x128] sm:$0xff] }
 0x7ce   :  { %v1880_v8 = vsel %vm1879_vm2, %v2898_v12, %v1876_v34  ;;  %v5250_v34 = vld [vmem:[#allocation34_spill] sm:$0xff] }
 0x7cf   :  { %v1885_v30 = vsel %vm1882_vm3, %v1884_v20, %v1880_v8  ;;  %v1900_v56 = vsel %vm1899_vm6, %v2900_v42, %v1896_v23  ;;  %v4751_v42 = vld [vmem:[#allocation13 + $0x158] sm:$0xff]  ;;  %v1406_v20 = vadd.f32 %v5250_v34, %v5245_v44  ;;  %v1447_v23 = vadd.f32 %v4616_v22, %v5243_v19 }
 0x7d0   :  { %v1907_v33 = vmul.f32 %v1885_v30, %v1865_v40  ;;  %v1905_v17 = vsel %vm1902_vm7, %v1904_v16, %v1900_v56 }
 0x7d1   :  { %v1910_v53 = vsub.f32 1.0, %v1905_v17  ;;  %v1912_v26 = vmul.f32 %v1905_v17, %v4642_v29 }
 0x7d2   :  { %v1908_v7 = vadd.f32 %v1907_v33, %v1485_v24 }
 0x7d4   :  { %2901 = vtanh.f32 %v1908_v7 }
 0x7da   :  { %v2902_v12 = vpop.eup %2901 }
 0x7db   :  { %v1911_v15 = vmul.f32 %v2902_v12, %v1910_v53 }
 0x7dd   :  { %v4737_v50 = vadd.f32 %v1912_v26, %v1911_v15 }
 0x7df   :  { %1934 = vmatmul.f32.vlgmr.msrb.gmra.mxu1 %v4737_v50  ;;  %1954 = vmatmul.f32.vlgmr.msra.gmra.mxu2 %v4737_v50 }
 0x7e0   :  { %1974 = vmatmul.f32.vlgmr.msra.gmra.mxu3 %v4737_v50  ;;  %2180 = vmatpush.msrb.mxu1 %v4742_v61 }
 0x7e1   :  { %2251 = vmatpush.msra.mxu2 %v4648_v5  ;;  %2271 = vmatpush.msra.mxu3 %v4746_v4 }
 0x7e2   :  { %2181 = vmatpush.msrb.mxu1 %v4374_v48  ;;  %v4766_v48 = vld [vmem:[#allocation13 + $0x110] sm:$0xff] }
 0x7e3   :  { %2252 = vmatpush.msra.mxu2 %v4653_v58  ;;  %2272 = vmatpush.msra.mxu3 %v4751_v42 }
 0x7e4   :  { %2182 = vmatpush.msrb.mxu1 %v4382_v0  ;;  %v4771_v0 = vld [vmem:[#allocation13 + $0xf8] sm:$0xff] }
 0x7e5   :  { %2253 = vmatpush.msra.mxu2 %v4658_v9  ;;  %2273 = vmatpush.msra.mxu3 %v4756_v31 }
 0x7e6   :  { %2183 = vmatpush.msrb.mxu1 %v4384_v47  ;;  %v4776_v47 = vld [vmem:[#allocation13 + $0xe0] sm:$0xff] }
 0x7e7   :  { %2254 = vmatpush.msra.mxu2 %v4663_v11  ;;  %2274 = vmatpush.msra.mxu3 %v4761_v60 }
 0x7e8   :  { %2184 = vmatpush.msrb.mxu1 %v4388_v57  ;;  %v4781_v57 = vld [vmem:[#allocation13 + $0xc8] sm:$0xff] }
 0x7e9   :  { %2255 = vmatpush.msra.mxu2 %v4668_v35  ;;  %2275 = vmatpush.msra.mxu3 %v4766_v48 }
 0x7ea   :  { %2185 = vmatpush.msrb.mxu1 %v4396_v21  ;;  %v4786_v21 = vld [vmem:[#allocation13 + $0xb0] sm:$0xff] }
 0x7eb   :  { %2256 = vmatpush.msra.mxu2 %v4673_v10  ;;  %2276 = vmatpush.msra.mxu3 %v4771_v0 }
 0x7ec   :  { %2186 = vmatpush.msrb.mxu1 %v4401_v3  ;;  %v4791_v3 = vld [vmem:[#allocation13 + $0x98] sm:$0xff] }
 0x7ed   :  { %2257 = vmatpush.msra.mxu2 %v4678_v1  ;;  %2277 = vmatpush.msra.mxu3 %v4776_v47 }
 0x7ee   :  { %2187 = vmatpush.msrb.mxu1 %v4406_v37  ;;  %v4796_v37 = vld [vmem:[#allocation13 + $0x80] sm:$0xff] }
 0x7ef   :  { %2258 = vmatpush.msra.mxu2 %v4683_v32  ;;  %2278 = vmatpush.msra.mxu3 %v4781_v57 }
 0x7f0   :  { %2188 = vmatpush.msrb.mxu1 %v4411_v52  ;;  %v4801_v52 = vld [vmem:[#allocation13 + $0x68] sm:$0xff] }
 0x7f1   :  { %2259 = vmatpush.msra.mxu2 %v4688_v49  ;;  %2279 = vmatpush.msra.mxu3 %v4786_v21 }
 0x7f2   :  { %2189 = vmatpush.msrb.mxu1 %v4423_v28  ;;  %v4806_v28 = vld [vmem:[#allocation13 + $0x50] sm:$0xff] }
 0x7f3   :  { %2260 = vmatpush.msra.mxu2 %v4693_v2  ;;  %2280 = vmatpush.msra.mxu3 %v4791_v3 }
 0x7f4   :  { %2190 = vmatpush.msrb.mxu1 %v4427_v6  ;;  %v4811_v6 = vld [vmem:[#allocation13 + $0x38] sm:$0xff] }
 0x7f5   :  { %2261 = vmatpush.msra.mxu2 %v4698_v43  ;;  %2281 = vmatpush.msra.mxu3 %v4796_v37 }
 0x7f6   :  { %2191 = vmatpush.msrb.mxu1 %v4434_v25  ;;  %v4816_v25 = vld [vmem:[#allocation13 + $0x20] sm:$0xff] }
 0x7f7   :  { %2262 = vmatpush.msra.mxu2 %v4703_v63  ;;  %2282 = vmatpush.msra.mxu3 %v4801_v52 }
 0x7f8   :  { %2192 = vmatpush.msrb.mxu1 %v5227_v54  ;;  %v4821_v54 = vld [vmem:[#allocation13 + $0x8] sm:$0xff] }
 0x7f9   :  { %2263 = vmatpush.msra.mxu2 %v4708_v46  ;;  %2283 = vmatpush.msra.mxu3 %v4806_v28 }
 0x7fa   :  { %2193 = vmatpush.msrb.mxu1 %v5228_v59 }
 0x7fb   :  { %2264 = vmatpush.msra.mxu2 %v4713_v27  ;;  %2284 = vmatpush.msra.mxu3 %v4811_v6 }
 0x7fc   :  { %2194 = vmatpush.msrb.mxu1 %v5229_v62 }
 0x7fd   :  { %2265 = vmatpush.msra.mxu2 %v4718_v36  ;;  %2285 = vmatpush.msra.mxu3 %v4816_v25 }
 0x7fe   :  { %2195 = vmatpush.msrb.mxu1 %v5231_v41 }
 0x7ff   :  { %2266 = vmatpush.msra.mxu2 %v4723_v51  ;;  %2286 = vmatpush.msra.mxu3 %v4821_v54 }
 0x85c   :  { %v1935_v59 = vpop.f32.mrf.mxu1 }
 0x85d   :  { %v1936_v62 = vadd.f32 %v1935_v59, %v5247_v55 }
 0x85f   :  { %v1978_v40 = vadd.f32 %v1936_v62, %v1406_v20 }
 0x861   :  { %v2744_v8 = vmul.f32 -1.442695, %v1978_v40 }
 0x862   :  { %v1955_v30 = vpop.f32.mrf.mxu2 }
 0x863   :  { %2903 = vpow2.f32 %v2744_v8  ;;  %v1956_v41 = vadd.f32 %v1955_v30, %v5244_v18  ;;  %v1975_v59 = vpop.f32.mrf.mxu3 }
 0x864   :  { %v1976_v8 = vadd.f32 %v1975_v59, %v5248_v45 }
 0x865   :  { %v1998_v24 = vadd.f32 %v1956_v41, %v1447_v23  ;;  %v5251_v23 = vld [vmem:[#allocation52_spill] sm:$0xff] }
 0x866   :  { %v1488_v41 = vadd.f32 %v5251_v23, %v4553_v14 }
 0x867   :  { %v2745_v33 = vmul.f32 -1.442695, %v1998_v24 }
 0x869   :  { %v2904_v39 = vpop.eup %2903  ;;  %2905 = vpow2.f32 %v2745_v33 }
 0x86a   :  { %v1982_v38 = vadd.f32 1.0, %v2904_v39 }
 0x86c   :  { %2907 = vrcp.f32 %v1982_v38  ;;  %v1994_v12 = vand.u32 2147483648, %v1982_v38  ;;  %v1992_v26 = vand.u32 2147483647, %v1982_v38  ;;  %vm1988_vm9 = vweird.f32 %v1982_v38 }
 0x86e   :  { %v1995_v62 = vor.u32 1.1754944e-38, %v1994_v12  ;;  %vm1993_vm11 = vcmp.eq.f32.partialorder %v1992_v26, 8.507059e+37 }
 0x86f   :  { %v2906_v7 = vpop.eup %2905 }
 0x870   :  { %v2002_v56 = vadd.f32 1.0, %v2906_v7 }
 0x872   :  { %v2908_v16 = vpop.eup %2907  ;;  %2909 = vrcp.f32 %v2002_v56  ;;  %v2014_v39 = vand.u32 2147483648, %v2002_v56  ;;  %vm2008_vm13 = vweird.f32 %v2002_v56 }
 0x873   :  { %v1984_v17 = vmul.f32 %v2908_v16, %v1982_v38  ;;  %vm1989_vm8 = vweird.f32 %v2908_v16 }
 0x874   :  { %vm1990_vm10 = vmor %vm1988_vm9, %vm1989_vm8  ;;  %v2015_v38 = vor.u32 1.1754944e-38, %v2014_v39 }
 0x875   :  { %v1985_v53 = vsub.f32 1.0, %v1984_v17  ;;  %v2012_v17 = vand.u32 2147483647, %v2002_v56 }
 0x877   :  { %v1986_v15 = vmul.f32 %v2908_v16, %v1985_v53  ;;  %vm2013_vm15 = vcmp.eq.f32.partialorder %v2012_v17, 8.507059e+37 }
 0x878   :  { %v2910_v22 = vpop.eup %2909 }
 0x879   :  { %v2004_v34 = vmul.f32 %v2910_v22, %v2002_v56  ;;  %v1987_v20 = vadd.f32 %v2908_v16, %v1986_v15  ;;  %vm2009_vm12 = vweird.f32 %v2910_v22  ;;  %v4842_v56 = vld [vmem:[#allocation13 + $0x160] sm:$0xff] }
 0x87a   :  { %vm2010_vm14 = vmor %vm2008_vm13, %vm2009_vm12 }
 0x87b   :  { %v2005_v40 = vsub.f32 1.0, %v2004_v34  ;;  %v1991_v30 = vsel %vm1990_vm10, %v2908_v16, %v1987_v20 }
 0x87c   :  { %v1996_v24 = vsel %vm1993_vm11, %v1995_v62, %v1991_v30 }
 0x87d   :  { %v2006_v33 = vmul.f32 %v2910_v22, %v2005_v40  ;;  %v2018_v7 = vmul.f32 %v1996_v24, %v1976_v8  ;;  %v4852_v40 = vld [vmem:[#allocation13 + $0x130] sm:$0xff] }
 0x87f   :  { %v2007_v53 = vadd.f32 %v2910_v22, %v2006_v33  ;;  %v2019_v15 = vadd.f32 %v2018_v7, %v1488_v41 }
 0x881   :  { %v2011_v12 = vsel %vm2010_vm14, %v2910_v22, %v2007_v53  ;;  %2911 = vtanh.f32 %v2019_v15  ;;  %v4847_v22 = vld [vmem:[#allocation13 + $0x148] sm:$0xff] }
 0x882   :  { %v2016_v59 = vsel %vm2013_vm15, %v2015_v38, %v2011_v12 }
 0x883   :  { %v2021_v16 = vsub.f32 1.0, %v2016_v59  ;;  %v2023_v20 = vmul.f32 %v2016_v59, %v4737_v50  ;;  %v5254_v59 = vld [vmem:[#allocation53_spill] sm:$0xff] }
 0x887   :  { %v2912_v26 = vpop.eup %2911 }
 0x888   :  { %v2022_v34 = vmul.f32 %v2912_v26, %v2021_v16  ;;  %v1491_v16 = vadd.f32 %v5254_v59, %v4553_v14 }
 0x88a   :  { %v4834_v62 = vadd.f32 %v2023_v20, %v2022_v34 }
 0x88c   :  { %2045 = vmatmul.f32.vlgmr.msrb.gmra.mxu0 %v4834_v62  ;;  %2065 = vmatmul.f32.vlgmr.msra.gmra.mxu1 %v4834_v62 }
 0x88d   :  { %2085 = vmatmul.f32.vlgmr.msrb.gmra.mxu2 %v4834_v62  ;;  %2291 = vmatpush.msrb.mxu0 %v4742_v61 }
 0x88e   :  { %2362 = vmatpush.msra.mxu1 %v4648_v5  ;;  %2382 = vmatpush.msrb.mxu2 %v4746_v4  ;;  %v4857_v5 = vld [vmem:[#allocation13 + $0x118] sm:$0xff]  ;;  %v5252_v4 = vld [vmem:[#allocation33_spill] sm:$0xff] }
 0x88f   :  { %2292 = vmatpush.msrb.mxu0 %v4842_v56 }
 0x890   :  { %2363 = vmatpush.msra.mxu1 %v4653_v58  ;;  %2383 = vmatpush.msrb.mxu2 %v4751_v42  ;;  %v4862_v58 = vld [vmem:[#allocation13 + $0x100] sm:$0xff]  ;;  %v1409_v42 = vadd.f32 %v5252_v4, %v5245_v44 }
 0x891   :  { %2293 = vmatpush.msrb.mxu0 %v4847_v22 }
 0x892   :  { %2364 = vmatpush.msra.mxu1 %v4658_v9  ;;  %2384 = vmatpush.msrb.mxu2 %v4756_v31  ;;  %v4867_v9 = vld [vmem:[#allocation13 + $0xe8] sm:$0xff]  ;;  %v5253_v31 = vld [vmem:[#allocation51_spill] sm:$0xff] }
 0x893   :  { %2294 = vmatpush.msrb.mxu0 %v4852_v40 }
 0x894   :  { %2365 = vmatpush.msra.mxu1 %v4663_v11  ;;  %2385 = vmatpush.msrb.mxu2 %v4761_v60  ;;  %v4872_v11 = vld [vmem:[#allocation13 + $0xd0] sm:$0xff]  ;;  %v1450_v60 = vadd.f32 %v5253_v31, %v5243_v19 }
 0x895   :  { %2295 = vmatpush.msrb.mxu0 %v4857_v5 }
 0x896   :  { %2366 = vmatpush.msra.mxu1 %v4668_v35  ;;  %2386 = vmatpush.msrb.mxu2 %v4766_v48  ;;  %v4877_v35 = vld [vmem:[#allocation13 + $0xb8] sm:$0xff] }
 0x897   :  { %2296 = vmatpush.msrb.mxu0 %v4862_v58 }
 0x898   :  { %2367 = vmatpush.msra.mxu1 %v4673_v10  ;;  %2387 = vmatpush.msrb.mxu2 %v4771_v0  ;;  %v4882_v10 = vld [vmem:[#allocation13 + $0xa0] sm:$0xff] }
 0x899   :  { %2297 = vmatpush.msrb.mxu0 %v4867_v9 }
 0x89a   :  { %2368 = vmatpush.msra.mxu1 %v4678_v1  ;;  %2388 = vmatpush.msrb.mxu2 %v4776_v47  ;;  %v4887_v1 = vld [vmem:[#allocation13 + $0x88] sm:$0xff] }
 0x89b   :  { %2298 = vmatpush.msrb.mxu0 %v4872_v11 }
 0x89c   :  { %2369 = vmatpush.msra.mxu1 %v4683_v32  ;;  %2389 = vmatpush.msrb.mxu2 %v4781_v57  ;;  %v4892_v32 = vld [vmem:[#allocation13 + $0x70] sm:$0xff] }
 0x89d   :  { %2299 = vmatpush.msrb.mxu0 %v4877_v35 }
 0x89e   :  { %2370 = vmatpush.msra.mxu1 %v4688_v49  ;;  %2390 = vmatpush.msrb.mxu2 %v4786_v21  ;;  %v4897_v49 = vld [vmem:[#allocation13 + $0x58] sm:$0xff] }
 0x89f   :  { %2300 = vmatpush.msrb.mxu0 %v4882_v10 }
 0x8a0   :  { %2371 = vmatpush.msra.mxu1 %v4693_v2  ;;  %2391 = vmatpush.msrb.mxu2 %v4791_v3  ;;  %v4902_v2 = vld [vmem:[#allocation13 + $0x40] sm:$0xff] }
 0x8a1   :  { %2301 = vmatpush.msrb.mxu0 %v4887_v1 }
 0x8a2   :  { %2372 = vmatpush.msra.mxu1 %v4698_v43  ;;  %2392 = vmatpush.msrb.mxu2 %v4796_v37  ;;  %v4907_v43 = vld [vmem:[#allocation13 + $0x28] sm:$0xff] }
 0x8a3   :  { %2302 = vmatpush.msrb.mxu0 %v4892_v32 }
 0x8a4   :  { %2373 = vmatpush.msra.mxu1 %v4703_v63  ;;  %2393 = vmatpush.msrb.mxu2 %v4801_v52  ;;  %v4912_v63 = vld [vmem:[#allocation13 + $0x10] sm:$0xff] }
 0x8a5   :  { %2303 = vmatpush.msrb.mxu0 %v4897_v49 }
 0x8a6   :  { %2374 = vmatpush.msra.mxu1 %v4708_v46  ;;  %2394 = vmatpush.msrb.mxu2 %v4806_v28 }
 0x8a7   :  { %2304 = vmatpush.msrb.mxu0 %v4902_v2 }
 0x8a8   :  { %2375 = vmatpush.msra.mxu1 %v4713_v27  ;;  %2395 = vmatpush.msrb.mxu2 %v4811_v6 }
 0x8a9   :  { %2305 = vmatpush.msrb.mxu0 %v4907_v43 }
 0x8aa   :  { %2376 = vmatpush.msra.mxu1 %v4718_v36  ;;  %2396 = vmatpush.msrb.mxu2 %v4816_v25 }
 0x8ab   :  { %2306 = vmatpush.msrb.mxu0 %v4912_v63 }
 0x8ac   :  { %2377 = vmatpush.msra.mxu1 %v4723_v51  ;;  %2397 = vmatpush.msrb.mxu2 %v4821_v54 }
 0x909   :  { %v2046_v46 = vpop.f32.mrf.mxu0  ;;  %v2066_v27 = vpop.f32.mrf.mxu1 }
 0x90a   :  { %v2047_v36 = vadd.f32 %v2046_v46, %v5247_v55  ;;  %v2067_v48 = vadd.f32 %v2066_v27, %v5244_v18 }
 0x90c   :  { %v2089_v0 = vadd.f32 %v2047_v36, %v1409_v42  ;;  %v2109_v47 = vadd.f32 %v2067_v48, %v1450_v60 }
 0x90e   :  { %v2746_v57 = vmul.f32 -1.442695, %v2089_v0  ;;  %v2747_v21 = vmul.f32 -1.442695, %v2109_v47  ;;  %v2488_v47 = vld [vmem:[#allocation16 + $0x50] sm:$0xff] }
 0x910   :  { %2913 = vpow2.f32 %v2746_v57  ;;  %v2086_v39 = vpop.f32.mrf.mxu2 }
 0x911   :  { %2915 = vpow2.f32 %v2747_v21  ;;  %v2087_v53 = vadd.f32 %v2086_v39, %v5248_v45  ;;  %v2487_v21 = vld [vmem:[#allocation16 + $0x48] sm:$0xff] }
 0x916   :  { %v2914_v51 = vpop.eup %2913 }
 0x917   :  { %v2916_v3 = vpop.eup %2915  ;;  %v2093_v37 = vadd.f32 1.0, %v2914_v51 }
 0x918   :  { %v2113_v52 = vadd.f32 1.0, %v2916_v3  ;;  %v2486_v3 = vld [vmem:[#allocation16 + $0x40] sm:$0xff] }
 0x919   :  { %2917 = vrcp.f32 %v2093_v37  ;;  %v2105_v23 = vand.u32 2147483648, %v2093_v37  ;;  %v2103_v24 = vand.u32 2147483647, %v2093_v37  ;;  %vm2099_vm1 = vweird.f32 %v2093_v37 }
 0x91a   :  { %2919 = vrcp.f32 %v2113_v52  ;;  %v2125_v26 = vand.u32 2147483648, %v2113_v52  ;;  %vm2119_vm5 = vweird.f32 %v2113_v52  ;;  %v2123_v20 = vand.u32 2147483647, %v2113_v52 }
 0x91b   :  { %v2106_v17 = vor.u32 1.1754944e-38, %v2105_v23  ;;  %vm2104_vm3 = vcmp.eq.f32.partialorder %v2103_v24, 8.507059e+37  ;;  %v2481_v23 = vld [vmem:[#allocation16 + $0x18] sm:$0xff] }
 0x91c   :  { %v2126_v4 = vor.u32 1.1754944e-38, %v2125_v26  ;;  %vm2124_vm7 = vcmp.eq.f32.partialorder %v2123_v20, 8.507059e+37 }
 0x91f   :  { %v2918_v28 = vpop.eup %2917 }
 0x920   :  { %v2920_v6 = vpop.eup %2919  ;;  %v2095_v25 = vmul.f32 %v2918_v28, %v2093_v37  ;;  %vm2100_vm0 = vweird.f32 %v2918_v28 }
 0x921   :  { %v2115_v54 = vmul.f32 %v2920_v6, %v2113_v52  ;;  %vm2101_vm2 = vmor %vm2099_vm1, %vm2100_vm0  ;;  %vm2120_vm4 = vweird.f32 %v2920_v6  ;;  %v2485_v52 = vld [vmem:[#allocation16 + $0x38] sm:$0xff] }
 0x922   :  { %v2096_v8 = vsub.f32 1.0, %v2095_v25  ;;  %vm2121_vm6 = vmor %vm2119_vm5, %vm2120_vm4  ;;  %v2483_v25 = vld [vmem:[#allocation16 + $0x28] sm:$0xff] }
 0x923   :  { %v2116_v30 = vsub.f32 1.0, %v2115_v54 }
 0x924   :  { %v2097_v41 = vmul.f32 %v2918_v28, %v2096_v8  ;;  %v2482_v8 = vld [vmem:[#allocation16 + $0x20] sm:$0xff] }
 0x925   :  { %v2117_v33 = vmul.f32 %v2920_v6, %v2116_v30 }
 0x926   :  { %v2098_v7 = vadd.f32 %v2918_v28, %v2097_v41  ;;  %v2480_v41 = vld [vmem:[#allocation16 + $0x10] sm:$0xff] }
 0x927   :  { %v2118_v12 = vadd.f32 %v2920_v6, %v2117_v33  ;;  %v2479_v33 = vld [vmem:[#allocation16 + $0x8] sm:$0xff] }
 0x928   :  { %v2102_v15 = vsel %vm2101_vm2, %v2918_v28, %v2098_v7  ;;  %v2484_v28 = vld [vmem:[#allocation16 + $0x30] sm:$0xff] }
 0x929   :  { %v2107_v38 = vsel %vm2104_vm3, %v2106_v17, %v2102_v15  ;;  %v2122_v27 = vsel %vm2121_vm6, %v2920_v6, %v2118_v12  ;;  %v2478_v17 = vld [vmem:[#allocation16] sm:$0xff] }
 0x92a   :  { %v2129_v34 = vmul.f32 %v2107_v38, %v2087_v53  ;;  %v2127_v42 = vsel %vm2124_vm7, %v2126_v4, %v2122_v27 }
 0x92b   :  { %v2132_v31 = vsub.f32 1.0, %v2127_v42  ;;  %v2134_v48 = vmul.f32 %v2127_v42, %v4834_v62 }
 0x92c   :  { %v2130_v46 = vadd.f32 %v2129_v34, %v1491_v16 }
 0x92e   :  { %2921 = vtanh.f32 %v2130_v46 }
 0x934   :  { %v2922_v60 = vpop.eup %2921 }
 0x935   :  { %v2133_v36 = vmul.f32 %v2922_v60, %v2132_v31  ;;  %v5257_v31 = vld [vmem:[#allocation25_spill] sm:$0xff] }
 0x936   :  { %v1494_v60 = vadd.f32 %v5257_v31, %v4553_v14 }
 0x937   :  { %v4927_v0 = vadd.f32 %v2134_v48, %v2133_v36 }
 0x939   :  { %2156 = vmatmul.f32.vlgmr.msrb.gmra.mxu3 %v4927_v0  ;;  %2176 = vmatmul.f32.vlgmr.msra.gmra.mxu0 %v4927_v0 }
 0x93a   :  { %2196 = vmatmul.f32.vlgmr.msrb.gmra.mxu1 %v4927_v0  ;;  %2402 = vmatpush.msrb.mxu3 %v4742_v61 }
 0x93c   :  { %2403 = vmatpush.msrb.mxu3 %v4842_v56  ;;  %v5255_v56 = vld [vmem:[#allocation38_spill] sm:$0xff] }
 0x93e   :  { %2404 = vmatpush.msrb.mxu3 %v4847_v22  ;;  %v1453_v22 = vadd.f32 %v5255_v56, %v5243_v19 }
 0x940   :  { %2405 = vmatpush.msrb.mxu3 %v4852_v40 }
 0x942   :  { %2406 = vmatpush.msrb.mxu3 %v4857_v5  ;;  %v2493_v5 = vld [vmem:[#allocation16 + $0x78] sm:$0xff] }
 0x943   :  { %2498 = vmatpush.msra.mxu0 %v2493_v5 }
 0x944   :  { %2407 = vmatpush.msrb.mxu3 %v4862_v58 }
 0x946   :  { %2408 = vmatpush.msrb.mxu3 %v4867_v9  ;;  %v2492_v9 = vld [vmem:[#allocation16 + $0x70] sm:$0xff] }
 0x947   :  { %2499 = vmatpush.msra.mxu0 %v2492_v9 }
 0x948   :  { %2409 = vmatpush.msrb.mxu3 %v4872_v11 }
 0x94a   :  { %2410 = vmatpush.msrb.mxu3 %v4877_v35  ;;  %v2491_v35 = vld [vmem:[#allocation16 + $0x68] sm:$0xff] }
 0x94b   :  { %2500 = vmatpush.msra.mxu0 %v2491_v35 }
 0x94c   :  { %2411 = vmatpush.msrb.mxu3 %v4882_v10 }
 0x94e   :  { %2412 = vmatpush.msrb.mxu3 %v4887_v1  ;;  %v5256_v1 = vld [vmem:[#allocation42_spill] sm:$0xff] }
 0x950   :  { %2413 = vmatpush.msrb.mxu3 %v4892_v32  ;;  %v1412_v32 = vadd.f32 %v5256_v1, %v5245_v44 }
 0x952   :  { %2414 = vmatpush.msrb.mxu3 %v4897_v49 }
 0x954   :  { %2415 = vmatpush.msrb.mxu3 %v4902_v2  ;;  %v2490_v2 = vld [vmem:[#allocation16 + $0x60] sm:$0xff] }
 0x955   :  { %2501 = vmatpush.msra.mxu0 %v2490_v2  ;;  %v4972_v2 = vld [vmem:[%s5060_s10] ss:$0 sm:$0xff]  ;;  %s3322_s10 = smov [#allocation18]  }
 0x956   :  { %2416 = vmatpush.msrb.mxu3 %v4907_v43  ;;  %v2489_v43 = vld [vmem:[#allocation16 + $0x58] sm:$0xff]  ;;  %s2703_s17 = sshll.u32 %s3322_s10, 4  ;;  %s2704_s17 = int_to_ptr.vmem [resolvable:$true] %s2703_s17 }
 0x957   :  { %2502 = vmatpush.msra.mxu0 %v2489_v43 }
 0x958   :  { %2417 = vmatpush.msrb.mxu3 %v4912_v63 }
 0x959   :  { %2503 = vmatpush.msra.mxu0 %v2488_v47 }
 0x95b   :  { %2504 = vmatpush.msra.mxu0 %v2487_v21 }
 0x95d   :  { %2505 = vmatpush.msra.mxu0 %v2486_v3 }
 0x95f   :  { %2506 = vmatpush.msra.mxu0 %v2485_v52 }
 0x961   :  { %2507 = vmatpush.msra.mxu0 %v2484_v28 }
 0x963   :  { %2508 = vmatpush.msra.mxu0 %v2483_v25 }
 0x965   :  { %2509 = vmatpush.msra.mxu0 %v2482_v8 }
 0x967   :  { %2510 = vmatpush.msra.mxu0 %v2481_v23 }
 0x969   :  { %2511 = vmatpush.msra.mxu0 %v2480_v41 }
 0x96b   :  { %2512 = vmatpush.msra.mxu0 %v2479_v33 }
 0x96d   :  { %2513 = vmatpush.msra.mxu0 %v2478_v17 }
 0x9b6   :  { %v2177_v61 = vpop.f32.mrf.mxu0 }
 0x9b7   :  { %v2178_v40 = vadd.f32 %v2177_v61, %v5244_v18  ;;  %v2197_v26 = vpop.f32.mrf.mxu1 }
 0x9b8   :  { %v2198_v46 = vadd.f32 %v2197_v26, %v5248_v45 }
 0x9b9   :  { %v2220_v58 = vadd.f32 %v2178_v40, %v1453_v22 }
 0x9bb   :  { %v2749_v11 = vmul.f32 -1.442695, %v2220_v58 }
 0x9bc   :  { %v2157_v10 = vpop.f32.mrf.mxu3 }
 0x9bd   :  { %2923 = vpow2.f32 %v2749_v11  ;;  %v2158_v49 = vadd.f32 %v2157_v10, %v5247_v55 }
 0x9bf   :  { %v2200_v63 = vadd.f32 %v2158_v49, %v1412_v32 }
 0x9c1   :  { %v2748_v57 = vmul.f32 -1.442695, %v2200_v63 }
 0x9c3   :  { %v2924_v51 = vpop.eup %2923  ;;  %2925 = vpow2.f32 %v2748_v57 }
 0x9c4   :  { %v2224_v37 = vadd.f32 1.0, %v2924_v51 }
 0x9c6   :  { %2927 = vrcp.f32 %v2224_v37  ;;  %v2236_v36 = vand.u32 2147483648, %v2224_v37  ;;  %vm2230_vm13 = vweird.f32 %v2224_v37  ;;  %v2234_v61 = vand.u32 2147483647, %v2224_v37 }
 0x9c8   :  { %v2237_v40 = vor.u32 1.1754944e-38, %v2236_v36  ;;  %vm2235_vm15 = vcmp.eq.f32.partialorder %v2234_v61, 8.507059e+37 }
 0x9c9   :  { %v2926_v6 = vpop.eup %2925 }
 0x9ca   :  { %v2204_v54 = vadd.f32 1.0, %v2926_v6 }
 0x9cc   :  { %2929 = vrcp.f32 %v2204_v54  ;;  %v2928_v30 = vpop.eup %2927  ;;  %v2216_v38 = vand.u32 2147483648, %v2204_v54  ;;  %v2214_v59 = vand.u32 2147483647, %v2204_v54  ;;  %vm2210_vm9 = vweird.f32 %v2204_v54 }
 0x9cd   :  { %v2226_v24 = vmul.f32 %v2928_v30, %v2224_v37  ;;  %vm2231_vm12 = vweird.f32 %v2928_v30 }
 0x9ce   :  { %v2217_v20 = vor.u32 1.1754944e-38, %v2216_v38  ;;  %vm2215_vm11 = vcmp.eq.f32.partialorder %v2214_v59, 8.507059e+37  ;;  %vm2232_vm14 = vmor %vm2230_vm13, %vm2231_vm12 }
 0x9cf   :  { %v2227_v53 = vsub.f32 1.0, %v2226_v24 }
 0x9d1   :  { %v2228_v16 = vmul.f32 %v2928_v30, %v2227_v53 }
 0x9d2   :  { %v2930_v39 = vpop.eup %2929 }
 0x9d3   :  { %v2206_v7 = vmul.f32 %v2930_v39, %v2204_v54  ;;  %vm2211_vm8 = vweird.f32 %v2930_v39  ;;  %v2229_v42 = vadd.f32 %v2928_v30, %v2228_v16 }
 0x9d4   :  { %vm2212_vm10 = vmor %vm2210_vm9, %vm2211_vm8 }
 0x9d5   :  { %v2207_v15 = vsub.f32 1.0, %v2206_v7  ;;  %v2233_v22 = vsel %vm2232_vm14, %v2928_v30, %v2229_v42 }
 0x9d6   :  { %v2238_v5 = vsel %vm2235_vm15, %v2237_v40, %v2233_v22 }
 0x9d7   :  { %v2208_v12 = vmul.f32 %v2930_v39, %v2207_v15  ;;  %v2243_v58 = vsub.f32 1.0, %v2238_v5  ;;  %v2245_v35 = vmul.f32 %v2238_v5, %v4927_v0 }
 0x9d9   :  { %v2209_v34 = vadd.f32 %v2930_v39, %v2208_v12 }
 0x9db   :  { %v2213_v27 = vsel %vm2212_vm10, %v2930_v39, %v2209_v34 }
 0x9dc   :  { %v2218_v4 = vsel %vm2215_vm11, %v2217_v20, %v2213_v27  ;;  %v5260_v20 = vld [vmem:[#allocation54_spill] sm:$0xff] }
 0x9dd   :  { %v2240_v48 = vmul.f32 %v2218_v4, %v2198_v46  ;;  %v1497_v46 = vadd.f32 %v5260_v20, %v4553_v14 }
 0x9df   :  { %v2241_v56 = vadd.f32 %v2240_v48, %v1494_v60 }
 0x9e1   :  { %2931 = vtanh.f32 %v2241_v56 }
 0x9e7   :  { %v2932_v9 = vpop.eup %2931 }
 0x9e8   :  { %v2244_v11 = vmul.f32 %v2932_v9, %v2243_v58 }
 0x9ea   :  { %v4958_v10 = vadd.f32 %v2245_v35, %v2244_v11 }
 0x9ec   :  { %2267 = vmatmul.f32.vlgmr.msra.gmra.mxu2 %v4958_v10  ;;  %2287 = vmatmul.f32.vlgmr.msra.gmra.mxu3 %v4958_v10 }
 0x9ed   :  { %2307 = vmatmul.f32.vlgmr.msrb.gmra.mxu0 %v4958_v10 }
 0x9f5   :  { %2514 = vmatmul.f32.vlgmr.msra.gmra.mxu0 %v4557_v13  ;;  %v5258_v13 = vld [vmem:[#allocation49_spill] sm:$0xff] }
 0x9f6   :  { %v1415_v43 = vadd.f32 %v5258_v13, %v5245_v44 }
 0x9fd   :  { %2517 = vmatmul.f32.gmra.mxu0 %v4642_v29  ;;  %v5259_v29 = vld [vmem:[#allocation55_spill] sm:$0xff] }
 0xa05   :  { %2520 = vmatmul.f32.gmra.mxu0 %v4737_v50  ;;  %v1456_v50 = vadd.f32 %v5259_v29, %v5243_v19 }
 0xa0d   :  { %2523 = vmatmul.f32.gmra.mxu0 %v4834_v62 }
 0xa15   :  { %2526 = vmatmul.f32.gmra.mxu0 %v4927_v0 }
 0xa1d   :  { %2529 = vmatmul.f32.gmra.mxu0 %v4958_v10 }
 0xa6a   :  { %v2308_v1 = vpop.f32.mrf.mxu0 }
 0xa6b   :  { %v2309_v27 = vadd.f32 %v2308_v1, %v5248_v45 }
 0xa6f   :  { %v2268_v32 = vpop.f32.mrf.mxu2  ;;  %v2288_v49 = vpop.f32.mrf.mxu3 }
 0xa70   :  { %v2269_v62 = vadd.f32 %v2268_v32, %v5247_v55  ;;  %v2289_v0 = vadd.f32 %v2288_v49, %v5244_v18 }
 0xa72   :  { %v2311_v63 = vadd.f32 %v2269_v62, %v1415_v43  ;;  %v2331_v47 = vadd.f32 %v2289_v0, %v1456_v50  ;;  %v2515_v57 = vpop.f32.mrf.mxu0 }
 0xa73   :  { %v2516_v21 = vadd.f32 %v4972_v2, %v2515_v57 }
 0xa74   :  { %v2750_v51 = vmul.f32 -1.442695, %v2311_v63  ;;  %v2751_v3 = vmul.f32 -1.442695, %v2331_v47 }
 0xa75   :  { %v2754_v37 = vmul.f32 -1.442695, %v2516_v21 }
 0xa76   :  { %2933 = vpow2.f32 %v2750_v51 }
 0xa77   :  { %2935 = vpow2.f32 %v2751_v3 }
 0xa78   :  { %2937 = vpow2.f32 %v2754_v37 }
 0xa7a   :  { %v2518_v52 = vpop.f32.mrf.mxu0 }
 0xa7b   :  { %v2519_v28 = vadd.f32 %v4972_v2, %v2518_v52 }
 0xa7c   :  { %v2934_v6 = vpop.eup %2933 }
 0xa7d   :  { %v2936_v25 = vpop.eup %2935  ;;  %v2315_v54 = vadd.f32 1.0, %v2934_v6  ;;  %v2755_v8 = vmul.f32 -1.442695, %v2519_v28 }
 0xa7e   :  { %v2938_v30 = vpop.eup %2937  ;;  %v4982_v23 = vadd.f32 1.0, %v2936_v25 }
 0xa7f   :  { %2939 = vrcp.f32 %v2315_v54  ;;  %v2563_v41 = vadd.f32 1.0, %v2938_v30  ;;  %v2325_v16 = vand.u32 2147483647, %v2315_v54  ;;  %v2327_v26 = vand.u32 2147483648, %v2315_v54 }
 0xa80   :  { %2941 = vrcp.f32 %v4982_v23  ;;  %vm2321_vm0 = vweird.f32 %v2315_v54  ;;  %v2347_v48 = vand.u32 2147483648, %v4982_v23  ;;  %v2345_v0 = vand.u32 2147483647, %v4982_v23 }
 0xa81   :  { %2943 = vpow2.f32 %v2755_v8  ;;  %vm2326_vm2 = vcmp.eq.f32.partialorder %v2325_v16, 8.507059e+37  ;;  %v2328_v40 = vor.u32 1.1754944e-38, %v2327_v26  ;;  %v2582_v5 = vand.u32 2147483648, %v2563_v41 }
 0xa82   :  { %2945 = vrcp.f32 %v2563_v41  ;;  %v2521_v24 = vpop.f32.mrf.mxu0  ;;  %v2580_v11 = vand.u32 2147483647, %v2563_v41  ;;  %vm2576_vm6 = vweird.f32 %v2563_v41  ;;  %vm2341_vm8 = vweird.f32 %v4982_v23 }
 0xa83   :  { %v2522_v33 = vadd.f32 %v4972_v2, %v2521_v24  ;;  %v2583_v62 = vor.u32 1.1754944e-38, %v2582_v5  ;;  %v2348_v6 = vor.u32 1.1754944e-38, %v2347_v48  ;;  %vm2346_vm11 = vcmp.eq.f32.partialorder %v2345_v0, 8.507059e+37 }
 0xa84   :  { %vm2581_vm9 = vcmp.eq.f32.partialorder %v2580_v11, 8.507059e+37 }
 0xa85   :  { %v2940_v39 = vpop.eup %2939  ;;  %v2756_v7 = vmul.f32 -1.442695, %v2522_v33 }
 0xa86   :  { %v4986_v17 = vpop.eup %2941  ;;  %v2317_v53 = vmul.f32 %v2940_v39, %v2315_v54  ;;  %vm2322_vm1 = vweird.f32 %v2940_v39 }
 0xa87   :  { %v2944_v15 = vpop.eup %2943  ;;  %v2337_v38 = vmul.f32 %v4986_v17, %v4982_v23  ;;  %2947 = vpow2.f32 %v2756_v7  ;;  %vm2323_vm3 = vmor %vm2321_vm0, %vm2322_vm1  ;;  %vm2342_vm5 = vweird.f32 %v4986_v17 }
 0xa88   :  { %v2946_v12 = vpop.eup %2945  ;;  %v2318_v59 = vsub.f32 1.0, %v2317_v53  ;;  %v4990_v34 = vadd.f32 1.0, %v2944_v15  ;;  %vm5009_vm10 = vmor %vm2341_vm8, %vm2342_vm5 }
 0xa89   :  { %v2338_v4 = vsub.f32 1.0, %v2337_v38  ;;  %v2572_v42 = vmul.f32 %v2946_v12, %v2563_v41  ;;  %vm2577_vm4 = vweird.f32 %v2946_v12 }
 0xa8a   :  { %v2319_v31 = vmul.f32 %v2940_v39, %v2318_v59  ;;  %2949 = vrcp.f32 %v4990_v34  ;;  %v2524_v60 = vpop.f32.mrf.mxu0  ;;  %vm2578_vm7 = vmor %vm2576_vm6, %vm2577_vm4  ;;  %v2597_v25 = vand.u32 2147483648, %v4990_v34  ;;  %v2595_v30 = vand.u32 2147483647, %v4990_v34 }
 0xa8b   :  { %v2339_v36 = vmul.f32 %v4986_v17, %v2338_v4  ;;  %v2573_v61 = vsub.f32 1.0, %v2572_v42  ;;  %v2525_v56 = vadd.f32 %v4972_v2, %v2524_v60  ;;  %vm2591_vm13 = vweird.f32 %v4990_v34 }
 0xa8c   :  { %v2320_v22 = vadd.f32 %v2940_v39, %v2319_v31  ;;  %vm2596_vm15 = vcmp.eq.f32.partialorder %v2595_v30, 8.507059e+37 }
 0xa8d   :  { %v2948_v58 = vpop.eup %2947  ;;  %v2574_v9 = vmul.f32 %v2946_v12, %v2573_v61  ;;  %v2757_v35 = vmul.f32 -1.442695, %v2525_v56  ;;  %v2340_v43 = vadd.f32 %v4986_v17, %v2339_v36 }
 0xa8e   :  { %v2324_v1 = vsel %vm2323_vm3, %v2940_v39, %v2320_v22  ;;  %v5000_v32 = vadd.f32 1.0, %v2948_v58 }
 0xa8f   :  { %v2329_v49 = vsel %vm2326_vm2, %v2328_v40, %v2324_v1  ;;  %v2575_v13 = vadd.f32 %v2946_v12, %v2574_v9  ;;  %2951 = vpow2.f32 %v2757_v35  ;;  %v2344_v28 = vsel %vm5009_vm10, %v4986_v17, %v2340_v43 }
 0xa90   :  { %v2950_v29 = vpop.eup %2949  ;;  %v2351_v50 = vmul.f32 %v2329_v49, %v2309_v27  ;;  %2953 = vrcp.f32 %v5000_v32  ;;  %v2349_v33 = vsel %vm2346_vm11, %v2348_v6, %v2344_v28  ;;  %v2598_v17 = vor.u32 1.1754944e-38, %v2597_v25 }
 0xa91   :  { %v2579_v63 = vsel %vm2578_vm7, %v2946_v12, %v2575_v13  ;;  %v2587_v47 = vmul.f32 %v2950_v29, %v4990_v34  ;;  %vm2592_vm12 = vweird.f32 %v2950_v29  ;;  %v2354_v38 = vsub.f32 1.0, %v2349_v33 }
 0xa92   :  { %v2584_v21 = vsel %vm2581_vm9, %v2583_v62, %v2579_v63  ;;  %v2527_v51 = vpop.f32.mrf.mxu0  ;;  %v2352_v3 = vadd.f32 %v2351_v50, %v1497_v46  ;;  %vm2593_vm14 = vmor %vm2591_vm13, %vm2592_vm12  ;;  %v2610_v16 = vand.u32 2147483647, %v5000_v32  ;;  %v2612_v26 = vand.u32 2147483648, %v5000_v32 }
 0xa93   :  { %2691 = vst [vmem:[#allocation18] sm:$0xff] %v2584_v21  ;;  %v2588_v37 = vsub.f32 1.0, %v2587_v47  ;;  %v2528_v52 = vadd.f32 %v4972_v2, %v2527_v51  ;;  %v2356_v46 = vmul.f32 %v2349_v33, %v4958_v10  ;;  %vm2606_vm1 = vweird.f32 %v5000_v32  ;;  %v5263_v33 = vld [vmem:[#allocation50_spill] sm:$0xff] }
 0xa94   :  { %2955 = vtanh.f32 %v2352_v3  ;;  %v2613_v61 = vor.u32 1.1754944e-38, %v2612_v26  ;;  %vm2611_vm3 = vcmp.eq.f32.partialorder %v2610_v16, 8.507059e+37  ;;  %v5264_v16 = vld [vmem:[#allocation29_spill] sm:$0xff] }
 0xa95   :  { %v2952_v54 = vpop.eup %2951  ;;  %v2589_v8 = vmul.f32 %v2950_v29, %v2588_v37  ;;  %v2758_v23 = vmul.f32 -1.442695, %v2528_v52  ;;  %v1459_v26 = vadd.f32 %v5264_v16, %v5243_v19 }
 0xa96   :  { %v2954_v41 = vpop.eup %2953  ;;  %v2566_v24 = vadd.f32 1.0, %v2952_v54 }
 0xa97   :  { %v2590_v39 = vadd.f32 %v2950_v29, %v2589_v8  ;;  %v2602_v7 = vmul.f32 %v2954_v41, %v5000_v32  ;;  %2957 = vpow2.f32 %v2758_v23  ;;  %vm2607_vm0 = vweird.f32 %v2954_v41 }
 0xa98   :  { %2959 = vrcp.f32 %v2566_v24  ;;  %vm2608_vm2 = vmor %vm2606_vm1, %vm2607_vm0  ;;  %v2627_v58 = vand.u32 2147483648, %v2566_v24  ;;  %v2625_v11 = vand.u32 2147483647, %v2566_v24  ;;  %vm2621_vm5 = vweird.f32 %v2566_v24 }
 0xa99   :  { %v2594_v53 = vsel %vm2593_vm14, %v2950_v29, %v2590_v39  ;;  %v2603_v15 = vsub.f32 1.0, %v2602_v7  ;;  %v1418_v39 = vadd.f32 %v5263_v33, %v5245_v44 }
 0xa9a   :  { %v2956_v12 = vpop.eup %2955  ;;  %v2599_v59 = vsel %vm2596_vm15, %v2598_v17, %v2594_v53  ;;  %v2530_v20 = vpop.f32.mrf.mxu0  ;;  %v2628_v49 = vor.u32 1.1754944e-38, %v2627_v58  ;;  %vm2626_vm7 = vcmp.eq.f32.partialorder %v2625_v11, 8.507059e+37 }
 0xa9b   :  { %2692 = vst [vmem:[#allocation18 + $0x8] sm:$0xff] %v2599_v59  ;;  %v2604_v34 = vmul.f32 %v2954_v41, %v2603_v15  ;;  %v2531_v27 = vadd.f32 %v4972_v2, %v2530_v20  ;;  %v2355_v4 = vmul.f32 %v2956_v12, %v2354_v38 }
 0xa9d   :  { %v2958_v42 = vpop.eup %2957  ;;  %v2605_v31 = vadd.f32 %v2954_v41, %v2604_v34  ;;  %v2759_v60 = vmul.f32 -1.442695, %v2531_v27  ;;  %v5026_v36 = vadd.f32 %v2356_v46, %v2355_v4 }
 0xa9e   :  { %v2960_v48 = vpop.eup %2959  ;;  %v2567_v56 = vadd.f32 1.0, %v2958_v42 }
 0xa9f   :  { %v2609_v22 = vsel %vm2608_vm2, %v2954_v41, %v2605_v31  ;;  %v2617_v10 = vmul.f32 %v2960_v48, %v2566_v24  ;;  %2961 = vpow2.f32 %v2759_v60  ;;  %2378 = vmatmul.f32.vlgmr.msra.gmra.mxu1 %v5026_v36  ;;  %2398 = vmatmul.f32.vlgmr.msrb.gmra.mxu2 %v5026_v36  ;;  %vm2622_vm4 = vweird.f32 %v2960_v48 }
 0xaa0   :  { %v2614_v40 = vsel %vm2611_vm3, %v2613_v61, %v2609_v22  ;;  %2963 = vrcp.f32 %v2567_v56  ;;  %2418 = vmatmul.f32.vlgmr.msrb.gmra.mxu3 %v5026_v36  ;;  %2532 = vmatmul.f32.gmra.mxu0 %v5026_v36  ;;  %vm2623_vm6 = vmor %vm2621_vm5, %vm2622_vm4  ;;  %v2642_v0 = vand.u32 2147483648, %v2567_v56  ;;  %v2640_v47 = vand.u32 2147483647, %v2567_v56 }
 0xaa1   :  { %2693 = vst [vmem:[#allocation18 + $0x10] sm:$0xff] %v2614_v40  ;;  %v2618_v5 = vsub.f32 1.0, %v2617_v10  ;;  %vm2636_vm9 = vweird.f32 %v2567_v56 }
 0xaa2   :  { %v2643_v51 = vor.u32 1.1754944e-38, %v2642_v0  ;;  %vm2641_vm11 = vcmp.eq.f32.partialorder %v2640_v47, 8.507059e+37  ;;  %v5265_v47 = vld [vmem:[#allocation41_spill] sm:$0xff] }
 0xaa3   :  { %v2619_v9 = vmul.f32 %v2960_v48, %v2618_v5 }
 0xaa5   :  { %v2962_v35 = vpop.eup %2961  ;;  %v2620_v1 = vadd.f32 %v2960_v48, %v2619_v9 }
 0xaa6   :  { %v2964_v32 = vpop.eup %2963  ;;  %v2568_v13 = vadd.f32 1.0, %v2962_v35 }
 0xaa7   :  { %v2624_v43 = vsel %vm2623_vm6, %v2960_v48, %v2620_v1  ;;  %v2632_v29 = vmul.f32 %v2964_v32, %v2567_v56  ;;  %vm2637_vm8 = vweird.f32 %v2964_v32 }
 0xaa8   :  { %v2629_v50 = vsel %vm2626_vm7, %v2628_v49, %v2624_v43  ;;  %2965 = vrcp.f32 %v2568_v13  ;;  %vm2638_vm10 = vmor %vm2636_vm9, %vm2637_vm8  ;;  %v2657_v6 = vand.u32 2147483648, %v2568_v13  ;;  %v2655_v54 = vand.u32 2147483647, %v2568_v13 }
 0xaa9   :  { %2694 = vst [vmem:[#allocation18 + $0x18] sm:$0xff] %v2629_v50  ;;  %v2633_v62 = vsub.f32 1.0, %v2632_v29  ;;  %vm2651_vm13 = vweird.f32 %v2568_v13 }
 0xaaa   :  { %v2658_v30 = vor.u32 1.1754944e-38, %v2657_v6  ;;  %vm2656_vm15 = vcmp.eq.f32.partialorder %v2655_v54, 8.507059e+37 }
 0xaab   :  { %v2634_v63 = vmul.f32 %v2964_v32, %v2633_v62 }
 0xaad   :  { %v2635_v57 = vadd.f32 %v2964_v32, %v2634_v63 }
 0xaae   :  { %v2966_v21 = vpop.eup %2965 }
 0xaaf   :  { %v2639_v3 = vsel %vm2638_vm10, %v2964_v32, %v2635_v57  ;;  %v2647_v37 = vmul.f32 %v2966_v21, %v2568_v13  ;;  %vm2652_vm12 = vweird.f32 %v2966_v21  ;;  %v1500_v57 = vadd.f32 %v5265_v47, %v4553_v14 }
 0xab0   :  { %v2644_v52 = vsel %vm2641_vm11, %v2643_v51, %v2639_v3  ;;  %vm2653_vm14 = vmor %vm2651_vm13, %vm2652_vm12 }
 0xab1   :  { %2695 = vst [vmem:[#allocation18 + $0x20] sm:$0xff] %v2644_v52  ;;  %v2648_v28 = vsub.f32 1.0, %v2647_v37 }
 0xab3   :  { %v2649_v25 = vmul.f32 %v2966_v21, %v2648_v28 }
 0xab5   :  { %v2650_v8 = vadd.f32 %v2966_v21, %v2649_v25 }
 0xab7   :  { %v2654_v23 = vsel %vm2653_vm14, %v2966_v21, %v2650_v8 }
 0xab8   :  { %v2659_v41 = vsel %vm2656_vm15, %v2658_v30, %v2654_v23 }
 0xab9   :  { %2696 = vst [vmem:[#allocation18 + $0x28] sm:$0xff] %v2659_v41 }
 0xb1c   :  { %v2379_v24 = vpop.f32.mrf.mxu1 }
 0xb1d   :  { %v2380_v7 = vadd.f32 %v2379_v24, %v5247_v55  ;;  %v2533_v17 = vpop.f32.mrf.mxu0 }
 0xb1e   :  { %v2534_v53 = vadd.f32 %v4972_v2, %v2533_v17 }
 0xb1f   :  { %v2422_v15 = vadd.f32 %v2380_v7, %v1418_v39 }
 0xb20   :  { %v2760_v38 = vmul.f32 -1.442695, %v2534_v53 }
 0xb21   :  { %v2752_v12 = vmul.f32 -1.442695, %v2422_v15 }
 0xb22   :  { %2967 = vpow2.f32 %v2760_v38  ;;  %v2399_v59 = vpop.f32.mrf.mxu2 }
 0xb23   :  { %2969 = vpow2.f32 %v2752_v12  ;;  %v2400_v20 = vadd.f32 %v2399_v59, %v5244_v18  ;;  %v2419_v58 = vpop.f32.mrf.mxu3 }
 0xb24   :  { %v2420_v29 = vadd.f32 %v2419_v58, %v5248_v45 }
 0xb25   :  { %v2442_v46 = vadd.f32 %v2400_v20, %v1459_v26 }
 0xb27   :  { %v2753_v34 = vmul.f32 -1.442695, %v2442_v46 }
 0xb28   :  { %v2968_v27 = vpop.eup %2967 }
 0xb29   :  { %v2970_v44 = vpop.eup %2969  ;;  %v2569_v4 = vadd.f32 1.0, %v2968_v27  ;;  %2971 = vpow2.f32 %v2753_v34 }
 0xb2a   :  { %v2426_v55 = vadd.f32 1.0, %v2970_v44 }
 0xb2b   :  { %2973 = vrcp.f32 %v2569_v4  ;;  %v2672_v22 = vand.u32 2147483648, %v2569_v4  ;;  %v2670_v40 = vand.u32 2147483647, %v2569_v4  ;;  %vm2666_vm2 = vweird.f32 %v2569_v4 }
 0xb2c   :  { %2975 = vrcp.f32 %v2426_v55  ;;  %v2438_v5 = vand.u32 2147483648, %v2426_v55  ;;  %v2436_v11 = vand.u32 2147483647, %v2426_v55  ;;  %vm2432_vm4 = vweird.f32 %v2426_v55 }
 0xb2d   :  { %v2673_v32 = vor.u32 1.1754944e-38, %v2672_v22  ;;  %vm2671_vm5 = vcmp.eq.f32.partialorder %v2670_v40, 8.507059e+37 }
 0xb2e   :  { %v2439_v50 = vor.u32 1.1754944e-38, %v2438_v5  ;;  %vm2437_vm7 = vcmp.eq.f32.partialorder %v2436_v11, 8.507059e+37 }
 0xb2f   :  { %v2972_v42 = vpop.eup %2971 }
 0xb30   :  { %v2446_v31 = vadd.f32 1.0, %v2972_v42 }
 0xb31   :  { %v2974_v60 = vpop.eup %2973 }
 0xb32   :  { %v2976_v48 = vpop.eup %2975  ;;  %v2662_v61 = vmul.f32 %v2974_v60, %v2569_v4  ;;  %2977 = vrcp.f32 %v2446_v31  ;;  %vm2667_vm0 = vweird.f32 %v2974_v60  ;;  %v2458_v37 = vand.u32 2147483648, %v2446_v31 }
 0xb33   :  { %v2428_v56 = vmul.f32 %v2976_v48, %v2426_v55  ;;  %vm2433_vm1 = vweird.f32 %v2976_v48  ;;  %vm2668_vm3 = vmor %vm2666_vm2, %vm2667_vm0  ;;  %v2456_v52 = vand.u32 2147483647, %v2446_v31  ;;  %vm2452_vm9 = vweird.f32 %v2446_v31 }
 0xb34   :  { %v2663_v19 = vsub.f32 1.0, %v2662_v61  ;;  %vm2434_vm6 = vmor %vm2432_vm4, %vm2433_vm1  ;;  %v2459_v25 = vor.u32 1.1754944e-38, %v2458_v37 }
 0xb35   :  { %v2429_v10 = vsub.f32 1.0, %v2428_v56  ;;  %vm2457_vm11 = vcmp.eq.f32.partialorder %v2456_v52, 8.507059e+37 }
 0xb36   :  { %v2664_v18 = vmul.f32 %v2974_v60, %v2663_v19 }
 0xb37   :  { %v2430_v9 = vmul.f32 %v2976_v48, %v2429_v10 }
 0xb38   :  { %v2978_v35 = vpop.eup %2977  ;;  %v2665_v1 = vadd.f32 %v2974_v60, %v2664_v18 }
 0xb39   :  { %v2448_v49 = vmul.f32 %v2978_v35, %v2446_v31  ;;  %v2431_v13 = vadd.f32 %v2976_v48, %v2430_v9  ;;  %vm2453_vm8 = vweird.f32 %v2978_v35 }
 0xb3a   :  { %v2669_v43 = vsel %vm2668_vm3, %v2974_v60, %v2665_v1  ;;  %vm2454_vm10 = vmor %vm2452_vm9, %vm2453_vm8 }
 0xb3b   :  { %v2674_v62 = vsel %vm2671_vm5, %v2673_v32, %v2669_v43  ;;  %v2435_v0 = vsel %vm2434_vm6, %v2976_v48, %v2431_v13  ;;  %v2449_v63 = vsub.f32 1.0, %v2448_v49 }
 0xb3c   :  { %2697 = vst [vmem:[#allocation18 + $0x30] sm:$0xff] %v2674_v62  ;;  %v2440_v21 = vsel %vm2437_vm7, %v2439_v50, %v2435_v0 }
 0xb3d   :  { %v2462_v51 = vmul.f32 %v2440_v21, %v2420_v29  ;;  %v2450_v3 = vmul.f32 %v2978_v35, %v2449_v63 }
 0xb3f   :  { %v2463_v28 = vadd.f32 %v2462_v51, %v1500_v57  ;;  %v2451_v6 = vadd.f32 %v2978_v35, %v2450_v3 }
 0xb41   :  { %2979 = vtanh.f32 %v2463_v28  ;;  %v2455_v45 = vsel %vm2454_vm10, %v2978_v35, %v2451_v6 }
 0xb42   :  { %v2460_v54 = vsel %vm2457_vm11, %v2459_v25, %v2455_v45 }
 0xb43   :  { %v2465_v8 = vsub.f32 1.0, %v2460_v54  ;;  %v2467_v14 = vmul.f32 %v2460_v54, %v5026_v36 }
 0xb47   :  { %v2980_v30 = vpop.eup %2979 }
 0xb48   :  { %v2466_v23 = vmul.f32 %v2980_v30, %v2465_v8 }
 0xb4a   :  { %v2468_v41 = vadd.f32 %v2467_v14, %v2466_v23 }
 0xb4c   :  { %2535 = vmatmul.f32.gmra.mxu0 %v2468_v41 }
 0xbc9   :  { %v2536_v24 = vpop.f32.mrf.mxu0 }
 0xbca   :  { %v2537_v33 = vadd.f32 %v4972_v2, %v2536_v24 }
 0xbcc   :  { %v2761_v39 = vmul.f32 -1.442695, %v2537_v33 }
 0xbce   :  { %2981 = vpow2.f32 %v2761_v39 }
 0xbd4   :  { %v2982_v7 = vpop.eup %2981 }
 0xbd5   :  { %v2570_v17 = vadd.f32 1.0, %v2982_v7 }
 0xbd7   :  { %2983 = vrcp.f32 %v2570_v17  ;;  %v2687_v12 = vand.u32 2147483648, %v2570_v17  ;;  %v2685_v16 = vand.u32 2147483647, %v2570_v17  ;;  %vm2681_vm13 = vweird.f32 %v2570_v17 }
 0xbd9   :  { %v2688_v2 = vor.u32 1.1754944e-38, %v2687_v12  ;;  %vm2686_vm15 = vcmp.eq.f32.partialorder %v2685_v16, 8.507059e+37 }
 0xbdd   :  { %v2984_v53 = vpop.eup %2983 }
 0xbde   :  { %v2677_v15 = vmul.f32 %v2984_v53, %v2570_v17  ;;  %vm2682_vm12 = vweird.f32 %v2984_v53 }
 0xbdf   :  { %vm2683_vm14 = vmor %vm2681_vm13, %vm2682_vm12 }
 0xbe0   :  { %v2678_v38 = vsub.f32 1.0, %v2677_v15 }
 0xbe2   :  { %v2679_v59 = vmul.f32 %v2984_v53, %v2678_v38 }
 0xbe4   :  { %v2680_v36 = vadd.f32 %v2984_v53, %v2679_v59 }
 0xbe6   :  { %v2684_v26 = vsel %vm2683_vm14, %v2984_v53, %v2680_v36 }
 0xbe7   :  { %v2689_v20 = vsel %vm2686_vm15, %v2688_v2, %v2684_v26 }
 0xbe8   :  { %2698 = vst [vmem:[#allocation18 + $0x38] sm:$0xff] %v2689_v20 }
 0xbe9   :  { %2711 = dma.vmem_to_hbm [thread:$0]  %s2704_s17, 1024, %s2706_s0, [#allocation6], %s3315_s18, %s3315_s18, %s3316_s6  }
 0xbea   :  { %3307 = dma.done.wait [#allocation6], 1024  }
 0xbeb   :  { %3308 = vsyncadd [#allocation6], 4294966272 }
 0xbec   :  { %2716 = vsyncpa [#allocation5], 1 }
 0xbed   :  { %2717 = vsyncpa [#allocation8], 1 }
 0xbee   :  { %2718 = vsyncpa [#allocation11], 1 }
 0xbef   :  { %2719 = vsyncpa [#allocation14], 1 }
 0xbf0   :  { %2720 = vsyncpa [#allocation17], 1 }
 0xbf1   :  { %2721 = vsyncpa [#allocation6], 1 }

</bundles_post_ra>
